<compile_context>
chip_gen: v7x
topology: tpu7x:2x2x1
jax: 0.10.0
libtpu: 0.0.40
codegen_flags: <defaults>
</compile_context>

<pallas_src>
import functools

import numpy as np
import jax
import jax.numpy as jnp
from jax.experimental import pallas as pl
from jax.experimental.pallas import tpu as pltpu

# ---------------- HashEmbedding / HashNet hyper-parameters (small) ----------
COORD_DIM = 2
GRID_MIN = -1.0
GRID_MAX = 1.0
N_LEVELS = 4
N_FEATURES = 2                       # F
LOG2_T = 8                           # log2 hashtable size
TABLE_SIZE = 1 << LOG2_T             # T
BASE_RES = 4
FINEST_RES = 32
HIDDEN = 64                          # hidden_features
HIDDEN_LAYERS = 2                    # extra hidden Linear+ReLU layers
OUT_FEATURES = 3
EMBED_DIM = N_LEVELS * N_FEATURES
PAD_OUT = 8                          # output rows padded to one f32 sublane tile

FACTOR = np.exp((np.log(FINEST_RES) - np.log(BASE_RES)) / (N_LEVELS - 1))
RESOLUTIONS = tuple(float(np.floor(BASE_RES * FACTOR ** i)) for i in range(N_LEVELS))

_PRIMES = (1, 2654435761, 805459861)
# wrap primes into int32 range (only low 32 bits matter after the & mask)
PRIMES_I32 = tuple(((p + 2 ** 31) % 2 ** 32) - 2 ** 31 for p in _PRIMES)
HASH_MASK = (1 << LOG2_T) - 1

# corner offsets of a 2D grid cell: (dx, dy)
CORNERS = ((0, 0), (0, 1), (1, 0), (1, 1))


# ------------------------------- Pallas kernel ------------------------------
def hashnet_kernel(coords_ref, tw0_ref, b0_ref, w1_ref, b1_ref, w2_ref, b2_ref,
                   wo_ref, bo_ref, out_ref, *, soft_dtype):
    # coords are fed transposed: (2, TB) with batch on lanes.
    x = coords_ref[...]                                         # (2, TB) f32
    tb = x.shape[1]
    iota_t = jax.lax.broadcasted_iota(jnp.int32, (TABLE_SIZE, tb), 0)
    mask = jnp.int32(HASH_MASK)
    zero = jnp.zeros((), soft_dtype)

    # h0 accumulator: sum over levels of tw0[l] @ soft_l^T  (HIDDEN, TB), f32.
    acc = jnp.zeros((HIDDEN, tb), jnp.float32)

    for lvl in range(N_LEVELS):                                 # unrolled at trace time
        res = RESOLUTIONS[lvl]
        grid_size = (GRID_MAX - GRID_MIN) / res
        bl = jnp.floor((x - GRID_MIN) / grid_size)              # bottom-left vertex idx
        min_v = bl * grid_size + GRID_MIN
        w = (x - min_v) / grid_size                              # (2, TB) bilinear weights
        bl_i = bl.astype(jnp.int32)

        # Hoisted per-axis factors and the 4 corner products (batch on lanes).
        wx1 = w[0:1, :]
        wx0 = 1.0 - wx1
        wy1 = w[1:2, :]
        wy0 = 1.0 - wy1
        corner_w = ((wx0 * wy0).astype(soft_dtype),              # (0,0)
                    (wx0 * wy1).astype(soft_dtype),              # (0,1)
                    (wx1 * wy0).astype(soft_dtype),              # (1,0)
                    (wx1 * wy1).astype(soft_dtype))              # (1,1)

        vx0 = bl_i[0:1, :]
        vy0 = bl_i[1:2, :]

        # Transposed soft one-hot over the hash table: (TABLE_SIZE, TB).
        # NOTE: keep the SUM over corners (collisions must double-count, like
        # the reference gather) -- do not fold into nested selects.
        soft_t = None
        for c, (dx, dy) in enumerate(CORNERS):
            hidx = (((vx0 + dx) * jnp.int32(PRIMES_I32[0])) ^
                    ((vy0 + dy) * jnp.int32(PRIMES_I32[1]))) & mask   # (1, TB) int32
            contrib = jnp.where(hidx == iota_t, corner_w[c], zero)    # (T, TB)
            soft_t = contrib if soft_t is None else soft_t + contrib

        # Per-level matmul against the folded (tables @ w0) block, bf16 operands.
        acc = acc + jnp.dot(tw0_ref[lvl], soft_t.astype(jnp.bfloat16),
                            preferred_element_type=jnp.float32)       # (HIDDEN, TB)

    # --- small MLP, fully in the transposed layout (HIDDEN, TB) ---
    h = jnp.maximum(acc + b0_ref[...], 0.0)                            # f32
    h = jnp.maximum(jnp.dot(w1_ref[...], h.astype(jnp.bfloat16),
                            preferred_element_type=jnp.float32) + b1_ref[...], 0.0)
    h = jnp.maximum(jnp.dot(w2_ref[...], h.astype(jnp.bfloat16),
                            preferred_element_type=jnp.float32) + b2_ref[...], 0.0)

    # Outermost Linear; weights padded to 8 output rows -> full-vst store.
    out = jnp.dot(wo_ref[...], h.astype(jnp.bfloat16),
                  preferred_element_type=jnp.float32) + bo_ref[...]    # (8, TB)
    out_ref[...] = out.astype(out_ref.dtype)


# ------------------------------- parameter packing ---------------------------
def prepare_params(params):
    """One-time host-side packing: fold tables into w0, transpose, cast to bf16."""
    tables, w0, b0, w1, b1, w2, b2, wo, bo = params

    # tw0[l] = (tables[l] @ w0[l*F:(l+1)*F, :]).T   -> (HIDDEN, TABLE_SIZE)
    tw0_blocks = []
    for l in range(N_LEVELS):
        w0_block = w0[l * N_FEATURES:(l + 1) * N_FEATURES, :]          # (F, HIDDEN)
        tw0_blocks.append(jnp.dot(tables[l], w0_block,
                                  precision=jax.lax.Precision.HIGHEST).T)
    tw0 = jnp.stack(tw0_blocks, axis=0).astype(jnp.bfloat16)           # (L, HIDDEN, T)

    b0_t = b0.T.astype(jnp.float32)                                    # (HIDDEN, 1)
    w1_t = w1.T.astype(jnp.bfloat16)                                   # (HIDDEN, HIDDEN)
    b1_t = b1.T.astype(jnp.float32)
    w2_t = w2.T.astype(jnp.bfloat16)
    b2_t = b2.T.astype(jnp.float32)

    wo_pad = jnp.zeros((PAD_OUT, HIDDEN), jnp.bfloat16)
    wo_pad = wo_pad.at[:OUT_FEATURES].set(wo.T.astype(jnp.bfloat16))   # (8, HIDDEN)
    bo_pad = jnp.zeros((PAD_OUT, 1), jnp.float32)
    bo_pad = bo_pad.at[:OUT_FEATURES].set(bo.T)                        # (8, 1)

    return (tw0, b0_t, w1_t, b1_t, w2_t, b2_t, wo_pad, bo_pad)


# ------------------------------- wrapper -------------------------------------
def hashnet_forward(coords, prepped, tile_b=None):
    B = coords.shape[0]
    tw0, b0_t, w1_t, b1_t, w2_t, b2_t, wo_pad, bo_pad = prepped

    kind = jax.devices()[0].device_kind.lower()
    use_bf16_vpu = ("v6" in kind) or ("v7" in kind)
    # bf16 one-hot build only where the VPU has native bf16 (v6e / v7x);
    # MXU operands are bf16 on all generations (cast just before the dot).
    soft_dtype = jnp.bfloat16 if use_bf16_vpu else jnp.float32

    if tile_b is None:
        if "v7" in kind:
            cap = 128        # >=4 grid steps at B=512 -> 2 per TensorCore
        elif use_bf16_vpu:
            cap = 256        # v6e: one full 256-lane MXU N-tile per step
        else:
            cap = 128        # v5e: keep f32 one-hot slabs small
        tile_b = B
        c = cap
        while c >= 128:
            if B % c == 0:
                tile_b = c
                break
            c -= 128
    assert B % tile_b == 0

    coords_t = coords.T                                               # (2, B)

    def full_spec(arr):
        nd = arr.ndim
        return pl.BlockSpec(arr.shape, lambda i, _nd=nd: (0,) * _nd)

    kernel = functools.partial(hashnet_kernel, soft_dtype=soft_dtype)

    flops = int(B * 2 * (N_LEVELS * TABLE_SIZE * HIDDEN
                         + HIDDEN_LAYERS * HIDDEN * HIDDEN
                         + HIDDEN * PAD_OUT))
    weight_bytes = sum(int(a.size) * a.dtype.itemsize
                       for a in (tw0, b0_t, w1_t, b1_t, w2_t, b2_t, wo_pad, bo_pad))
    bytes_accessed = int(B * (COORD_DIM + PAD_OUT) * 4 + weight_bytes)

    out_pad = pl.pallas_call(
        kernel,
        out_shape=jax.ShapeDtypeStruct((PAD_OUT, B), jnp.float32),
        grid=(B // tile_b,),
        in_specs=[
            pl.BlockSpec((COORD_DIM, tile_b), lambda i: (0, i)),
            full_spec(tw0), full_spec(b0_t),
            full_spec(w1_t), full_spec(b1_t),
            full_spec(w2_t), full_spec(b2_t),
            full_spec(wo_pad), full_spec(bo_pad),
        ],
        out_specs=pl.BlockSpec((PAD_OUT, tile_b), lambda i: (0, i)),
        compiler_params=pltpu.CompilerParams(dimension_semantics=("parallel",)),
        cost_estimate=pl.CostEstimate(flops=flops, transcendentals=0,
                                      bytes_accessed=bytes_accessed),
    )(coords_t, tw0, b0_t, w1_t, b1_t, w2_t, b2_t, wo_pad, bo_pad)

    return out_pad[:OUT_FEATURES].T                                   # (B, OUT_FEATURES)


# ------------------------------- pure-JAX reference --------------------------
def hashnet_reference(x, params):
    tables, w0, b0, w1, b1, w2, b2, wo, bo = params
    prec = jax.lax.Precision.HIGHEST
    feats = []
    for lvl in range(N_LEVELS):
        res = RESOLUTIONS[lvl]
        grid_size = (GRID_MAX - GRID_MIN) / res
        bl = jnp.floor((x - GRID_MIN) / grid_size)
        min_v = bl * grid_size + GRID_MIN
        max_v = min_v + grid_size
        w = (x - min_v) / (max_v - min_v)
        bl_i = bl.astype(jnp.int32)
        acc = jnp.zeros((x.shape[0], N_FEATURES), jnp.float32)
        for dx, dy in CORNERS:
            vx = bl_i[:, 0] + dx
            vy = bl_i[:, 1] + dy
            h = ((vx * jnp.int32(PRIMES_I32[0])) ^
                 (vy * jnp.int32(PRIMES_I32[1]))) & jnp.int32(HASH_MASK)
            vals = tables[lvl][h]                                    # gather (B, F)
            wv = ((w[:, 0] if dx else 1.0 - w[:, 0]) *
                  (w[:, 1] if dy else 1.0 - w[:, 1]))
            acc = acc + wv[:, None] * vals
        feats.append(acc)
    emb = jnp.concatenate(feats, axis=-1)
    h = jnp.maximum(jnp.dot(emb, w0, precision=prec) + b0, 0.0)
    h = jnp.maximum(jnp.dot(h, w1, precision=prec) + b1, 0.0)
    h = jnp.maximum(jnp.dot(h, w2, precision=prec) + b2, 0.0)
    return jnp.dot(h, wo, precision=prec) + bo


# ------------------------------- parameter init -------------------------------
def init_params(key):
    ks = jax.random.split(key, 10)
    # nn.Embedding weights ~ U(-1e-4, 1e-4), one table per level, stacked.
    tables = jax.random.uniform(ks[0], (N_LEVELS, TABLE_SIZE, N_FEATURES),
                                jnp.float32, minval=-1e-4, maxval=1e-4)

    def xavier(k, fin, fout):
        a = float(np.sqrt(6.0 / (fin + fout)))
        return jax.random.uniform(k, (fin, fout), jnp.float32, minval=-a, maxval=a)

    def bias(k, fin, fout):
        b = float(1.0 / np.sqrt(fin))
        return jax.random.uniform(k, (1, fout), jnp.float32, minval=-b, maxval=b)

    w0 = xavier(ks[1], EMBED_DIM, HIDDEN); b0 = bias(ks[2], EMBED_DIM, HIDDEN)
    w1 = xavier(ks[3], HIDDEN, HIDDEN);    b1 = bias(ks[4], HIDDEN, HIDDEN)
    w2 = xavier(ks[5], HIDDEN, HIDDEN);    b2 = bias(ks[6], HIDDEN, HIDDEN)
    wo = xavier(ks[7], HIDDEN, OUT_FEATURES); bo = bias(ks[8], HIDDEN, OUT_FEATURES)
    return (tables, w0, b0, w1, b1, w2, b2, wo, bo)


if __name__ == "__main__":
    key = jax.random.PRNGKey(0)
    k_params, k_coords = jax.random.split(key)
    params = init_params(k_params)
    prepped = prepare_params(params)          # one-time packing, outside forward

    B = 512
    coords = jax.random.uniform(k_coords, (B, COORD_DIM), jnp.float32,
                                minval=GRID_MIN, maxval=GRID_MAX)

    out = jax.block_until_ready(hashnet_forward(coords, prepped))
    ref = jax.block_until_ready(hashnet_reference(coords, params))

    assert out.shape == (B, OUT_FEATURES)
    # Kernel uses bf16 MXU operands everywhere (f32 accumulation + f32 bias
    # adds); the reference uses f32/HIGHEST, so allow ~3% tolerance.
    np.testing.assert_allclose(np.asarray(out), np.asarray(ref),
                               rtol=3e-2, atol=3e-2)
    print("KERNEL_OK")
</pallas_src>

<mosaic_0001>
module attributes {stable_mosaic.version = 11 : i64} {
  func.func @hashnet_kernel(%arg0: i32, %arg1: memref<2x128xf32, #tpu.memory_space<vmem>>, %arg2: memref<4x64x256xbf16, #tpu.memory_space<vmem>>, %arg3: memref<64x1xf32, #tpu.memory_space<vmem>>, %arg4: memref<64x64xbf16, #tpu.memory_space<vmem>>, %arg5: memref<64x1xf32, #tpu.memory_space<vmem>>, %arg6: memref<64x64xbf16, #tpu.memory_space<vmem>>, %arg7: memref<64x1xf32, #tpu.memory_space<vmem>>, %arg8: memref<8x64xbf16, #tpu.memory_space<vmem>>, %arg9: memref<8x1xf32, #tpu.memory_space<vmem>>, %arg10: memref<8x128xf32, #tpu.memory_space<vmem>>) attributes {dimension_semantics = [#tpu.dimension_semantics<parallel>], iteration_bounds = array<i64: 4>, scalar_prefetch = 0 : i64, scratch_operands = 0 : i64, tpu.core_type = #tpu.core_type<tc>, window_params = [{transform_indices = @transform_0, window_bounds = array<i64: 2, 128>}, {pipeline_mode = #tpu.pipeline_mode<synchronous>, transform_indices = @transform_1, window_bounds = array<i64: 4, 64, 256>}, {pipeline_mode = #tpu.pipeline_mode<synchronous>, transform_indices = @transform_2, window_bounds = array<i64: 64, 1>}, {pipeline_mode = #tpu.pipeline_mode<synchronous>, transform_indices = @transform_3, window_bounds = array<i64: 64, 64>}, {pipeline_mode = #tpu.pipeline_mode<synchronous>, transform_indices = @transform_4, window_bounds = array<i64: 64, 1>}, {pipeline_mode = #tpu.pipeline_mode<synchronous>, transform_indices = @transform_5, window_bounds = array<i64: 64, 64>}, {pipeline_mode = #tpu.pipeline_mode<synchronous>, transform_indices = @transform_6, window_bounds = array<i64: 64, 1>}, {pipeline_mode = #tpu.pipeline_mode<synchronous>, transform_indices = @transform_7, window_bounds = array<i64: 8, 64>}, {pipeline_mode = #tpu.pipeline_mode<synchronous>, transform_indices = @transform_8, window_bounds = array<i64: 8, 1>}, {transform_indices = @transform_9, window_bounds = array<i64: 8, 128>}]} {
    %c0 = arith.constant 0 : index
    %c0_0 = arith.constant 0 : index
    %0 = vector.load %arg1[%c0, %c0_0] : memref<2x128xf32, #tpu.memory_space<vmem>>, vector<2x128xf32>
    %1 = tpu.iota {dimensions = array<i32: 0>} : vector<256x128xi32>
    %cst = arith.constant 0.000000e+00 : f32
    %2 = vector.broadcast %cst : f32 to vector<64x128xf32>
    %cst_1 = arith.constant -1.000000e+00 : f32
    %3 = vector.broadcast %cst_1 : f32 to vector<2x128xf32>
    %4 = arith.subf %0, %3 : vector<2x128xf32>
    %cst_2 = arith.constant 5.000000e-01 : f32
    %5 = vector.broadcast %cst_2 : f32 to vector<2x128xf32>
    %6 = arith.divf %4, %5 : vector<2x128xf32>
    %7 = math.floor %6 : vector<2x128xf32>
    %cst_3 = arith.constant 5.000000e-01 : f32
    %8 = vector.broadcast %cst_3 : f32 to vector<2x128xf32>
    %9 = arith.mulf %7, %8 : vector<2x128xf32>
    %cst_4 = arith.constant -1.000000e+00 : f32
    %10 = vector.broadcast %cst_4 : f32 to vector<2x128xf32>
    %11 = arith.addf %9, %10 : vector<2x128xf32>
    %12 = arith.subf %0, %11 : vector<2x128xf32>
    %cst_5 = arith.constant 5.000000e-01 : f32
    %13 = vector.broadcast %cst_5 : f32 to vector<2x128xf32>
    %14 = arith.divf %12, %13 : vector<2x128xf32>
    %15 = arith.fptosi %7 : vector<2x128xf32> to vector<2x128xi32>
    %16 = vector.extract_strided_slice %14 {offsets = [0, 0], sizes = [1, 128], strides = [1, 1]} : vector<2x128xf32> to vector<1x128xf32>
    %cst_6 = arith.constant 1.000000e+00 : f32
    %17 = vector.broadcast %cst_6 : f32 to vector<1x128xf32>
    %18 = arith.subf %17, %16 : vector<1x128xf32>
    %19 = vector.extract_strided_slice %14 {offsets = [1, 0], sizes = [1, 128], strides = [1, 1]} : vector<2x128xf32> to vector<1x128xf32>
    %cst_7 = arith.constant 1.000000e+00 : f32
    %20 = vector.broadcast %cst_7 : f32 to vector<1x128xf32>
    %21 = arith.subf %20, %19 : vector<1x128xf32>
    %22 = arith.mulf %18, %21 : vector<1x128xf32>
    %23 = arith.mulf %18, %19 : vector<1x128xf32>
    %24 = arith.mulf %16, %21 : vector<1x128xf32>
    %25 = arith.mulf %16, %19 : vector<1x128xf32>
    %26 = vector.extract_strided_slice %15 {offsets = [0, 0], sizes = [1, 128], strides = [1, 1]} : vector<2x128xi32> to vector<1x128xi32>
    %27 = vector.extract_strided_slice %15 {offsets = [1, 0], sizes = [1, 128], strides = [1, 1]} : vector<2x128xi32> to vector<1x128xi32>
    %c0_i32 = arith.constant 0 : i32
    %28 = vector.broadcast %c0_i32 : i32 to vector<1x128xi32>
    %29 = arith.addi %26, %28 : vector<1x128xi32>
    %c1_i32 = arith.constant 1 : i32
    %30 = vector.broadcast %c1_i32 : i32 to vector<1x128xi32>
    %31 = arith.muli %29, %30 : vector<1x128xi32>
    %c0_i32_8 = arith.constant 0 : i32
    %32 = vector.broadcast %c0_i32_8 : i32 to vector<1x128xi32>
    %33 = arith.addi %27, %32 : vector<1x128xi32>
    %c-1640531535_i32 = arith.constant -1640531535 : i32
    %34 = vector.broadcast %c-1640531535_i32 : i32 to vector<1x128xi32>
    %35 = arith.muli %33, %34 : vector<1x128xi32>
    %36 = arith.xori %31, %35 : vector<1x128xi32>
    %c255_i32 = arith.constant 255 : i32
    %37 = vector.broadcast %c255_i32 : i32 to vector<1x128xi32>
    %38 = arith.andi %36, %37 : vector<1x128xi32>
    %39 = vector.broadcast %38 : vector<1x128xi32> to vector<256x128xi32>
    %40 = arith.cmpi eq, %39, %1 : vector<256x128xi32>
    %cst_9 = arith.constant 0.000000e+00 : f32
    %41 = vector.shape_cast %22 : vector<1x128xf32> to vector<1x128xf32>
    %42 = vector.broadcast %41 : vector<1x128xf32> to vector<256x128xf32>
    %43 = vector.broadcast %cst_9 : f32 to vector<256x128xf32>
    %44 = arith.select %40, %42, %43 : vector<256x128xi1>, vector<256x128xf32>
    %c0_i32_10 = arith.constant 0 : i32
    %45 = vector.broadcast %c0_i32_10 : i32 to vector<1x128xi32>
    %46 = arith.addi %26, %45 : vector<1x128xi32>
    %c1_i32_11 = arith.constant 1 : i32
    %47 = vector.broadcast %c1_i32_11 : i32 to vector<1x128xi32>
    %48 = arith.muli %46, %47 : vector<1x128xi32>
    %c1_i32_12 = arith.constant 1 : i32
    %49 = vector.broadcast %c1_i32_12 : i32 to vector<1x128xi32>
    %50 = arith.addi %27, %49 : vector<1x128xi32>
    %c-1640531535_i32_13 = arith.constant -1640531535 : i32
    %51 = vector.broadcast %c-1640531535_i32_13 : i32 to vector<1x128xi32>
    %52 = arith.muli %50, %51 : vector<1x128xi32>
    %53 = arith.xori %48, %52 : vector<1x128xi32>
    %c255_i32_14 = arith.constant 255 : i32
    %54 = vector.broadcast %c255_i32_14 : i32 to vector<1x128xi32>
    %55 = arith.andi %53, %54 : vector<1x128xi32>
    %56 = vector.broadcast %55 : vector<1x128xi32> to vector<256x128xi32>
    %57 = arith.cmpi eq, %56, %1 : vector<256x128xi32>
    %cst_15 = arith.constant 0.000000e+00 : f32
    %58 = vector.shape_cast %23 : vector<1x128xf32> to vector<1x128xf32>
    %59 = vector.broadcast %58 : vector<1x128xf32> to vector<256x128xf32>
    %60 = vector.broadcast %cst_15 : f32 to vector<256x128xf32>
    %61 = arith.select %57, %59, %60 : vector<256x128xi1>, vector<256x128xf32>
    %62 = arith.addf %44, %61 : vector<256x128xf32>
    %c1_i32_16 = arith.constant 1 : i32
    %63 = vector.broadcast %c1_i32_16 : i32 to vector<1x128xi32>
    %64 = arith.addi %26, %63 : vector<1x128xi32>
    %c1_i32_17 = arith.constant 1 : i32
    %65 = vector.broadcast %c1_i32_17 : i32 to vector<1x128xi32>
    %66 = arith.muli %64, %65 : vector<1x128xi32>
    %c0_i32_18 = arith.constant 0 : i32
    %67 = vector.broadcast %c0_i32_18 : i32 to vector<1x128xi32>
    %68 = arith.addi %27, %67 : vector<1x128xi32>
    %c-1640531535_i32_19 = arith.constant -1640531535 : i32
    %69 = vector.broadcast %c-1640531535_i32_19 : i32 to vector<1x128xi32>
    %70 = arith.muli %68, %69 : vector<1x128xi32>
    %71 = arith.xori %66, %70 : vector<1x128xi32>
    %c255_i32_20 = arith.constant 255 : i32
    %72 = vector.broadcast %c255_i32_20 : i32 to vector<1x128xi32>
    %73 = arith.andi %71, %72 : vector<1x128xi32>
    %74 = vector.broadcast %73 : vector<1x128xi32> to vector<256x128xi32>
    %75 = arith.cmpi eq, %74, %1 : vector<256x128xi32>
    %cst_21 = arith.constant 0.000000e+00 : f32
    %76 = vector.shape_cast %24 : vector<1x128xf32> to vector<1x128xf32>
    %77 = vector.broadcast %76 : vector<1x128xf32> to vector<256x128xf32>
    %78 = vector.broadcast %cst_21 : f32 to vector<256x128xf32>
    %79 = arith.select %75, %77, %78 : vector<256x128xi1>, vector<256x128xf32>
    %80 = arith.addf %62, %79 : vector<256x128xf32>
    %c1_i32_22 = arith.constant 1 : i32
    %81 = vector.broadcast %c1_i32_22 : i32 to vector<1x128xi32>
    %82 = arith.addi %26, %81 : vector<1x128xi32>
    %c1_i32_23 = arith.constant 1 : i32
    %83 = vector.broadcast %c1_i32_23 : i32 to vector<1x128xi32>
    %84 = arith.muli %82, %83 : vector<1x128xi32>
    %c1_i32_24 = arith.constant 1 : i32
    %85 = vector.broadcast %c1_i32_24 : i32 to vector<1x128xi32>
    %86 = arith.addi %27, %85 : vector<1x128xi32>
    %c-1640531535_i32_25 = arith.constant -1640531535 : i32
    %87 = vector.broadcast %c-1640531535_i32_25 : i32 to vector<1x128xi32>
    %88 = arith.muli %86, %87 : vector<1x128xi32>
    %89 = arith.xori %84, %88 : vector<1x128xi32>
    %c255_i32_26 = arith.constant 255 : i32
    %90 = vector.broadcast %c255_i32_26 : i32 to vector<1x128xi32>
    %91 = arith.andi %89, %90 : vector<1x128xi32>
    %92 = vector.broadcast %91 : vector<1x128xi32> to vector<256x128xi32>
    %93 = arith.cmpi eq, %92, %1 : vector<256x128xi32>
    %cst_27 = arith.constant 0.000000e+00 : f32
    %94 = vector.shape_cast %25 : vector<1x128xf32> to vector<1x128xf32>
    %95 = vector.broadcast %94 : vector<1x128xf32> to vector<256x128xf32>
    %96 = vector.broadcast %cst_27 : f32 to vector<256x128xf32>
    %97 = arith.select %93, %95, %96 : vector<256x128xi1>, vector<256x128xf32>
    %98 = arith.addf %80, %97 : vector<256x128xf32>
    %c0_28 = arith.constant 0 : index
    %c0_29 = arith.constant 0 : index
    %c0_30 = arith.constant 0 : index
    %99 = vector.load %arg2[%c0_28, %c0_29, %c0_30] : memref<4x64x256xbf16, #tpu.memory_space<vmem>>, vector<1x64x256xbf16>
    %100 = vector.shape_cast %99 : vector<1x64x256xbf16> to vector<64x256xbf16>
    %101 = arith.truncf %98 : vector<256x128xf32> to vector<256x128xbf16>
    %cst_31 = arith.constant dense<0.000000e+00> : vector<64x128xf32>
    %102 = tpu.matmul %100, %101, %cst_31 {dimension_numbers = #tpu.dot_dimension_numbers<[1], [0], [0], [1], [0, 0, 1, 1], [], []>} : vector<64x256xbf16>, vector<256x128xbf16>, vector<64x128xf32> -> vector<64x128xf32>
    %103 = arith.addf %2, %102 : vector<64x128xf32>
    %cst_32 = arith.constant -1.000000e+00 : f32
    %104 = vector.broadcast %cst_32 : f32 to vector<2x128xf32>
    %105 = arith.subf %0, %104 : vector<2x128xf32>
    %cst_33 = arith.constant 2.500000e-01 : f32
    %106 = vector.broadcast %cst_33 : f32 to vector<2x128xf32>
    %107 = arith.divf %105, %106 : vector<2x128xf32>
    %108 = math.floor %107 : vector<2x128xf32>
    %cst_34 = arith.constant 2.500000e-01 : f32
    %109 = vector.broadcast %cst_34 : f32 to vector<2x128xf32>
    %110 = arith.mulf %108, %109 : vector<2x128xf32>
    %cst_35 = arith.constant -1.000000e+00 : f32
    %111 = vector.broadcast %cst_35 : f32 to vector<2x128xf32>
    %112 = arith.addf %110, %111 : vector<2x128xf32>
    %113 = arith.subf %0, %112 : vector<2x128xf32>
    %cst_36 = arith.constant 2.500000e-01 : f32
    %114 = vector.broadcast %cst_36 : f32 to vector<2x128xf32>
    %115 = arith.divf %113, %114 : vector<2x128xf32>
    %116 = arith.fptosi %108 : vector<2x128xf32> to vector<2x128xi32>
    %117 = vector.extract_strided_slice %115 {offsets = [0, 0], sizes = [1, 128], strides = [1, 1]} : vector<2x128xf32> to vector<1x128xf32>
    %cst_37 = arith.constant 1.000000e+00 : f32
    %118 = vector.broadcast %cst_37 : f32 to vector<1x128xf32>
    %119 = arith.subf %118, %117 : vector<1x128xf32>
    %120 = vector.extract_strided_slice %115 {offsets = [1, 0], sizes = [1, 128], strides = [1, 1]} : vector<2x128xf32> to vector<1x128xf32>
    %cst_38 = arith.constant 1.000000e+00 : f32
    %121 = vector.broadcast %cst_38 : f32 to vector<1x128xf32>
    %122 = arith.subf %121, %120 : vector<1x128xf32>
    %123 = arith.mulf %119, %122 : vector<1x128xf32>
    %124 = arith.mulf %119, %120 : vector<1x128xf32>
    %125 = arith.mulf %117, %122 : vector<1x128xf32>
    %126 = arith.mulf %117, %120 : vector<1x128xf32>
    %127 = vector.extract_strided_slice %116 {offsets = [0, 0], sizes = [1, 128], strides = [1, 1]} : vector<2x128xi32> to vector<1x128xi32>
    %128 = vector.extract_strided_slice %116 {offsets = [1, 0], sizes = [1, 128], strides = [1, 1]} : vector<2x128xi32> to vector<1x128xi32>
    %c0_i32_39 = arith.constant 0 : i32
    %129 = vector.broadcast %c0_i32_39 : i32 to vector<1x128xi32>
    %130 = arith.addi %127, %129 : vector<1x128xi32>
    %c1_i32_40 = arith.constant 1 : i32
    %131 = vector.broadcast %c1_i32_40 : i32 to vector<1x128xi32>
    %132 = arith.muli %130, %131 : vector<1x128xi32>
    %c0_i32_41 = arith.constant 0 : i32
    %133 = vector.broadcast %c0_i32_41 : i32 to vector<1x128xi32>
    %134 = arith.addi %128, %133 : vector<1x128xi32>
    %c-1640531535_i32_42 = arith.constant -1640531535 : i32
    %135 = vector.broadcast %c-1640531535_i32_42 : i32 to vector<1x128xi32>
    %136 = arith.muli %134, %135 : vector<1x128xi32>
    %137 = arith.xori %132, %136 : vector<1x128xi32>
    %c255_i32_43 = arith.constant 255 : i32
    %138 = vector.broadcast %c255_i32_43 : i32 to vector<1x128xi32>
    %139 = arith.andi %137, %138 : vector<1x128xi32>
    %140 = vector.broadcast %139 : vector<1x128xi32> to vector<256x128xi32>
    %141 = arith.cmpi eq, %140, %1 : vector<256x128xi32>
    %cst_44 = arith.constant 0.000000e+00 : f32
    %142 = vector.shape_cast %123 : vector<1x128xf32> to vector<1x128xf32>
    %143 = vector.broadcast %142 : vector<1x128xf32> to vector<256x128xf32>
    %144 = vector.broadcast %cst_44 : f32 to vector<256x128xf32>
    %145 = arith.select %141, %143, %144 : vector<256x128xi1>, vector<256x128xf32>
    %c0_i32_45 = arith.constant 0 : i32
    %146 = vector.broadcast %c0_i32_45 : i32 to vector<1x128xi32>
    %147 = arith.addi %127, %146 : vector<1x128xi32>
    %c1_i32_46 = arith.constant 1 : i32
    %148 = vector.broadcast %c1_i32_46 : i32 to vector<1x128xi32>
    %149 = arith.muli %147, %148 : vector<1x128xi32>
    %c1_i32_47 = arith.constant 1 : i32
    %150 = vector.broadcast %c1_i32_47 : i32 to vector<1x128xi32>
    %151 = arith.addi %128, %150 : vector<1x128xi32>
    %c-1640531535_i32_48 = arith.constant -1640531535 : i32
    %152 = vector.broadcast %c-1640531535_i32_48 : i32 to vector<1x128xi32>
    %153 = arith.muli %151, %152 : vector<1x128xi32>
    %154 = arith.xori %149, %153 : vector<1x128xi32>
    %c255_i32_49 = arith.constant 255 : i32
    %155 = vector.broadcast %c255_i32_49 : i32 to vector<1x128xi32>
    %156 = arith.andi %154, %155 : vector<1x128xi32>
    %157 = vector.broadcast %156 : vector<1x128xi32> to vector<256x128xi32>
    %158 = arith.cmpi eq, %157, %1 : vector<256x128xi32>
    %cst_50 = arith.constant 0.000000e+00 : f32
    %159 = vector.shape_cast %124 : vector<1x128xf32> to vector<1x128xf32>
    %160 = vector.broadcast %159 : vector<1x128xf32> to vector<256x128xf32>
    %161 = vector.broadcast %cst_50 : f32 to vector<256x128xf32>
    %162 = arith.select %158, %160, %161 : vector<256x128xi1>, vector<256x128xf32>
    %163 = arith.addf %145, %162 : vector<256x128xf32>
    %c1_i32_51 = arith.constant 1 : i32
    %164 = vector.broadcast %c1_i32_51 : i32 to vector<1x128xi32>
    %165 = arith.addi %127, %164 : vector<1x128xi32>
    %c1_i32_52 = arith.constant 1 : i32
    %166 = vector.broadcast %c1_i32_52 : i32 to vector<1x128xi32>
    %167 = arith.muli %165, %166 : vector<1x128xi32>
    %c0_i32_53 = arith.constant 0 : i32
    %168 = vector.broadcast %c0_i32_53 : i32 to vector<1x128xi32>
    %169 = arith.addi %128, %168 : vector<1x128xi32>
    %c-1640531535_i32_54 = arith.constant -1640531535 : i32
    %170 = vector.broadcast %c-1640531535_i32_54 : i32 to vector<1x128xi32>
    %171 = arith.muli %169, %170 : vector<1x128xi32>
    %172 = arith.xori %167, %171 : vector<1x128xi32>
    %c255_i32_55 = arith.constant 255 : i32
    %173 = vector.broadcast %c255_i32_55 : i32 to vector<1x128xi32>
    %174 = arith.andi %172, %173 : vector<1x128xi32>
    %175 = vector.broadcast %174 : vector<1x128xi32> to vector<256x128xi32>
    %176 = arith.cmpi eq, %175, %1 : vector<256x128xi32>
    %cst_56 = arith.constant 0.000000e+00 : f32
    %177 = vector.shape_cast %125 : vector<1x128xf32> to vector<1x128xf32>
    %178 = vector.broadcast %177 : vector<1x128xf32> to vector<256x128xf32>
    %179 = vector.broadcast %cst_56 : f32 to vector<256x128xf32>
    %180 = arith.select %176, %178, %179 : vector<256x128xi1>, vector<256x128xf32>
    %181 = arith.addf %163, %180 : vector<256x128xf32>
    %c1_i32_57 = arith.constant 1 : i32
    %182 = vector.broadcast %c1_i32_57 : i32 to vector<1x128xi32>
    %183 = arith.addi %127, %182 : vector<1x128xi32>
    %c1_i32_58 = arith.constant 1 : i32
    %184 = vector.broadcast %c1_i32_58 : i32 to vector<1x128xi32>
    %185 = arith.muli %183, %184 : vector<1x128xi32>
    %c1_i32_59 = arith.constant 1 : i32
    %186 = vector.broadcast %c1_i32_59 : i32 to vector<1x128xi32>
    %187 = arith.addi %128, %186 : vector<1x128xi32>
    %c-1640531535_i32_60 = arith.constant -1640531535 : i32
    %188 = vector.broadcast %c-1640531535_i32_60 : i32 to vector<1x128xi32>
    %189 = arith.muli %187, %188 : vector<1x128xi32>
    %190 = arith.xori %185, %189 : vector<1x128xi32>
    %c255_i32_61 = arith.constant 255 : i32
    %191 = vector.broadcast %c255_i32_61 : i32 to vector<1x128xi32>
    %192 = arith.andi %190, %191 : vector<1x128xi32>
    %193 = vector.broadcast %192 : vector<1x128xi32> to vector<256x128xi32>
    %194 = arith.cmpi eq, %193, %1 : vector<256x128xi32>
    %cst_62 = arith.constant 0.000000e+00 : f32
    %195 = vector.shape_cast %126 : vector<1x128xf32> to vector<1x128xf32>
    %196 = vector.broadcast %195 : vector<1x128xf32> to vector<256x128xf32>
    %197 = vector.broadcast %cst_62 : f32 to vector<256x128xf32>
    %198 = arith.select %194, %196, %197 : vector<256x128xi1>, vector<256x128xf32>
    %199 = arith.addf %181, %198 : vector<256x128xf32>
    %c1 = arith.constant 1 : index
    %c0_63 = arith.constant 0 : index
    %c0_64 = arith.constant 0 : index
    %200 = vector.load %arg2[%c1, %c0_63, %c0_64] : memref<4x64x256xbf16, #tpu.memory_space<vmem>>, vector<1x64x256xbf16>
    %201 = vector.shape_cast %200 : vector<1x64x256xbf16> to vector<64x256xbf16>
    %202 = arith.truncf %199 : vector<256x128xf32> to vector<256x128xbf16>
    %cst_65 = arith.constant dense<0.000000e+00> : vector<64x128xf32>
    %203 = tpu.matmul %201, %202, %cst_65 {dimension_numbers = #tpu.dot_dimension_numbers<[1], [0], [0], [1], [0, 0, 1, 1], [], []>} : vector<64x256xbf16>, vector<256x128xbf16>, vector<64x128xf32> -> vector<64x128xf32>
    %204 = arith.addf %103, %203 : vector<64x128xf32>
    %cst_66 = arith.constant -1.000000e+00 : f32
    %205 = vector.broadcast %cst_66 : f32 to vector<2x128xf32>
    %206 = arith.subf %0, %205 : vector<2x128xf32>
    %cst_67 = arith.constant 1.250000e-01 : f32
    %207 = vector.broadcast %cst_67 : f32 to vector<2x128xf32>
    %208 = arith.divf %206, %207 : vector<2x128xf32>
    %209 = math.floor %208 : vector<2x128xf32>
    %cst_68 = arith.constant 1.250000e-01 : f32
    %210 = vector.broadcast %cst_68 : f32 to vector<2x128xf32>
    %211 = arith.mulf %209, %210 : vector<2x128xf32>
    %cst_69 = arith.constant -1.000000e+00 : f32
    %212 = vector.broadcast %cst_69 : f32 to vector<2x128xf32>
    %213 = arith.addf %211, %212 : vector<2x128xf32>
    %214 = arith.subf %0, %213 : vector<2x128xf32>
    %cst_70 = arith.constant 1.250000e-01 : f32
    %215 = vector.broadcast %cst_70 : f32 to vector<2x128xf32>
    %216 = arith.divf %214, %215 : vector<2x128xf32>
    %217 = arith.fptosi %209 : vector<2x128xf32> to vector<2x128xi32>
    %218 = vector.extract_strided_slice %216 {offsets = [0, 0], sizes = [1, 128], strides = [1, 1]} : vector<2x128xf32> to vector<1x128xf32>
    %cst_71 = arith.constant 1.000000e+00 : f32
    %219 = vector.broadcast %cst_71 : f32 to vector<1x128xf32>
    %220 = arith.subf %219, %218 : vector<1x128xf32>
    %221 = vector.extract_strided_slice %216 {offsets = [1, 0], sizes = [1, 128], strides = [1, 1]} : vector<2x128xf32> to vector<1x128xf32>
    %cst_72 = arith.constant 1.000000e+00 : f32
    %222 = vector.broadcast %cst_72 : f32 to vector<1x128xf32>
    %223 = arith.subf %222, %221 : vector<1x128xf32>
    %224 = arith.mulf %220, %223 : vector<1x128xf32>
    %225 = arith.mulf %220, %221 : vector<1x128xf32>
    %226 = arith.mulf %218, %223 : vector<1x128xf32>
    %227 = arith.mulf %218, %221 : vector<1x128xf32>
    %228 = vector.extract_strided_slice %217 {offsets = [0, 0], sizes = [1, 128], strides = [1, 1]} : vector<2x128xi32> to vector<1x128xi32>
    %229 = vector.extract_strided_slice %217 {offsets = [1, 0], sizes = [1, 128], strides = [1, 1]} : vector<2x128xi32> to vector<1x128xi32>
    %c0_i32_73 = arith.constant 0 : i32
    %230 = vector.broadcast %c0_i32_73 : i32 to vector<1x128xi32>
    %231 = arith.addi %228, %230 : vector<1x128xi32>
    %c1_i32_74 = arith.constant 1 : i32
    %232 = vector.broadcast %c1_i32_74 : i32 to vector<1x128xi32>
    %233 = arith.muli %231, %232 : vector<1x128xi32>
    %c0_i32_75 = arith.constant 0 : i32
    %234 = vector.broadcast %c0_i32_75 : i32 to vector<1x128xi32>
    %235 = arith.addi %229, %234 : vector<1x128xi32>
    %c-1640531535_i32_76 = arith.constant -1640531535 : i32
    %236 = vector.broadcast %c-1640531535_i32_76 : i32 to vector<1x128xi32>
    %237 = arith.muli %235, %236 : vector<1x128xi32>
    %238 = arith.xori %233, %237 : vector<1x128xi32>
    %c255_i32_77 = arith.constant 255 : i32
    %239 = vector.broadcast %c255_i32_77 : i32 to vector<1x128xi32>
    %240 = arith.andi %238, %239 : vector<1x128xi32>
    %241 = vector.broadcast %240 : vector<1x128xi32> to vector<256x128xi32>
    %242 = arith.cmpi eq, %241, %1 : vector<256x128xi32>
    %cst_78 = arith.constant 0.000000e+00 : f32
    %243 = vector.shape_cast %224 : vector<1x128xf32> to vector<1x128xf32>
    %244 = vector.broadcast %243 : vector<1x128xf32> to vector<256x128xf32>
    %245 = vector.broadcast %cst_78 : f32 to vector<256x128xf32>
    %246 = arith.select %242, %244, %245 : vector<256x128xi1>, vector<256x128xf32>
    %c0_i32_79 = arith.constant 0 : i32
    %247 = vector.broadcast %c0_i32_79 : i32 to vector<1x128xi32>
    %248 = arith.addi %228, %247 : vector<1x128xi32>
    %c1_i32_80 = arith.constant 1 : i32
    %249 = vector.broadcast %c1_i32_80 : i32 to vector<1x128xi32>
    %250 = arith.muli %248, %249 : vector<1x128xi32>
    %c1_i32_81 = arith.constant 1 : i32
    %251 = vector.broadcast %c1_i32_81 : i32 to vector<1x128xi32>
    %252 = arith.addi %229, %251 : vector<1x128xi32>
    %c-1640531535_i32_82 = arith.constant -1640531535 : i32
    %253 = vector.broadcast %c-1640531535_i32_82 : i32 to vector<1x128xi32>
    %254 = arith.muli %252, %253 : vector<1x128xi32>
    %255 = arith.xori %250, %254 : vector<1x128xi32>
    %c255_i32_83 = arith.constant 255 : i32
    %256 = vector.broadcast %c255_i32_83 : i32 to vector<1x128xi32>
    %257 = arith.andi %255, %256 : vector<1x128xi32>
    %258 = vector.broadcast %257 : vector<1x128xi32> to vector<256x128xi32>
    %259 = arith.cmpi eq, %258, %1 : vector<256x128xi32>
    %cst_84 = arith.constant 0.000000e+00 : f32
    %260 = vector.shape_cast %225 : vector<1x128xf32> to vector<1x128xf32>
    %261 = vector.broadcast %260 : vector<1x128xf32> to vector<256x128xf32>
    %262 = vector.broadcast %cst_84 : f32 to vector<256x128xf32>
    %263 = arith.select %259, %261, %262 : vector<256x128xi1>, vector<256x128xf32>
    %264 = arith.addf %246, %263 : vector<256x128xf32>
    %c1_i32_85 = arith.constant 1 : i32
    %265 = vector.broadcast %c1_i32_85 : i32 to vector<1x128xi32>
    %266 = arith.addi %228, %265 : vector<1x128xi32>
    %c1_i32_86 = arith.constant 1 : i32
    %267 = vector.broadcast %c1_i32_86 : i32 to vector<1x128xi32>
    %268 = arith.muli %266, %267 : vector<1x128xi32>
    %c0_i32_87 = arith.constant 0 : i32
    %269 = vector.broadcast %c0_i32_87 : i32 to vector<1x128xi32>
    %270 = arith.addi %229, %269 : vector<1x128xi32>
    %c-1640531535_i32_88 = arith.constant -1640531535 : i32
    %271 = vector.broadcast %c-1640531535_i32_88 : i32 to vector<1x128xi32>
    %272 = arith.muli %270, %271 : vector<1x128xi32>
    %273 = arith.xori %268, %272 : vector<1x128xi32>
    %c255_i32_89 = arith.constant 255 : i32
    %274 = vector.broadcast %c255_i32_89 : i32 to vector<1x128xi32>
    %275 = arith.andi %273, %274 : vector<1x128xi32>
    %276 = vector.broadcast %275 : vector<1x128xi32> to vector<256x128xi32>
    %277 = arith.cmpi eq, %276, %1 : vector<256x128xi32>
    %cst_90 = arith.constant 0.000000e+00 : f32
    %278 = vector.shape_cast %226 : vector<1x128xf32> to vector<1x128xf32>
    %279 = vector.broadcast %278 : vector<1x128xf32> to vector<256x128xf32>
    %280 = vector.broadcast %cst_90 : f32 to vector<256x128xf32>
    %281 = arith.select %277, %279, %280 : vector<256x128xi1>, vector<256x128xf32>
    %282 = arith.addf %264, %281 : vector<256x128xf32>
    %c1_i32_91 = arith.constant 1 : i32
    %283 = vector.broadcast %c1_i32_91 : i32 to vector<1x128xi32>
    %284 = arith.addi %228, %283 : vector<1x128xi32>
    %c1_i32_92 = arith.constant 1 : i32
    %285 = vector.broadcast %c1_i32_92 : i32 to vector<1x128xi32>
    %286 = arith.muli %284, %285 : vector<1x128xi32>
    %c1_i32_93 = arith.constant 1 : i32
    %287 = vector.broadcast %c1_i32_93 : i32 to vector<1x128xi32>
    %288 = arith.addi %229, %287 : vector<1x128xi32>
    %c-1640531535_i32_94 = arith.constant -1640531535 : i32
    %289 = vector.broadcast %c-1640531535_i32_94 : i32 to vector<1x128xi32>
    %290 = arith.muli %288, %289 : vector<1x128xi32>
    %291 = arith.xori %286, %290 : vector<1x128xi32>
    %c255_i32_95 = arith.constant 255 : i32
    %292 = vector.broadcast %c255_i32_95 : i32 to vector<1x128xi32>
    %293 = arith.andi %291, %292 : vector<1x128xi32>
    %294 = vector.broadcast %293 : vector<1x128xi32> to vector<256x128xi32>
    %295 = arith.cmpi eq, %294, %1 : vector<256x128xi32>
    %cst_96 = arith.constant 0.000000e+00 : f32
    %296 = vector.shape_cast %227 : vector<1x128xf32> to vector<1x128xf32>
    %297 = vector.broadcast %296 : vector<1x128xf32> to vector<256x128xf32>
    %298 = vector.broadcast %cst_96 : f32 to vector<256x128xf32>
    %299 = arith.select %295, %297, %298 : vector<256x128xi1>, vector<256x128xf32>
    %300 = arith.addf %282, %299 : vector<256x128xf32>
    %c2 = arith.constant 2 : index
    %c0_97 = arith.constant 0 : index
    %c0_98 = arith.constant 0 : index
    %301 = vector.load %arg2[%c2, %c0_97, %c0_98] : memref<4x64x256xbf16, #tpu.memory_space<vmem>>, vector<1x64x256xbf16>
    %302 = vector.shape_cast %301 : vector<1x64x256xbf16> to vector<64x256xbf16>
    %303 = arith.truncf %300 : vector<256x128xf32> to vector<256x128xbf16>
    %cst_99 = arith.constant dense<0.000000e+00> : vector<64x128xf32>
    %304 = tpu.matmul %302, %303, %cst_99 {dimension_numbers = #tpu.dot_dimension_numbers<[1], [0], [0], [1], [0, 0, 1, 1], [], []>} : vector<64x256xbf16>, vector<256x128xbf16>, vector<64x128xf32> -> vector<64x128xf32>
    %305 = arith.addf %204, %304 : vector<64x128xf32>
    %cst_100 = arith.constant -1.000000e+00 : f32
    %306 = vector.broadcast %cst_100 : f32 to vector<2x128xf32>
    %307 = arith.subf %0, %306 : vector<2x128xf32>
    %cst_101 = arith.constant 6.250000e-02 : f32
    %308 = vector.broadcast %cst_101 : f32 to vector<2x128xf32>
    %309 = arith.divf %307, %308 : vector<2x128xf32>
    %310 = math.floor %309 : vector<2x128xf32>
    %cst_102 = arith.constant 6.250000e-02 : f32
    %311 = vector.broadcast %cst_102 : f32 to vector<2x128xf32>
    %312 = arith.mulf %310, %311 : vector<2x128xf32>
    %cst_103 = arith.constant -1.000000e+00 : f32
    %313 = vector.broadcast %cst_103 : f32 to vector<2x128xf32>
    %314 = arith.addf %312, %313 : vector<2x128xf32>
    %315 = arith.subf %0, %314 : vector<2x128xf32>
    %cst_104 = arith.constant 6.250000e-02 : f32
    %316 = vector.broadcast %cst_104 : f32 to vector<2x128xf32>
    %317 = arith.divf %315, %316 : vector<2x128xf32>
    %318 = arith.fptosi %310 : vector<2x128xf32> to vector<2x128xi32>
    %319 = vector.extract_strided_slice %317 {offsets = [0, 0], sizes = [1, 128], strides = [1, 1]} : vector<2x128xf32> to vector<1x128xf32>
    %cst_105 = arith.constant 1.000000e+00 : f32
    %320 = vector.broadcast %cst_105 : f32 to vector<1x128xf32>
    %321 = arith.subf %320, %319 : vector<1x128xf32>
    %322 = vector.extract_strided_slice %317 {offsets = [1, 0], sizes = [1, 128], strides = [1, 1]} : vector<2x128xf32> to vector<1x128xf32>
    %cst_106 = arith.constant 1.000000e+00 : f32
    %323 = vector.broadcast %cst_106 : f32 to vector<1x128xf32>
    %324 = arith.subf %323, %322 : vector<1x128xf32>
    %325 = arith.mulf %321, %324 : vector<1x128xf32>
    %326 = arith.mulf %321, %322 : vector<1x128xf32>
    %327 = arith.mulf %319, %324 : vector<1x128xf32>
    %328 = arith.mulf %319, %322 : vector<1x128xf32>
    %329 = vector.extract_strided_slice %318 {offsets = [0, 0], sizes = [1, 128], strides = [1, 1]} : vector<2x128xi32> to vector<1x128xi32>
    %330 = vector.extract_strided_slice %318 {offsets = [1, 0], sizes = [1, 128], strides = [1, 1]} : vector<2x128xi32> to vector<1x128xi32>
    %c0_i32_107 = arith.constant 0 : i32
    %331 = vector.broadcast %c0_i32_107 : i32 to vector<1x128xi32>
    %332 = arith.addi %329, %331 : vector<1x128xi32>
    %c1_i32_108 = arith.constant 1 : i32
    %333 = vector.broadcast %c1_i32_108 : i32 to vector<1x128xi32>
    %334 = arith.muli %332, %333 : vector<1x128xi32>
    %c0_i32_109 = arith.constant 0 : i32
    %335 = vector.broadcast %c0_i32_109 : i32 to vector<1x128xi32>
    %336 = arith.addi %330, %335 : vector<1x128xi32>
    %c-1640531535_i32_110 = arith.constant -1640531535 : i32
    %337 = vector.broadcast %c-1640531535_i32_110 : i32 to vector<1x128xi32>
    %338 = arith.muli %336, %337 : vector<1x128xi32>
    %339 = arith.xori %334, %338 : vector<1x128xi32>
    %c255_i32_111 = arith.constant 255 : i32
    %340 = vector.broadcast %c255_i32_111 : i32 to vector<1x128xi32>
    %341 = arith.andi %339, %340 : vector<1x128xi32>
    %342 = vector.broadcast %341 : vector<1x128xi32> to vector<256x128xi32>
    %343 = arith.cmpi eq, %342, %1 : vector<256x128xi32>
    %cst_112 = arith.constant 0.000000e+00 : f32
    %344 = vector.shape_cast %325 : vector<1x128xf32> to vector<1x128xf32>
    %345 = vector.broadcast %344 : vector<1x128xf32> to vector<256x128xf32>
    %346 = vector.broadcast %cst_112 : f32 to vector<256x128xf32>
    %347 = arith.select %343, %345, %346 : vector<256x128xi1>, vector<256x128xf32>
    %c0_i32_113 = arith.constant 0 : i32
    %348 = vector.broadcast %c0_i32_113 : i32 to vector<1x128xi32>
    %349 = arith.addi %329, %348 : vector<1x128xi32>
    %c1_i32_114 = arith.constant 1 : i32
    %350 = vector.broadcast %c1_i32_114 : i32 to vector<1x128xi32>
    %351 = arith.muli %349, %350 : vector<1x128xi32>
    %c1_i32_115 = arith.constant 1 : i32
    %352 = vector.broadcast %c1_i32_115 : i32 to vector<1x128xi32>
    %353 = arith.addi %330, %352 : vector<1x128xi32>
    %c-1640531535_i32_116 = arith.constant -1640531535 : i32
    %354 = vector.broadcast %c-1640531535_i32_116 : i32 to vector<1x128xi32>
    %355 = arith.muli %353, %354 : vector<1x128xi32>
    %356 = arith.xori %351, %355 : vector<1x128xi32>
    %c255_i32_117 = arith.constant 255 : i32
    %357 = vector.broadcast %c255_i32_117 : i32 to vector<1x128xi32>
    %358 = arith.andi %356, %357 : vector<1x128xi32>
    %359 = vector.broadcast %358 : vector<1x128xi32> to vector<256x128xi32>
    %360 = arith.cmpi eq, %359, %1 : vector<256x128xi32>
    %cst_118 = arith.constant 0.000000e+00 : f32
    %361 = vector.shape_cast %326 : vector<1x128xf32> to vector<1x128xf32>
    %362 = vector.broadcast %361 : vector<1x128xf32> to vector<256x128xf32>
    %363 = vector.broadcast %cst_118 : f32 to vector<256x128xf32>
    %364 = arith.select %360, %362, %363 : vector<256x128xi1>, vector<256x128xf32>
    %365 = arith.addf %347, %364 : vector<256x128xf32>
    %c1_i32_119 = arith.constant 1 : i32
    %366 = vector.broadcast %c1_i32_119 : i32 to vector<1x128xi32>
    %367 = arith.addi %329, %366 : vector<1x128xi32>
    %c1_i32_120 = arith.constant 1 : i32
    %368 = vector.broadcast %c1_i32_120 : i32 to vector<1x128xi32>
    %369 = arith.muli %367, %368 : vector<1x128xi32>
    %c0_i32_121 = arith.constant 0 : i32
    %370 = vector.broadcast %c0_i32_121 : i32 to vector<1x128xi32>
    %371 = arith.addi %330, %370 : vector<1x128xi32>
    %c-1640531535_i32_122 = arith.constant -1640531535 : i32
    %372 = vector.broadcast %c-1640531535_i32_122 : i32 to vector<1x128xi32>
    %373 = arith.muli %371, %372 : vector<1x128xi32>
    %374 = arith.xori %369, %373 : vector<1x128xi32>
    %c255_i32_123 = arith.constant 255 : i32
    %375 = vector.broadcast %c255_i32_123 : i32 to vector<1x128xi32>
    %376 = arith.andi %374, %375 : vector<1x128xi32>
    %377 = vector.broadcast %376 : vector<1x128xi32> to vector<256x128xi32>
    %378 = arith.cmpi eq, %377, %1 : vector<256x128xi32>
    %cst_124 = arith.constant 0.000000e+00 : f32
    %379 = vector.shape_cast %327 : vector<1x128xf32> to vector<1x128xf32>
    %380 = vector.broadcast %379 : vector<1x128xf32> to vector<256x128xf32>
    %381 = vector.broadcast %cst_124 : f32 to vector<256x128xf32>
    %382 = arith.select %378, %380, %381 : vector<256x128xi1>, vector<256x128xf32>
    %383 = arith.addf %365, %382 : vector<256x128xf32>
    %c1_i32_125 = arith.constant 1 : i32
    %384 = vector.broadcast %c1_i32_125 : i32 to vector<1x128xi32>
    %385 = arith.addi %329, %384 : vector<1x128xi32>
    %c1_i32_126 = arith.constant 1 : i32
    %386 = vector.broadcast %c1_i32_126 : i32 to vector<1x128xi32>
    %387 = arith.muli %385, %386 : vector<1x128xi32>
    %c1_i32_127 = arith.constant 1 : i32
    %388 = vector.broadcast %c1_i32_127 : i32 to vector<1x128xi32>
    %389 = arith.addi %330, %388 : vector<1x128xi32>
    %c-1640531535_i32_128 = arith.constant -1640531535 : i32
    %390 = vector.broadcast %c-1640531535_i32_128 : i32 to vector<1x128xi32>
    %391 = arith.muli %389, %390 : vector<1x128xi32>
    %392 = arith.xori %387, %391 : vector<1x128xi32>
    %c255_i32_129 = arith.constant 255 : i32
    %393 = vector.broadcast %c255_i32_129 : i32 to vector<1x128xi32>
    %394 = arith.andi %392, %393 : vector<1x128xi32>
    %395 = vector.broadcast %394 : vector<1x128xi32> to vector<256x128xi32>
    %396 = arith.cmpi eq, %395, %1 : vector<256x128xi32>
    %cst_130 = arith.constant 0.000000e+00 : f32
    %397 = vector.shape_cast %328 : vector<1x128xf32> to vector<1x128xf32>
    %398 = vector.broadcast %397 : vector<1x128xf32> to vector<256x128xf32>
    %399 = vector.broadcast %cst_130 : f32 to vector<256x128xf32>
    %400 = arith.select %396, %398, %399 : vector<256x128xi1>, vector<256x128xf32>
    %401 = arith.addf %383, %400 : vector<256x128xf32>
    %c3 = arith.constant 3 : index
    %c0_131 = arith.constant 0 : index
    %c0_132 = arith.constant 0 : index
    %402 = vector.load %arg2[%c3, %c0_131, %c0_132] : memref<4x64x256xbf16, #tpu.memory_space<vmem>>, vector<1x64x256xbf16>
    %403 = vector.shape_cast %402 : vector<1x64x256xbf16> to vector<64x256xbf16>
    %404 = arith.truncf %401 : vector<256x128xf32> to vector<256x128xbf16>
    %cst_133 = arith.constant dense<0.000000e+00> : vector<64x128xf32>
    %405 = tpu.matmul %403, %404, %cst_133 {dimension_numbers = #tpu.dot_dimension_numbers<[1], [0], [0], [1], [0, 0, 1, 1], [], []>} : vector<64x256xbf16>, vector<256x128xbf16>, vector<64x128xf32> -> vector<64x128xf32>
    %406 = arith.addf %305, %405 : vector<64x128xf32>
    %c0_134 = arith.constant 0 : index
    %c0_135 = arith.constant 0 : index
    %407 = vector.load %arg3[%c0_134, %c0_135] : memref<64x1xf32, #tpu.memory_space<vmem>>, vector<64x1xf32>
    %408 = vector.broadcast %407 : vector<64x1xf32> to vector<64x128xf32>
    %409 = arith.addf %406, %408 : vector<64x128xf32>
    %cst_136 = arith.constant 0.000000e+00 : f32
    %410 = vector.broadcast %cst_136 : f32 to vector<64x128xf32>
    %411 = arith.maximumf %409, %410 : vector<64x128xf32>
    %c0_137 = arith.constant 0 : index
    %c0_138 = arith.constant 0 : index
    %412 = vector.load %arg4[%c0_137, %c0_138] : memref<64x64xbf16, #tpu.memory_space<vmem>>, vector<64x64xbf16>
    %413 = arith.truncf %411 : vector<64x128xf32> to vector<64x128xbf16>
    %cst_139 = arith.constant dense<0.000000e+00> : vector<64x128xf32>
    %414 = tpu.matmul %412, %413, %cst_139 {dimension_numbers = #tpu.dot_dimension_numbers<[1], [0], [0], [1], [0, 0, 1, 1], [], []>} : vector<64x64xbf16>, vector<64x128xbf16>, vector<64x128xf32> -> vector<64x128xf32>
    %c0_140 = arith.constant 0 : index
    %c0_141 = arith.constant 0 : index
    %415 = vector.load %arg5[%c0_140, %c0_141] : memref<64x1xf32, #tpu.memory_space<vmem>>, vector<64x1xf32>
    %416 = vector.broadcast %415 : vector<64x1xf32> to vector<64x128xf32>
    %417 = arith.addf %414, %416 : vector<64x128xf32>
    %cst_142 = arith.constant 0.000000e+00 : f32
    %418 = vector.broadcast %cst_142 : f32 to vector<64x128xf32>
    %419 = arith.maximumf %417, %418 : vector<64x128xf32>
    %c0_143 = arith.constant 0 : index
    %c0_144 = arith.constant 0 : index
    %420 = vector.load %arg6[%c0_143, %c0_144] : memref<64x64xbf16, #tpu.memory_space<vmem>>, vector<64x64xbf16>
    %421 = arith.truncf %419 : vector<64x128xf32> to vector<64x128xbf16>
    %cst_145 = arith.constant dense<0.000000e+00> : vector<64x128xf32>
    %422 = tpu.matmul %420, %421, %cst_145 {dimension_numbers = #tpu.dot_dimension_numbers<[1], [0], [0], [1], [0, 0, 1, 1], [], []>} : vector<64x64xbf16>, vector<64x128xbf16>, vector<64x128xf32> -> vector<64x128xf32>
    %c0_146 = arith.constant 0 : index
    %c0_147 = arith.constant 0 : index
    %423 = vector.load %arg7[%c0_146, %c0_147] : memref<64x1xf32, #tpu.memory_space<vmem>>, vector<64x1xf32>
    %424 = vector.broadcast %423 : vector<64x1xf32> to vector<64x128xf32>
    %425 = arith.addf %422, %424 : vector<64x128xf32>
    %cst_148 = arith.constant 0.000000e+00 : f32
    %426 = vector.broadcast %cst_148 : f32 to vector<64x128xf32>
    %427 = arith.maximumf %425, %426 : vector<64x128xf32>
    %c0_149 = arith.constant 0 : index
    %c0_150 = arith.constant 0 : index
    %428 = vector.load %arg8[%c0_149, %c0_150] : memref<8x64xbf16, #tpu.memory_space<vmem>>, vector<8x64xbf16>
    %429 = arith.truncf %427 : vector<64x128xf32> to vector<64x128xbf16>
    %cst_151 = arith.constant dense<0.000000e+00> : vector<8x128xf32>
    %430 = tpu.matmul %428, %429, %cst_151 {dimension_numbers = #tpu.dot_dimension_numbers<[1], [0], [0], [1], [0, 0, 1, 1], [], []>} : vector<8x64xbf16>, vector<64x128xbf16>, vector<8x128xf32> -> vector<8x128xf32>
    %c0_152 = arith.constant 0 : index
    %c0_153 = arith.constant 0 : index
    %431 = vector.load %arg9[%c0_152, %c0_153] : memref<8x1xf32, #tpu.memory_space<vmem>>, vector<8x1xf32>
    %432 = vector.broadcast %431 : vector<8x1xf32> to vector<8x128xf32>
    %433 = arith.addf %430, %432 : vector<8x128xf32>
    %c0_154 = arith.constant 0 : index
    %c0_155 = arith.constant 0 : index
    %434 = vector.load %arg10[%c0_154, %c0_155] : memref<8x128xf32, #tpu.memory_space<vmem>>, vector<8x128xf32>
    tpu.vector_store %arg10[%c0_154, %c0_155], %433 {strides = array<i32>} : memref<8x128xf32, #tpu.memory_space<vmem>>, vector<8x128xf32>,
    return
  }
  func.func @transform_0(%arg0: i32) -> (i32, i32) {
    %c0_i32 = arith.constant 0 : i32
    %c0_i32_0 = arith.constant 0 : i32
    return %c0_i32, %arg0 : i32, i32
  }
  func.func @transform_1(%arg0: i32) -> (i32, i32, i32) {
    %c0_i32 = arith.constant 0 : i32
    %c0_i32_0 = arith.constant 0 : i32
    %c0_i32_1 = arith.constant 0 : i32
    %c0_i32_2 = arith.constant 0 : i32
    return %c0_i32, %c0_i32_0, %c0_i32_1 : i32, i32, i32
  }
  func.func @transform_2(%arg0: i32) -> (i32, i32) {
    %c0_i32 = arith.constant 0 : i32
    %c0_i32_0 = arith.constant 0 : i32
    %c0_i32_1 = arith.constant 0 : i32
    return %c0_i32, %c0_i32_0 : i32, i32
  }
  func.func @transform_3(%arg0: i32) -> (i32, i32) {
    %c0_i32 = arith.constant 0 : i32
    %c0_i32_0 = arith.constant 0 : i32
    %c0_i32_1 = arith.constant 0 : i32
    return %c0_i32, %c0_i32_0 : i32, i32
  }
  func.func @transform_4(%arg0: i32) -> (i32, i32) {
    %c0_i32 = arith.constant 0 : i32
    %c0_i32_0 = arith.constant 0 : i32
    %c0_i32_1 = arith.constant 0 : i32
    return %c0_i32, %c0_i32_0 : i32, i32
  }
  func.func @transform_5(%arg0: i32) -> (i32, i32) {
    %c0_i32 = arith.constant 0 : i32
    %c0_i32_0 = arith.constant 0 : i32
    %c0_i32_1 = arith.constant 0 : i32
    return %c0_i32, %c0_i32_0 : i32, i32
  }
  func.func @transform_6(%arg0: i32) -> (i32, i32) {
    %c0_i32 = arith.constant 0 : i32
    %c0_i32_0 = arith.constant 0 : i32
    %c0_i32_1 = arith.constant 0 : i32
    return %c0_i32, %c0_i32_0 : i32, i32
  }
  func.func @transform_7(%arg0: i32) -> (i32, i32) {
    %c0_i32 = arith.constant 0 : i32
    %c0_i32_0 = arith.constant 0 : i32
    %c0_i32_1 = arith.constant 0 : i32
    return %c0_i32, %c0_i32_0 : i32, i32
  }
  func.func @transform_8(%arg0: i32) -> (i32, i32) {
    %c0_i32 = arith.constant 0 : i32
    %c0_i32_0 = arith.constant 0 : i32
    %c0_i32_1 = arith.constant 0 : i32
    return %c0_i32, %c0_i32_0 : i32, i32
  }
  func.func @transform_9(%arg0: i32) -> (i32, i32) {
    %c0_i32 = arith.constant 0 : i32
    %c0_i32_0 = arith.constant 0 : i32
    return %c0_i32, %arg0 : i32, i32
  }
}

</mosaic_0001>

<bundles_post_ra>
// kernel: tpu_custom_call.1
= control target key start
LH: loop header
LB: loop body
LE: loop exit
PB: predicated region body
PF: predicated region fallthrough
CT: control target
= control target key end

     0   :  { %14 = vsyncpa [#allocation3], 0  ;;  %s5724_s0 = inlined_call_operand.vmem [shape: f32[2,512], index: 0, kind: input, shape index: {}]   ;;  %s5725_s1 = inlined_call_operand.hbm [shape: bf16[4,64,256], index: 1, kind: input, shape index: {}]   ;;  %s5726_s2 = inlined_call_operand.vmem [shape: f32[64,1], index: 2, kind: input, shape index: {}]   ;;  %s5727_s3 = inlined_call_operand.vmem [shape: bf16[64,64], index: 3, kind: input, shape index: {}]   ;;  %s5728_s4 = inlined_call_operand.vmem [shape: f32[64,1], index: 4, kind: input, shape index: {}]   ;;  %s5729_s5 = inlined_call_operand.vmem [shape: bf16[64,64], index: 5, kind: input, shape index: {}]   ;;  %s5730_s6 = inlined_call_operand.vmem [shape: f32[64,1], index: 6, kind: input, shape index: {}]   ;;  %s5731_s7 = inlined_call_operand.vmem [shape: bf16[8,64], index: 7, kind: input, shape index: {}]   ;;  %s5732_s8 = inlined_call_operand.vmem [shape: f32[8,1], index: 8, kind: input, shape index: {}]   ;;  %s5733_s9 = inlined_call_operand.hbm [shape: f32[8,512], index: 9, kind: output, shape index: {}]  }
   0x1   :  { %15 = vsyncpa [#allocation4], 0 }
   0x2   :  { %17 = vsyncpa [#allocation4 + $0x1], 0  ;;  %s3675_s30 = smov 0   ;;  %s3677_s10 = smov 0  }
   0x3   :  { %s3679_s11 = smov 0   ;;  %s3681_s12 = smov 0  }
   0x4 LB: > { %s3696_s13 = sadd.s32 4294967295, %s3616_s12   ;;  %s3113_s14 = sadd.s32 4294967294, %s3616_s12   ;;  %s3616_s12 = sphi %s3681_s12, %s5773_s12   ;;  %s3612_s11 = sphi %s3679_s11, %s5772_s11   ;;  %s3608_s10 = sphi %s3677_s10, %s5771_s10   ;;  %s3604_s30 = sphi %s3675_s30, %s5770_s30  }
   0x5   : > { %s3700_s15 = sadd.s32 1, %s3616_s12   ;;  %s224_s16 = sadd.s32 1, %s3612_s11 }
   0x6   : > { %s221_s17 = ssub.s32 %s3616_s12, %s3700_s15  ;;  %p234_p0 = scmp.ne.s32.totalorder %s3612_s11, %s3608_s10 }
   0x7   : > { %p222_p1 = scmp.eq.s32.totalorder %s221_s17, 0  ;;  %p235_p2 = scmp.eq.s32.totalorder %s3696_s13, 3 }
   0x8   : > { %p240_p3 = scmp.ne.s32.totalorder %s3608_s10, %s3604_s30  ;;  %p241_p4 = scmp.eq.s32.totalorder %s3113_s14, 3 }
   0x9   : > { %s3711_s18 = scalar_select %p222_p1, %s3612_s11, %s224_s16  }
   0xa   : > { %p3713_p5 = por %p235_p2, %p234_p0  ;;  %p3717_p6 = por %p241_p4, %p240_p3 }
   0xb   : > { %p3114_p7 = scmp.ge.s32.totalorder %s3616_s12, 1  ;;  %p248_p8 = scmp.lt.s32.totalorder %s3616_s12, 5 }
   0xc   : > { %s5749_s19 = scalar_select %p3713_p5, 1, 0 }
   0xd   : > { %s5750_s20 = scalar_select %p3717_p6, 1, 0 }
   0xe   : > { %p5734_p9 = scmp.eq.s32.totalorder %s3696_s13, 0  ;;  %p3724_p10 = pnand %p3114_p7, %p248_p8 }
   0xf   : > { %s3618_s22 = smov [#allocation2]   ;;  %s3522_s27 = scalar_lea.hbm %s5725_s1, 4096 }
  0x10   : > { %s5751_s21 = scalar_select %p3724_p10, 1, 0 }
  0x11   : > { %s260_s23 = sshll.u32 %s3618_s22, 4  ;;  %p3414_p11 = pneg %p3724_p10  ;;  %s261_s23 = int_to_ptr.vmem [resolvable:$true] %s260_s23 }
  0x12   : > { %p3523_p13 = scmp.ne.s32.totalorder %s5725_s1, %s3522_s27  ;;  %p3529_p3 = scmp.lt.u32.totalorder %s3522_s27, %s5725_s1 }
  0x13   : > { %p3732_p12 = pnand %p5734_p9, %p3414_p11 }
  0x15   : > { %p3524_p0 = pneg %p3732_p12 }
  0x17   : > { %p3525_p1 = pnand %p3524_p0, %p3523_p13 }
  0x19   : > { %p3526_p2 = pneg %p3525_p1 }
  0x1b   : > { %p3531_p4 = pnand %p3529_p3, %p3526_p2 }
  0x1d   : > { %3534 = shalt.err (!%p3531_p4)
}
  0x1e   : > { %s3535_s17 = scalar_lea.vmem %s261_s23, 4096  ;;  %p3543_p9 = scmp.lt.s32.totalorder %s261_s23, %s261_s23 }
  0x1f   : > { %p3536_p7 = scmp.ne.s32.totalorder %s261_s23, %s3535_s17  ;;  %p3544_p6 = scmp.lt.s32.totalorder %s3535_s17, %s3535_s17 }
  0x21   : > { %p3538_p8 = pnand %p3536_p7, %p3524_p0  ;;  %p3545_p5 = por %p3544_p6, %p3543_p9 }
  0x23   : > { %p3539_p11 = pneg %p3538_p8 }
  0x25   : > { %p3546_p10 = pnand %p3545_p5, %p3539_p11 }
  0x27   : > { %3549 = shalt.err (!%p3546_p10)
}
  0x28   : > { %s3619_s22 = smov 128   ;;  %s3620_s25 = smov 8  }
  0x29   : > { %3417 = dma.hbm_to_vmem [thread:$0]  (!%p3732_p12), %s5725_s1, 4096, %s261_s23, [#allocation3], %s3619_s22, %s3619_s22, %s3620_s25  }
  0x2a   : > { %p5753_p13 = scmp.ne.s32.totalorder %s5751_s21, 0 }
  0x2c   : > { %304 = sbr.rel (%p5753_p13) target bundleno = 1441 (0x5a1), region = 56 }
  0x33   : > { %p5754_p1 = scmp.eq.s32.totalorder %s3696_s13, 0 }
  0x35   : > { %3595 = dma.done.wait (%p5754_p1), [#allocation3], 4096   ;;  %p5755_p0 = pmov %p5754_p1 }
  0x36   : > { %p339_p5 = scmp.lt.s32.totalorder %s3696_s13, 3  ;;  %v345_v0 = vlaneseq  ;;  %s3172_s14 = sshll.u32 %s3696_s13, 7 }
  0x37   : > { %3597 = vsyncadd (%p5755_p0), [#allocation3], 4294963200  ;;  %s5682_s22 = scalar_lea.hbm %s5733_s9, %s3172_s14  ;;  %p5768_p9 = scmp.ne.s32.totalorder %s5749_s19, 0 }
  0x38   : > { %s340_s27 = scalar_select %p339_p5, %s3696_s13, 3  ;;  %v3765_v1 = vshrl.u32 %v345_v0, 7 }
  0x39   : > { %s3624_s26 = smov [#allocation5]  }
  0x3a   : > { %s3120_s29 = sshll.u32 %s340_s27, 1  ;;  %v3769_v3 = vadd.s32 128, %v3765_v1  ;;  %v3772_v4 = vadd.s32 136, %v3765_v1  ;;  %v3777_v6 = vsub.s32 0, %v3765_v1  ;;  %v3780_v7 = vadd.s32 8, %v3765_v1  ;;  %s3554_s28 = sshll.u32 %s3624_s26, 4  ;;  %s3555_s28 = int_to_ptr.vmem [resolvable:$false] %s3554_s28 }
  0x3b   : > { %s3763_s16 = scalar_lea.vmem %s5724_s0, %s3120_s29  ;;  %v3783_v8 = vadd.s32 144, %v3765_v1  ;;  %v3788_v11 = vadd.s32 152, %v3765_v1  ;;  %v3791_v12 = vadd.s32 16, %v3765_v1  ;;  %v3794_v13 = vadd.s32 24, %v3765_v1  ;;  %s336_s29 = sand.u32 1, %s3608_s10  }
  0x3c   : > { %v344_v2 = vld [vmem:[%s3763_s16] sm:$0x3]  ;;  %v3797_v14 = vadd.s32 160, %v3765_v1  ;;  %v3800_v17 = vadd.s32 168, %v3765_v1  ;;  %v3803_v18 = vadd.s32 32, %v3765_v1  ;;  %v3806_v19 = vadd.s32 40, %v3765_v1 }
  0x3d   : > { %v3774_v5 = vadd.f32 1.0, %v344_v2  ;;  %v3809_v20 = vadd.s32 176, %v3765_v1  ;;  %v3812_v21 = vadd.s32 184, %v3765_v1  ;;  %v3815_v26 = vadd.s32 48, %v3765_v1  ;;  %s3119_s24 = sshll.u32 %s336_s29, 3  ;;  %s3029_s13 = scalar_lea.sflag [#allocation4], %s336_s29 }
  0x3e   : > { %v3818_v27 = vadd.s32 56, %v3765_v1  ;;  %v3821_v28 = vadd.s32 192, %v3765_v1  ;;  %v3826_v33 = vadd.s32 200, %v3765_v1  ;;  %v3829_v34 = vadd.s32 64, %v3765_v1  ;;  %s3556_s27 = scalar_lea.vmem %s3555_s28, 256 }
  0x3f   : > { %v820_v9 = vmul.f32 4.0, %v3774_v5  ;;  %v380_v10 = vmul.f32 2.0, %v3774_v5  ;;  %v3832_v35 = vadd.s32 72, %v3765_v1  ;;  %v3839_v42 = vadd.s32 208, %v3765_v1 }
  0x40   : > { %v3845_v49 = vadd.s32 216, %v3765_v1 }
  0x41   : > { %v821_v15 = vfloor.f32 %v820_v9  ;;  %v381_v16 = vfloor.f32 %v380_v10 }
  0x43   : > { %v822_v22 = vmul.f32 0.25, %v821_v15  ;;  %v3402_v23 = vtrunc.f32 %v821_v15  ;;  %v382_v24 = vmul.f32 0.5, %v381_v16  ;;  %v3400_v25 = vtrunc.f32 %v381_v16 }
  0x45   : > { %v823_v29 = vadd.f32 -1.0, %v822_v22  ;;  %v3403_v30 = vcvt.f32.s32 %v3402_v23  ;;  %v383_v31 = vadd.f32 -1.0, %v382_v24  ;;  %v3823_v32 = vcvt.f32.s32 %v3400_v25 }
  0x47   : > { %v824_v36 = vsub.f32 %v344_v2, %v823_v29  ;;  %v838_v37 = vmul.u32 2654435761, %v3403_v30  ;;  %v914_v38 = vadd.s32 1, %v3403_v30  ;;  %v384_v39 = vsub.f32 %v344_v2, %v383_v31 }
  0x48   : > { %v398_v40 = vmul.u32 2654435761, %v3823_v32  ;;  %v3836_v41 = vadd.s32 1, %v3823_v32 }
  0x49   : > { %v825_v43 = vmul.f32 4.0, %v824_v36  ;;  %v839_v44 = vrot.slane %v838_v37, 1  ;;  %v915_v45 = vmul.u32 2654435761, %v914_v38  ;;  %v385_v46 = vmul.f32 2.0, %v384_v39 }
  0x4a   : > { %v3841_v47 = vrot.slane %v398_v40, 1  ;;  %v475_v48 = vmul.u32 2654435761, %v3836_v41 }
  0x4b   : > { %v827_v50 = vsub.f32 1.0, %v825_v43  ;;  %v833_v51 = vrot.slane %v825_v43, 1  ;;  %v840_v52 = vxor.u32 %v3403_v30, %v839_v44  ;;  %v916_v53 = vrot.slane %v915_v45, 1 }
  0x4c   : > { %v1023_v54 = vxor.u32 %v914_v38, %v839_v44  ;;  %v387_v55 = vsub.f32 1.0, %v385_v46  ;;  %v393_v56 = vrot.slane %v385_v46, 1  ;;  %v400_v57 = vxor.u32 %v3823_v32, %v3841_v47 }
  0x4d   : > { %v829_v58 = vrot.slane %v827_v50, 1  ;;  %v835_v59 = vmul.f32 %v833_v51, %v827_v50  ;;  %v837_v60 = vmul.f32 %v833_v51, %v825_v43  ;;  %v841_v61 = vand.u32 255, %v840_v52 }
  0x4e   : > { %v917_v62 = vxor.u32 %v3403_v30, %v916_v53  ;;  %v1024_v63 = vand.u32 255, %v1023_v54  ;;  %v1129_v0 = vxor.u32 %v916_v53, %v914_v38  ;;  %v389_v2 = vrot.slane %v387_v55, 1 }
  0x4f   : > { %v831_v9 = vmul.f32 %v829_v58, %v827_v50  ;;  %v836_v10 = vmul.f32 %v829_v58, %v825_v43  ;;  %v3850_v15 = vrot.slane %v841_v61, %v3777_v6  ;;  %v3853_v16 = vrot.slane %v835_v59, %v3777_v6 }
  0x50   : > { %v918_v22 = vand.u32 255, %v917_v62  ;;  %v3856_v23 = vrot.slane %v1024_v63, %v3777_v6  ;;  %v1130_v24 = vand.u32 255, %v1129_v0  ;;  %v3859_v25 = vrot.slane %v837_v60, %v3777_v6 }
  0x51   : > { %vm862_vm0 = vcmp.eq.s32.totalorder %v3850_v15, %v3769_v3  ;;  %vm863_vm1 = vcmp.eq.s32.totalorder %v3850_v15, %v3772_v4  ;;  %v3866_v29 = vrot.slane %v831_v9, %v3777_v6  ;;  %v3869_v30 = vrot.slane %v836_v10, %v3777_v6 }
  0x52   : > { %v3872_v31 = vrot.slane %v918_v22, %v3777_v6  ;;  %vm1045_vm2 = vcmp.eq.s32.totalorder %v3856_v23, %v3769_v3  ;;  %vm1046_vm3 = vcmp.eq.s32.totalorder %v3856_v23, %v3772_v4  ;;  %v3879_v36 = vrot.slane %v1130_v24, %v3777_v6 }
  0x53   : > { %v898_v37 = vsel %vm862_vm0, %v3866_v29, 0.0  ;;  %v899_v38 = vsel %vm863_vm1, %v3866_v29, 0.0  ;;  %v1081_v39 = vsel %vm1045_vm2, %v3869_v30, 0.0  ;;  %v1082_v40 = vsel %vm1046_vm3, %v3869_v30, 0.0 }
  0x54   : > { %vm939_vm4 = vcmp.eq.s32.totalorder %v3872_v31, %v3769_v3  ;;  %vm940_vm5 = vcmp.eq.s32.totalorder %v3872_v31, %v3772_v4  ;;  %vm1151_vm6 = vcmp.eq.s32.totalorder %v3879_v36, %v3769_v3  ;;  %vm1152_vm7 = vcmp.eq.s32.totalorder %v3879_v36, %v3772_v4 }
  0x55   : > { %v975_v43 = vsel %vm939_vm4, %v3853_v16, 0.0  ;;  %v976_v44 = vsel %vm940_vm5, %v3853_v16, 0.0  ;;  %v1187_v45 = vsel %vm1151_vm6, %v3859_v25, 0.0  ;;  %v1188_v50 = vsel %vm1152_vm7, %v3859_v25, 0.0 }
  0x56   : > { %v1007_v51 = vadd.f32 %v975_v43, %v898_v37  ;;  %v1008_v52 = vadd.f32 %v976_v44, %v899_v38  ;;  %v391_v53 = vmul.f32 %v389_v2, %v387_v55  ;;  %v395_v54 = vmul.f32 %v393_v56, %v387_v55 }
  0x57   : > { %v396_v58 = vmul.f32 %v389_v2, %v385_v46  ;;  %v397_v59 = vmul.f32 %v393_v56, %v385_v46  ;;  %v401_v60 = vand.u32 255, %v400_v57  ;;  %v476_v61 = vrot.slane %v475_v48, 1 }
  0x58   : > { %v1113_v62 = vadd.f32 %v1081_v39, %v1007_v51  ;;  %v1114_v63 = vadd.f32 %v1082_v40, %v1008_v52  ;;  %v3898_v0 = vrot.slane %v391_v53, %v3777_v6  ;;  %v3901_v9 = vrot.slane %v395_v54, %v3777_v6 }
  0x59   : > { %v3904_v10 = vrot.slane %v401_v60, %v3777_v6  ;;  %v477_v22 = vxor.u32 %v3823_v32, %v476_v61  ;;  %v583_v55 = vxor.u32 %v3836_v41, %v3841_v47  ;;  %v3910_v46 = vrot.slane %v396_v58, %v3777_v6 }
  0x5a   : > { %v1219_v48 = vadd.f32 %v1187_v45, %v1113_v62  ;;  %v1220_v56 = vadd.f32 %v1188_v50, %v1114_v63  ;;  %v689_v57 = vxor.u32 %v476_v61, %v3836_v41  ;;  %v3914_v2 = vrot.slane %v397_v59, %v3777_v6 }
  0x5b   : > { %vm422_vm8 = vcmp.eq.s32.totalorder %v3904_v10, %v3769_v3  ;;  %vm423_vm9 = vcmp.eq.s32.totalorder %v3904_v10, %v3772_v4  ;;  %v478_v32 = vand.u32 255, %v477_v22  ;;  %v584_v24 = vand.u32 255, %v583_v55 }
  0x5c   : > { %v1252_v37 = vpack.c.bf16 %v1220_v56, %v1219_v48  ;;  %v458_v47 = vsel %vm422_vm8, %v3898_v0, 0.0  ;;  %v459_v38 = vsel %vm423_vm9, %v3898_v0, 0.0  ;;  %v690_v39 = vand.u32 255, %v689_v57 }
  0x5d   : > { %v3923_v40 = vrot.slane %v478_v32, %v3777_v6  ;;  %v3926_v41 = vrot.slane %v584_v24, %v3777_v6  ;;  %vm846_vm10 = vcmp.eq.s32.totalorder %v3850_v15, %v3765_v1  ;;  %vm847_vm11 = vcmp.eq.s32.totalorder %v3850_v15, %v3780_v7 }
  0x5e   : > { %3175 = vmatprep.subr.bf16.mxu0 %v1252_v37  ;;  %v3933_v43 = vrot.slane %v690_v39, %v3777_v6  ;;  %v882_v44 = vsel %vm846_vm10, %v3866_v29, 0.0  ;;  %v883_v45 = vsel %vm847_vm11, %v3866_v29, 0.0  ;;  %vm923_vm12 = vcmp.eq.s32.totalorder %v3872_v31, %v3765_v1 }
  0x5f   : > { %vm499_vm13 = vcmp.eq.s32.totalorder %v3923_v40, %v3769_v3  ;;  %vm500_vm14 = vcmp.eq.s32.totalorder %v3923_v40, %v3772_v4  ;;  %vm605_vm15 = vcmp.eq.s32.totalorder %v3926_v41, %v3769_v3  ;;  %vm606_vm0 = vcmp.eq.s32.totalorder %v3926_v41, %v3772_v4 }
  0x60   : > { %v535_v50 = vsel %vm499_vm13, %v3901_v9, 0.0  ;;  %v536_v51 = vsel %vm500_vm14, %v3901_v9, 0.0  ;;  %v641_v52 = vsel %vm605_vm15, %v3910_v46, 0.0  ;;  %v642_v53 = vsel %vm606_vm0, %v3910_v46, 0.0 }
  0x61   : > { %v567_v54 = vadd.f32 %v535_v50, %v458_v47  ;;  %v568_v58 = vadd.f32 %v536_v51, %v459_v38  ;;  %vm711_vm1 = vcmp.eq.s32.totalorder %v3933_v43, %v3769_v3  ;;  %vm712_vm2 = vcmp.eq.s32.totalorder %v3933_v43, %v3772_v4 }
  0x62   : > { %v747_v59 = vsel %vm711_vm1, %v3914_v2, 0.0  ;;  %v748_v60 = vsel %vm712_vm2, %v3914_v2, 0.0  ;;  %vm924_vm3 = vcmp.eq.s32.totalorder %v3872_v31, %v3780_v7  ;;  %v959_v61 = vsel %vm923_vm12, %v3853_v16, 0.0 }
  0x63   : > { %v673_v62 = vadd.f32 %v641_v52, %v567_v54  ;;  %v674_v63 = vadd.f32 %v642_v53, %v568_v58  ;;  %v960_v22 = vsel %vm924_vm3, %v3853_v16, 0.0  ;;  %v991_v55 = vadd.f32 %v959_v61, %v882_v44 }
  0x64   : > { %v992_v48 = vadd.f32 %v960_v22, %v883_v45  ;;  %vm1029_vm4 = vcmp.eq.s32.totalorder %v3856_v23, %v3765_v1  ;;  %vm1030_vm5 = vcmp.eq.s32.totalorder %v3856_v23, %v3780_v7  ;;  %vm1135_vm6 = vcmp.eq.s32.totalorder %v3879_v36, %v3765_v1 }
  0x65   : > { %v779_v56 = vadd.f32 %v747_v59, %v673_v62  ;;  %v780_v57 = vadd.f32 %v748_v60, %v674_v63  ;;  %v1065_v32 = vsel %vm1029_vm4, %v3869_v30, 0.0  ;;  %v1066_v24 = vsel %vm1030_vm5, %v3869_v30, 0.0 }
  0x66   : > { %v1097_v37 = vadd.f32 %v1065_v32, %v991_v55  ;;  %v1098_v47 = vadd.f32 %v1066_v24, %v992_v48  ;;  %vm1136_vm7 = vcmp.eq.s32.totalorder %v3879_v36, %v3780_v7  ;;  %v1171_v38 = vsel %vm1135_vm6, %v3859_v25, 0.0 }
  0x67   : > { %v811_v39 = vpack.c.bf16 %v780_v57, %v779_v56  ;;  %v1172_v44 = vsel %vm1136_vm7, %v3859_v25, 0.0  ;;  %vm406_vm8 = vcmp.eq.s32.totalorder %v3904_v10, %v3765_v1  ;;  %vm407_vm9 = vcmp.eq.s32.totalorder %v3904_v10, %v3780_v7 }
  0x68   : > { %v1203_v45 = vadd.f32 %v1171_v38, %v1097_v37  ;;  %v1204_v50 = vadd.f32 %v1172_v44, %v1098_v47  ;;  %v442_v51 = vsel %vm406_vm8, %v3898_v0, 0.0  ;;  %v443_v52 = vsel %vm407_vm9, %v3898_v0, 0.0 }
  0x69   : > { %3215 = vmatprep.subr.bf16.mxu1 %v811_v39  ;;  %vm483_vm10 = vcmp.eq.s32.totalorder %v3923_v40, %v3765_v1  ;;  %vm484_vm11 = vcmp.eq.s32.totalorder %v3923_v40, %v3780_v7  ;;  %vm589_vm12 = vcmp.eq.s32.totalorder %v3926_v41, %v3765_v1  ;;  %vm590_vm13 = vcmp.eq.s32.totalorder %v3926_v41, %v3780_v7 }
  0x6a   : > { %v1244_v53 = vpack.c.bf16 %v1204_v50, %v1203_v45  ;;  %v519_v54 = vsel %vm483_vm10, %v3901_v9, 0.0  ;;  %v520_v58 = vsel %vm484_vm11, %v3901_v9, 0.0  ;;  %v625_v59 = vsel %vm589_vm12, %v3910_v46, 0.0 }
  0x6b   : > { %v551_v60 = vadd.f32 %v519_v54, %v442_v51  ;;  %v552_v61 = vadd.f32 %v520_v58, %v443_v52  ;;  %v626_v62 = vsel %vm590_vm13, %v3910_v46, 0.0  ;;  %vm695_vm14 = vcmp.eq.s32.totalorder %v3933_v43, %v3765_v1 }
  0x6c   : > { %3176 = vmatpush3.bf16.msra.mxu0 %v1244_v53  ;;  %vm696_vm15 = vcmp.eq.s32.totalorder %v3933_v43, %v3780_v7  ;;  %v731_v63 = vsel %vm695_vm14, %v3914_v2, 0.0  ;;  %vm864_vm0 = vcmp.eq.s32.totalorder %v3850_v15, %v3783_v8  ;;  %vm865_vm1 = vcmp.eq.s32.totalorder %v3850_v15, %v3788_v11 }
  0x6d   : > { %v657_v22 = vadd.f32 %v625_v59, %v551_v60  ;;  %v658_v55 = vadd.f32 %v626_v62, %v552_v61  ;;  %v732_v48 = vsel %vm696_vm15, %v3914_v2, 0.0  ;;  %v900_v56 = vsel %vm864_vm0, %v3866_v29, 0.0 }
  0x6e   : > { %v901_v57 = vsel %vm865_vm1, %v3866_v29, 0.0  ;;  %vm941_vm2 = vcmp.eq.s32.totalorder %v3872_v31, %v3783_v8  ;;  %vm942_vm3 = vcmp.eq.s32.totalorder %v3872_v31, %v3788_v11  ;;  %vm1047_vm4 = vcmp.eq.s32.totalorder %v3856_v23, %v3783_v8 }
  0x6f   : > { %v763_v32 = vadd.f32 %v731_v63, %v657_v22  ;;  %v764_v24 = vadd.f32 %v732_v48, %v658_v55  ;;  %v977_v37 = vsel %vm941_vm2, %v3853_v16, 0.0  ;;  %v978_v47 = vsel %vm942_vm3, %v3853_v16, 0.0 }
  0x70   : > { %v1009_v38 = vadd.f32 %v977_v37, %v900_v56  ;;  %v1010_v39 = vadd.f32 %v978_v47, %v901_v57  ;;  %vm1048_vm5 = vcmp.eq.s32.totalorder %v3856_v23, %v3788_v11  ;;  %v1083_v44 = vsel %vm1047_vm4, %v3869_v30, 0.0 }
  0x71   : > { %v803_v45 = vpack.c.bf16 %v764_v24, %v763_v32  ;;  %v1084_v50 = vsel %vm1048_vm5, %v3869_v30, 0.0  ;;  %vm1153_vm6 = vcmp.eq.s32.totalorder %v3879_v36, %v3783_v8  ;;  %vm1154_vm7 = vcmp.eq.s32.totalorder %v3879_v36, %v3788_v11 }
  0x72   : > { %v1115_v51 = vadd.f32 %v1083_v44, %v1009_v38  ;;  %v1116_v52 = vadd.f32 %v1084_v50, %v1010_v39  ;;  %v1189_v53 = vsel %vm1153_vm6, %v3859_v25, 0.0  ;;  %v1190_v54 = vsel %vm1154_vm7, %v3859_v25, 0.0 }
  0x73   : > { %3216 = vmatpush3.bf16.msra.mxu1 %v803_v45  ;;  %vm424_vm8 = vcmp.eq.s32.totalorder %v3904_v10, %v3783_v8  ;;  %vm425_vm9 = vcmp.eq.s32.totalorder %v3904_v10, %v3788_v11  ;;  %vm501_vm10 = vcmp.eq.s32.totalorder %v3923_v40, %v3783_v8  ;;  %vm502_vm11 = vcmp.eq.s32.totalorder %v3923_v40, %v3788_v11 }
  0x74   : > { %v1221_v58 = vadd.f32 %v1189_v53, %v1115_v51  ;;  %v1222_v59 = vadd.f32 %v1190_v54, %v1116_v52  ;;  %v460_v60 = vsel %vm424_vm8, %v3898_v0, 0.0  ;;  %v461_v61 = vsel %vm425_vm9, %v3898_v0, 0.0 }
  0x75   : > { %v537_v62 = vsel %vm501_vm10, %v3901_v9, 0.0  ;;  %v538_v63 = vsel %vm502_vm11, %v3901_v9, 0.0  ;;  %vm607_vm12 = vcmp.eq.s32.totalorder %v3926_v41, %v3783_v8  ;;  %vm608_vm13 = vcmp.eq.s32.totalorder %v3926_v41, %v3788_v11 }
  0x76   : > { %v1253_v22 = vpack.c.bf16 %v1222_v59, %v1221_v58  ;;  %v569_v55 = vadd.f32 %v537_v62, %v460_v60  ;;  %v570_v48 = vadd.f32 %v538_v63, %v461_v61  ;;  %v643_v56 = vsel %vm607_vm12, %v3910_v46, 0.0 }
  0x77   : > { %v644_v57 = vsel %vm608_vm13, %v3910_v46, 0.0  ;;  %vm713_vm14 = vcmp.eq.s32.totalorder %v3933_v43, %v3783_v8  ;;  %vm714_vm15 = vcmp.eq.s32.totalorder %v3933_v43, %v3788_v11  ;;  %vm848_vm0 = vcmp.eq.s32.totalorder %v3850_v15, %v3791_v12 }
  0x78   : > { %3177 = vmatprep.subr.bf16.mxu0 %v1253_v22  ;;  %v675_v32 = vadd.f32 %v643_v56, %v569_v55  ;;  %v676_v24 = vadd.f32 %v644_v57, %v570_v48  ;;  %v749_v37 = vsel %vm713_vm14, %v3914_v2, 0.0  ;;  %v750_v47 = vsel %vm714_vm15, %v3914_v2, 0.0 }
  0x79   : > { %vm849_vm1 = vcmp.eq.s32.totalorder %v3850_v15, %v3794_v13  ;;  %v884_v38 = vsel %vm848_vm0, %v3866_v29, 0.0  ;;  %vm925_vm2 = vcmp.eq.s32.totalorder %v3872_v31, %v3791_v12  ;;  %vm926_vm3 = vcmp.eq.s32.totalorder %v3872_v31, %v3794_v13 }
  0x7a   : > { %v781_v39 = vadd.f32 %v749_v37, %v675_v32  ;;  %v782_v44 = vadd.f32 %v750_v47, %v676_v24  ;;  %v885_v45 = vsel %vm849_vm1, %v3866_v29, 0.0  ;;  %v961_v50 = vsel %vm925_vm2, %v3853_v16, 0.0 }
  0x7b   : > { %v962_v51 = vsel %vm926_vm3, %v3853_v16, 0.0  ;;  %v993_v52 = vadd.f32 %v961_v50, %v884_v38  ;;  %vm1031_vm4 = vcmp.eq.s32.totalorder %v3856_v23, %v3791_v12  ;;  %vm1032_vm5 = vcmp.eq.s32.totalorder %v3856_v23, %v3794_v13 }
  0x7c   : > { %v812_v53 = vpack.c.bf16 %v782_v44, %v781_v39  ;;  %v994_v54 = vadd.f32 %v962_v51, %v885_v45  ;;  %v1067_v58 = vsel %vm1031_vm4, %v3869_v30, 0.0  ;;  %v1068_v59 = vsel %vm1032_vm5, %v3869_v30, 0.0 }
  0x7d   : > { %v1099_v60 = vadd.f32 %v1067_v58, %v993_v52  ;;  %vm1137_vm6 = vcmp.eq.s32.totalorder %v3879_v36, %v3791_v12  ;;  %vm1138_vm7 = vcmp.eq.s32.totalorder %v3879_v36, %v3794_v13  ;;  %vm408_vm8 = vcmp.eq.s32.totalorder %v3904_v10, %v3791_v12 }
  0x7e   : > { %3217 = vmatprep.subr.bf16.mxu1 %v812_v53  ;;  %v1100_v61 = vadd.f32 %v1068_v59, %v994_v54  ;;  %v1173_v62 = vsel %vm1137_vm6, %v3859_v25, 0.0  ;;  %v1174_v63 = vsel %vm1138_vm7, %v3859_v25, 0.0  ;;  %vm409_vm9 = vcmp.eq.s32.totalorder %v3904_v10, %v3794_v13 }
  0x7f   : > { %v1205_v22 = vadd.f32 %v1173_v62, %v1099_v60  ;;  %v444_v55 = vsel %vm408_vm8, %v3898_v0, 0.0  ;;  %v445_v48 = vsel %vm409_vm9, %v3898_v0, 0.0  ;;  %vm485_vm10 = vcmp.eq.s32.totalorder %v3923_v40, %v3791_v12 }
  0x80   : > { %v1206_v56 = vadd.f32 %v1174_v63, %v1100_v61  ;;  %vm486_vm11 = vcmp.eq.s32.totalorder %v3923_v40, %v3794_v13  ;;  %v521_v57 = vsel %vm485_vm10, %v3901_v9, 0.0  ;;  %vm591_vm12 = vcmp.eq.s32.totalorder %v3926_v41, %v3791_v12 }
  0x81   : > { %v522_v32 = vsel %vm486_vm11, %v3901_v9, 0.0  ;;  %v553_v24 = vadd.f32 %v521_v57, %v444_v55  ;;  %vm592_vm13 = vcmp.eq.s32.totalorder %v3926_v41, %v3794_v13  ;;  %v627_v37 = vsel %vm591_vm12, %v3910_v46, 0.0 }
  0x82   : > { %v1245_v47 = vpack.c.bf16 %v1206_v56, %v1205_v22  ;;  %v554_v38 = vadd.f32 %v522_v32, %v445_v48  ;;  %v628_v39 = vsel %vm592_vm13, %v3910_v46, 0.0  ;;  %vm697_vm14 = vcmp.eq.s32.totalorder %v3933_v43, %v3791_v12 }
  0x83   : > { %v659_v44 = vadd.f32 %v627_v37, %v553_v24  ;;  %vm698_vm15 = vcmp.eq.s32.totalorder %v3933_v43, %v3794_v13  ;;  %v733_v45 = vsel %vm697_vm14, %v3914_v2, 0.0  ;;  %vm866_vm0 = vcmp.eq.s32.totalorder %v3850_v15, %v3797_v14 }
  0x84   : > { %3178 = vmatpush3.bf16.msra.mxu0 %v1245_v47  ;;  %v660_v50 = vadd.f32 %v628_v39, %v554_v38  ;;  %v734_v51 = vsel %vm698_vm15, %v3914_v2, 0.0  ;;  %vm867_vm1 = vcmp.eq.s32.totalorder %v3850_v15, %v3800_v17  ;;  %v902_v52 = vsel %vm866_vm0, %v3866_v29, 0.0 }
  0x85   : > { %v765_v53 = vadd.f32 %v733_v45, %v659_v44  ;;  %v903_v54 = vsel %vm867_vm1, %v3866_v29, 0.0  ;;  %vm943_vm2 = vcmp.eq.s32.totalorder %v3872_v31, %v3797_v14  ;;  %vm944_vm3 = vcmp.eq.s32.totalorder %v3872_v31, %v3800_v17 }
  0x86   : > { %v766_v58 = vadd.f32 %v734_v51, %v660_v50  ;;  %v979_v59 = vsel %vm943_vm2, %v3853_v16, 0.0  ;;  %v980_v60 = vsel %vm944_vm3, %v3853_v16, 0.0  ;;  %vm1049_vm4 = vcmp.eq.s32.totalorder %v3856_v23, %v3797_v14 }
  0x87   : > { %v1011_v61 = vadd.f32 %v979_v59, %v902_v52  ;;  %v1012_v62 = vadd.f32 %v980_v60, %v903_v54  ;;  %vm1050_vm5 = vcmp.eq.s32.totalorder %v3856_v23, %v3800_v17  ;;  %v1085_v63 = vsel %vm1049_vm4, %v3869_v30, 0.0 }
  0x88   : > { %v804_v22 = vpack.c.bf16 %v766_v58, %v765_v53  ;;  %v1086_v55 = vsel %vm1050_vm5, %v3869_v30, 0.0  ;;  %vm1155_vm6 = vcmp.eq.s32.totalorder %v3879_v36, %v3797_v14  ;;  %vm1156_vm7 = vcmp.eq.s32.totalorder %v3879_v36, %v3800_v17 }
  0x89   : > { %v1117_v48 = vadd.f32 %v1085_v63, %v1011_v61  ;;  %v1118_v56 = vadd.f32 %v1086_v55, %v1012_v62  ;;  %v1191_v57 = vsel %vm1155_vm6, %v3859_v25, 0.0  ;;  %v1192_v32 = vsel %vm1156_vm7, %v3859_v25, 0.0 }
  0x8a   : > { %3218 = vmatpush3.bf16.msra.mxu1 %v804_v22  ;;  %vm426_vm8 = vcmp.eq.s32.totalorder %v3904_v10, %v3797_v14  ;;  %vm427_vm9 = vcmp.eq.s32.totalorder %v3904_v10, %v3800_v17  ;;  %vm503_vm10 = vcmp.eq.s32.totalorder %v3923_v40, %v3797_v14  ;;  %vm504_vm11 = vcmp.eq.s32.totalorder %v3923_v40, %v3800_v17 }
  0x8b   : > { %v1223_v24 = vadd.f32 %v1191_v57, %v1117_v48  ;;  %v1224_v37 = vadd.f32 %v1192_v32, %v1118_v56  ;;  %v462_v47 = vsel %vm426_vm8, %v3898_v0, 0.0  ;;  %v463_v38 = vsel %vm427_vm9, %v3898_v0, 0.0 }
  0x8c   : > { %v539_v39 = vsel %vm503_vm10, %v3901_v9, 0.0  ;;  %v540_v44 = vsel %vm504_vm11, %v3901_v9, 0.0  ;;  %vm609_vm12 = vcmp.eq.s32.totalorder %v3926_v41, %v3797_v14  ;;  %vm610_vm13 = vcmp.eq.s32.totalorder %v3926_v41, %v3800_v17 }
  0x8d   : > { %v1254_v45 = vpack.c.bf16 %v1224_v37, %v1223_v24  ;;  %v571_v50 = vadd.f32 %v539_v39, %v462_v47  ;;  %v572_v51 = vadd.f32 %v540_v44, %v463_v38  ;;  %v645_v52 = vsel %vm609_vm12, %v3910_v46, 0.0 }
  0x8e   : > { %v646_v53 = vsel %vm610_vm13, %v3910_v46, 0.0  ;;  %vm715_vm14 = vcmp.eq.s32.totalorder %v3933_v43, %v3797_v14  ;;  %vm716_vm15 = vcmp.eq.s32.totalorder %v3933_v43, %v3800_v17  ;;  %vm850_vm0 = vcmp.eq.s32.totalorder %v3850_v15, %v3803_v18 }
  0x8f   : > { %3179 = vmatprep.subr.bf16.mxu0 %v1254_v45  ;;  %v677_v54 = vadd.f32 %v645_v52, %v571_v50  ;;  %v678_v58 = vadd.f32 %v646_v53, %v572_v51  ;;  %v751_v59 = vsel %vm715_vm14, %v3914_v2, 0.0  ;;  %v752_v60 = vsel %vm716_vm15, %v3914_v2, 0.0  ;;  %v3467_v52 = vld [vmem:[#allocation2 + $0x44] ss:$8 sps:$4 sm:$0xff]  }
  0x90   : > { %vm851_vm1 = vcmp.eq.s32.totalorder %v3850_v15, %v3806_v19  ;;  %v886_v61 = vsel %vm850_vm0, %v3866_v29, 0.0  ;;  %vm927_vm2 = vcmp.eq.s32.totalorder %v3872_v31, %v3803_v18  ;;  %vm928_vm3 = vcmp.eq.s32.totalorder %v3872_v31, %v3806_v19  ;;  %1332 = vmatprep.mubr.bf16.mxu0 %v3467_v52 }
  0x91   : > { %v783_v62 = vadd.f32 %v751_v59, %v677_v54  ;;  %v784_v63 = vadd.f32 %v752_v60, %v678_v58  ;;  %v887_v22 = vsel %vm851_vm1, %v3866_v29, 0.0  ;;  %v963_v55 = vsel %vm927_vm2, %v3853_v16, 0.0  ;;  %v3470_v58 = vld [vmem:[#allocation2 + $0x4] ss:$8 sps:$4 sm:$0xff]  }
  0x92   : > { %v964_v48 = vsel %vm928_vm3, %v3853_v16, 0.0  ;;  %v995_v56 = vadd.f32 %v963_v55, %v886_v61  ;;  %vm1033_vm4 = vcmp.eq.s32.totalorder %v3856_v23, %v3803_v18  ;;  %vm1034_vm5 = vcmp.eq.s32.totalorder %v3856_v23, %v3806_v19  ;;  %1437 = vmatprep.mubr.bf16.mxu1 %v3470_v58 }
  0x93   : > { %v813_v57 = vpack.c.bf16 %v784_v63, %v783_v62  ;;  %v996_v32 = vadd.f32 %v964_v48, %v887_v22  ;;  %v1069_v24 = vsel %vm1033_vm4, %v3869_v30, 0.0  ;;  %v1070_v37 = vsel %vm1034_vm5, %v3869_v30, 0.0 }
  0x94   : > { %v1101_v47 = vadd.f32 %v1069_v24, %v995_v56  ;;  %vm1139_vm6 = vcmp.eq.s32.totalorder %v3879_v36, %v3803_v18  ;;  %vm1140_vm7 = vcmp.eq.s32.totalorder %v3879_v36, %v3806_v19  ;;  %vm410_vm8 = vcmp.eq.s32.totalorder %v3904_v10, %v3803_v18 }
  0x95   : > { %3219 = vmatprep.subr.bf16.mxu1 %v813_v57  ;;  %v1102_v38 = vadd.f32 %v1070_v37, %v996_v32  ;;  %v1175_v39 = vsel %vm1139_vm6, %v3859_v25, 0.0  ;;  %v1176_v44 = vsel %vm1140_vm7, %v3859_v25, 0.0  ;;  %vm411_vm9 = vcmp.eq.s32.totalorder %v3904_v10, %v3806_v19 }
  0x96   : > { %v1207_v45 = vadd.f32 %v1175_v39, %v1101_v47  ;;  %v446_v50 = vsel %vm410_vm8, %v3898_v0, 0.0  ;;  %v447_v51 = vsel %vm411_vm9, %v3898_v0, 0.0  ;;  %vm487_vm10 = vcmp.eq.s32.totalorder %v3923_v40, %v3803_v18 }
  0x97   : > { %v1208_v53 = vadd.f32 %v1176_v44, %v1102_v38  ;;  %vm488_vm11 = vcmp.eq.s32.totalorder %v3923_v40, %v3806_v19  ;;  %v523_v54 = vsel %vm487_vm10, %v3901_v9, 0.0  ;;  %vm593_vm12 = vcmp.eq.s32.totalorder %v3926_v41, %v3803_v18 }
  0x98   : > { %v524_v59 = vsel %vm488_vm11, %v3901_v9, 0.0  ;;  %v555_v60 = vadd.f32 %v523_v54, %v446_v50  ;;  %vm594_vm13 = vcmp.eq.s32.totalorder %v3926_v41, %v3806_v19  ;;  %v629_v61 = vsel %vm593_vm12, %v3910_v46, 0.0 }
  0x99   : > { %v1246_v62 = vpack.c.bf16 %v1208_v53, %v1207_v45  ;;  %v556_v63 = vadd.f32 %v524_v59, %v447_v51  ;;  %v630_v22 = vsel %vm594_vm13, %v3910_v46, 0.0  ;;  %vm699_vm14 = vcmp.eq.s32.totalorder %v3933_v43, %v3803_v18 }
  0x9a   : > { %v661_v55 = vadd.f32 %v629_v61, %v555_v60  ;;  %vm700_vm15 = vcmp.eq.s32.totalorder %v3933_v43, %v3806_v19  ;;  %v735_v48 = vsel %vm699_vm14, %v3914_v2, 0.0  ;;  %vm868_vm0 = vcmp.eq.s32.totalorder %v3850_v15, %v3809_v20 }
  0x9b   : > { %3180 = vmatpush3.bf16.msra.mxu0 %v1246_v62  ;;  %v662_v56 = vadd.f32 %v630_v22, %v556_v63  ;;  %v736_v57 = vsel %vm700_vm15, %v3914_v2, 0.0  ;;  %vm869_vm1 = vcmp.eq.s32.totalorder %v3850_v15, %v3812_v21  ;;  %v904_v32 = vsel %vm868_vm0, %v3866_v29, 0.0 }
  0x9c   : > { %v767_v24 = vadd.f32 %v735_v48, %v661_v55  ;;  %v905_v37 = vsel %vm869_vm1, %v3866_v29, 0.0  ;;  %vm945_vm2 = vcmp.eq.s32.totalorder %v3872_v31, %v3809_v20  ;;  %vm946_vm3 = vcmp.eq.s32.totalorder %v3872_v31, %v3812_v21 }
  0x9d   : > { %v768_v47 = vadd.f32 %v736_v57, %v662_v56  ;;  %v981_v38 = vsel %vm945_vm2, %v3853_v16, 0.0  ;;  %v982_v39 = vsel %vm946_vm3, %v3853_v16, 0.0  ;;  %vm1051_vm4 = vcmp.eq.s32.totalorder %v3856_v23, %v3809_v20 }
  0x9e   : > { %v1013_v44 = vadd.f32 %v981_v38, %v904_v32  ;;  %v1014_v45 = vadd.f32 %v982_v39, %v905_v37  ;;  %vm1052_vm5 = vcmp.eq.s32.totalorder %v3856_v23, %v3812_v21  ;;  %v1087_v50 = vsel %vm1051_vm4, %v3869_v30, 0.0 }
  0x9f   : > { %v805_v51 = vpack.c.bf16 %v768_v47, %v767_v24  ;;  %v1088_v52 = vsel %vm1052_vm5, %v3869_v30, 0.0  ;;  %vm1157_vm6 = vcmp.eq.s32.totalorder %v3879_v36, %v3809_v20  ;;  %vm1158_vm7 = vcmp.eq.s32.totalorder %v3879_v36, %v3812_v21 }
  0xa0   : > { %v1119_v53 = vadd.f32 %v1087_v50, %v1013_v44  ;;  %v1120_v54 = vadd.f32 %v1088_v52, %v1014_v45  ;;  %v1193_v58 = vsel %vm1157_vm6, %v3859_v25, 0.0  ;;  %v1194_v59 = vsel %vm1158_vm7, %v3859_v25, 0.0 }
  0xa1   : > { %3220 = vmatpush3.bf16.msra.mxu1 %v805_v51  ;;  %vm428_vm8 = vcmp.eq.s32.totalorder %v3904_v10, %v3809_v20  ;;  %vm429_vm9 = vcmp.eq.s32.totalorder %v3904_v10, %v3812_v21  ;;  %vm505_vm10 = vcmp.eq.s32.totalorder %v3923_v40, %v3809_v20  ;;  %vm506_vm11 = vcmp.eq.s32.totalorder %v3923_v40, %v3812_v21 }
  0xa2   : > { %v1225_v60 = vadd.f32 %v1193_v58, %v1119_v53  ;;  %v1226_v61 = vadd.f32 %v1194_v59, %v1120_v54  ;;  %v464_v62 = vsel %vm428_vm8, %v3898_v0, 0.0  ;;  %v465_v63 = vsel %vm429_vm9, %v3898_v0, 0.0 }
  0xa3   : > { %v541_v22 = vsel %vm505_vm10, %v3901_v9, 0.0  ;;  %v542_v55 = vsel %vm506_vm11, %v3901_v9, 0.0  ;;  %vm611_vm12 = vcmp.eq.s32.totalorder %v3926_v41, %v3809_v20  ;;  %vm612_vm13 = vcmp.eq.s32.totalorder %v3926_v41, %v3812_v21 }
  0xa4   : > { %v1255_v48 = vpack.c.bf16 %v1226_v61, %v1225_v60  ;;  %v573_v56 = vadd.f32 %v541_v22, %v464_v62  ;;  %v574_v57 = vadd.f32 %v542_v55, %v465_v63  ;;  %v647_v32 = vsel %vm611_vm12, %v3910_v46, 0.0 }
  0xa5   : > { %v648_v24 = vsel %vm612_vm13, %v3910_v46, 0.0  ;;  %vm717_vm14 = vcmp.eq.s32.totalorder %v3933_v43, %v3809_v20  ;;  %vm718_vm15 = vcmp.eq.s32.totalorder %v3933_v43, %v3812_v21  ;;  %vm852_vm0 = vcmp.eq.s32.totalorder %v3850_v15, %v3815_v26 }
  0xa6   : > { %3181 = vmatprep.subr.bf16.mxu0 %v1255_v48  ;;  %v679_v37 = vadd.f32 %v647_v32, %v573_v56  ;;  %v680_v47 = vadd.f32 %v648_v24, %v574_v57  ;;  %v753_v38 = vsel %vm717_vm14, %v3914_v2, 0.0  ;;  %v754_v39 = vsel %vm718_vm15, %v3914_v2, 0.0 }
  0xa7   : > { %vm853_vm1 = vcmp.eq.s32.totalorder %v3850_v15, %v3818_v27  ;;  %v888_v44 = vsel %vm852_vm0, %v3866_v29, 0.0  ;;  %vm929_vm2 = vcmp.eq.s32.totalorder %v3872_v31, %v3815_v26  ;;  %vm930_vm3 = vcmp.eq.s32.totalorder %v3872_v31, %v3818_v27 }
  0xa8   : > { %v785_v45 = vadd.f32 %v753_v38, %v679_v37  ;;  %v786_v50 = vadd.f32 %v754_v39, %v680_v47  ;;  %v889_v51 = vsel %vm853_vm1, %v3866_v29, 0.0  ;;  %v965_v52 = vsel %vm929_vm2, %v3853_v16, 0.0 }
  0xa9   : > { %v966_v53 = vsel %vm930_vm3, %v3853_v16, 0.0  ;;  %v997_v54 = vadd.f32 %v965_v52, %v888_v44  ;;  %vm1035_vm4 = vcmp.eq.s32.totalorder %v3856_v23, %v3815_v26  ;;  %vm1036_vm5 = vcmp.eq.s32.totalorder %v3856_v23, %v3818_v27 }
  0xaa   : > { %v814_v58 = vpack.c.bf16 %v786_v50, %v785_v45  ;;  %v998_v59 = vadd.f32 %v966_v53, %v889_v51  ;;  %v1071_v60 = vsel %vm1035_vm4, %v3869_v30, 0.0  ;;  %v1072_v61 = vsel %vm1036_vm5, %v3869_v30, 0.0 }
  0xab   : > { %v1103_v62 = vadd.f32 %v1071_v60, %v997_v54  ;;  %vm1141_vm6 = vcmp.eq.s32.totalorder %v3879_v36, %v3815_v26  ;;  %vm1142_vm7 = vcmp.eq.s32.totalorder %v3879_v36, %v3818_v27  ;;  %vm412_vm8 = vcmp.eq.s32.totalorder %v3904_v10, %v3815_v26 }
  0xac   : > { %3221 = vmatprep.subr.bf16.mxu1 %v814_v58  ;;  %v1104_v63 = vadd.f32 %v1072_v61, %v998_v59  ;;  %v1177_v22 = vsel %vm1141_vm6, %v3859_v25, 0.0  ;;  %v1178_v55 = vsel %vm1142_vm7, %v3859_v25, 0.0  ;;  %vm413_vm9 = vcmp.eq.s32.totalorder %v3904_v10, %v3818_v27 }
  0xad   : > { %v1209_v48 = vadd.f32 %v1177_v22, %v1103_v62  ;;  %v448_v56 = vsel %vm412_vm8, %v3898_v0, 0.0  ;;  %v449_v57 = vsel %vm413_vm9, %v3898_v0, 0.0  ;;  %vm489_vm10 = vcmp.eq.s32.totalorder %v3923_v40, %v3815_v26 }
  0xae   : > { %v1210_v32 = vadd.f32 %v1178_v55, %v1104_v63  ;;  %vm490_vm11 = vcmp.eq.s32.totalorder %v3923_v40, %v3818_v27  ;;  %v525_v24 = vsel %vm489_vm10, %v3901_v9, 0.0  ;;  %vm595_vm12 = vcmp.eq.s32.totalorder %v3926_v41, %v3815_v26 }
  0xaf   : > { %v526_v37 = vsel %vm490_vm11, %v3901_v9, 0.0  ;;  %v557_v47 = vadd.f32 %v525_v24, %v448_v56  ;;  %vm596_vm13 = vcmp.eq.s32.totalorder %v3926_v41, %v3818_v27  ;;  %v631_v38 = vsel %vm595_vm12, %v3910_v46, 0.0 }
  0xb0   : > { %v1247_v39 = vpack.c.bf16 %v1210_v32, %v1209_v48  ;;  %v558_v44 = vadd.f32 %v526_v37, %v449_v57  ;;  %v632_v45 = vsel %vm596_vm13, %v3910_v46, 0.0  ;;  %vm701_vm14 = vcmp.eq.s32.totalorder %v3933_v43, %v3815_v26 }
  0xb1   : > { %v663_v50 = vadd.f32 %v631_v38, %v557_v47  ;;  %vm702_vm15 = vcmp.eq.s32.totalorder %v3933_v43, %v3818_v27  ;;  %v737_v51 = vsel %vm701_vm14, %v3914_v2, 0.0  ;;  %vm870_vm0 = vcmp.eq.s32.totalorder %v3850_v15, %v3821_v28 }
  0xb2   : > { %3182 = vmatpush3.bf16.msra.mxu0 %v1247_v39  ;;  %v664_v52 = vadd.f32 %v632_v45, %v558_v44  ;;  %v738_v53 = vsel %vm702_vm15, %v3914_v2, 0.0  ;;  %vm871_vm1 = vcmp.eq.s32.totalorder %v3850_v15, %v3826_v33  ;;  %v906_v54 = vsel %vm870_vm0, %v3866_v29, 0.0 }
  0xb3   : > { %v769_v58 = vadd.f32 %v737_v51, %v663_v50  ;;  %v907_v59 = vsel %vm871_vm1, %v3866_v29, 0.0  ;;  %vm947_vm2 = vcmp.eq.s32.totalorder %v3872_v31, %v3821_v28  ;;  %vm948_vm3 = vcmp.eq.s32.totalorder %v3872_v31, %v3826_v33 }
  0xb4   : > { %v770_v60 = vadd.f32 %v738_v53, %v664_v52  ;;  %v983_v61 = vsel %vm947_vm2, %v3853_v16, 0.0  ;;  %v984_v62 = vsel %vm948_vm3, %v3853_v16, 0.0  ;;  %vm1053_vm4 = vcmp.eq.s32.totalorder %v3856_v23, %v3821_v28 }
  0xb5   : > { %v1015_v63 = vadd.f32 %v983_v61, %v906_v54  ;;  %v1016_v22 = vadd.f32 %v984_v62, %v907_v59  ;;  %vm1054_vm5 = vcmp.eq.s32.totalorder %v3856_v23, %v3826_v33  ;;  %v1089_v55 = vsel %vm1053_vm4, %v3869_v30, 0.0 }
  0xb6   : > { %v806_v48 = vpack.c.bf16 %v770_v60, %v769_v58  ;;  %v1090_v56 = vsel %vm1054_vm5, %v3869_v30, 0.0  ;;  %vm1159_vm6 = vcmp.eq.s32.totalorder %v3879_v36, %v3821_v28  ;;  %vm1160_vm7 = vcmp.eq.s32.totalorder %v3879_v36, %v3826_v33 }
  0xb7   : > { %v1121_v57 = vadd.f32 %v1089_v55, %v1015_v63  ;;  %v1122_v32 = vadd.f32 %v1090_v56, %v1016_v22  ;;  %v1195_v24 = vsel %vm1159_vm6, %v3859_v25, 0.0  ;;  %v1196_v37 = vsel %vm1160_vm7, %v3859_v25, 0.0 }
  0xb8   : > { %3222 = vmatpush3.bf16.msra.mxu1 %v806_v48  ;;  %vm430_vm8 = vcmp.eq.s32.totalorder %v3904_v10, %v3821_v28  ;;  %vm431_vm9 = vcmp.eq.s32.totalorder %v3904_v10, %v3826_v33  ;;  %vm507_vm10 = vcmp.eq.s32.totalorder %v3923_v40, %v3821_v28  ;;  %vm508_vm11 = vcmp.eq.s32.totalorder %v3923_v40, %v3826_v33 }
  0xb9   : > { %v1227_v47 = vadd.f32 %v1195_v24, %v1121_v57  ;;  %v1228_v38 = vadd.f32 %v1196_v37, %v1122_v32  ;;  %v466_v39 = vsel %vm430_vm8, %v3898_v0, 0.0  ;;  %v467_v44 = vsel %vm431_vm9, %v3898_v0, 0.0 }
  0xba   : > { %v543_v45 = vsel %vm507_vm10, %v3901_v9, 0.0  ;;  %v544_v50 = vsel %vm508_vm11, %v3901_v9, 0.0  ;;  %vm613_vm12 = vcmp.eq.s32.totalorder %v3926_v41, %v3821_v28  ;;  %vm614_vm13 = vcmp.eq.s32.totalorder %v3926_v41, %v3826_v33 }
  0xbb   : > { %v1256_v51 = vpack.c.bf16 %v1228_v38, %v1227_v47  ;;  %v575_v52 = vadd.f32 %v543_v45, %v466_v39  ;;  %v576_v53 = vadd.f32 %v544_v50, %v467_v44  ;;  %v649_v54 = vsel %vm613_vm12, %v3910_v46, 0.0 }
  0xbc   : > { %v650_v58 = vsel %vm614_vm13, %v3910_v46, 0.0  ;;  %vm719_vm14 = vcmp.eq.s32.totalorder %v3933_v43, %v3821_v28  ;;  %vm720_vm15 = vcmp.eq.s32.totalorder %v3933_v43, %v3826_v33  ;;  %vm854_vm0 = vcmp.eq.s32.totalorder %v3850_v15, %v3829_v34 }
  0xbd   : > { %3183 = vmatprep.subr.bf16.mxu0 %v1256_v51  ;;  %v681_v59 = vadd.f32 %v649_v54, %v575_v52  ;;  %v682_v60 = vadd.f32 %v650_v58, %v576_v53  ;;  %v755_v61 = vsel %vm719_vm14, %v3914_v2, 0.0  ;;  %v756_v62 = vsel %vm720_vm15, %v3914_v2, 0.0 }
  0xbe   : > { %vm855_vm1 = vcmp.eq.s32.totalorder %v3850_v15, %v3832_v35  ;;  %v890_v63 = vsel %vm854_vm0, %v3866_v29, 0.0  ;;  %vm931_vm2 = vcmp.eq.s32.totalorder %v3872_v31, %v3829_v34  ;;  %vm932_vm3 = vcmp.eq.s32.totalorder %v3872_v31, %v3832_v35 }
  0xbf   : > { %v787_v22 = vadd.f32 %v755_v61, %v681_v59  ;;  %v788_v55 = vadd.f32 %v756_v62, %v682_v60  ;;  %v891_v48 = vsel %vm855_vm1, %v3866_v29, 0.0  ;;  %v967_v56 = vsel %vm931_vm2, %v3853_v16, 0.0 }
  0xc0   : > { %v968_v57 = vsel %vm932_vm3, %v3853_v16, 0.0  ;;  %v999_v32 = vadd.f32 %v967_v56, %v890_v63  ;;  %vm1037_vm4 = vcmp.eq.s32.totalorder %v3856_v23, %v3829_v34  ;;  %vm1038_vm5 = vcmp.eq.s32.totalorder %v3856_v23, %v3832_v35 }
  0xc1   : > { %v815_v24 = vpack.c.bf16 %v788_v55, %v787_v22  ;;  %v1000_v37 = vadd.f32 %v968_v57, %v891_v48  ;;  %v1073_v47 = vsel %vm1037_vm4, %v3869_v30, 0.0  ;;  %v1074_v38 = vsel %vm1038_vm5, %v3869_v30, 0.0 }
  0xc2   : > { %v1105_v39 = vadd.f32 %v1073_v47, %v999_v32  ;;  %vm1143_vm6 = vcmp.eq.s32.totalorder %v3879_v36, %v3829_v34  ;;  %vm1144_vm7 = vcmp.eq.s32.totalorder %v3879_v36, %v3832_v35  ;;  %vm414_vm8 = vcmp.eq.s32.totalorder %v3904_v10, %v3829_v34 }
  0xc3   : > { %3223 = vmatprep.subr.bf16.mxu1 %v815_v24  ;;  %v1106_v44 = vadd.f32 %v1074_v38, %v1000_v37  ;;  %v1179_v45 = vsel %vm1143_vm6, %v3859_v25, 0.0  ;;  %v1180_v50 = vsel %vm1144_vm7, %v3859_v25, 0.0  ;;  %vm415_vm9 = vcmp.eq.s32.totalorder %v3904_v10, %v3832_v35 }
  0xc4   : > { %v1211_v51 = vadd.f32 %v1179_v45, %v1105_v39  ;;  %v450_v52 = vsel %vm414_vm8, %v3898_v0, 0.0  ;;  %v451_v53 = vsel %vm415_vm9, %v3898_v0, 0.0  ;;  %vm491_vm10 = vcmp.eq.s32.totalorder %v3923_v40, %v3829_v34 }
  0xc5   : > { %v1212_v54 = vadd.f32 %v1180_v50, %v1106_v44  ;;  %vm492_vm11 = vcmp.eq.s32.totalorder %v3923_v40, %v3832_v35  ;;  %v527_v58 = vsel %vm491_vm10, %v3901_v9, 0.0  ;;  %vm597_vm12 = vcmp.eq.s32.totalorder %v3926_v41, %v3829_v34 }
  0xc6   : > { %v528_v59 = vsel %vm492_vm11, %v3901_v9, 0.0  ;;  %v559_v60 = vadd.f32 %v527_v58, %v450_v52  ;;  %vm598_vm13 = vcmp.eq.s32.totalorder %v3926_v41, %v3832_v35  ;;  %v633_v61 = vsel %vm597_vm12, %v3910_v46, 0.0 }
  0xc7   : > { %v1248_v62 = vpack.c.bf16 %v1212_v54, %v1211_v51  ;;  %v560_v63 = vadd.f32 %v528_v59, %v451_v53  ;;  %v634_v22 = vsel %vm598_vm13, %v3910_v46, 0.0  ;;  %vm703_vm14 = vcmp.eq.s32.totalorder %v3933_v43, %v3829_v34 }
  0xc8   : > { %v665_v55 = vadd.f32 %v633_v61, %v559_v60  ;;  %vm704_vm15 = vcmp.eq.s32.totalorder %v3933_v43, %v3832_v35  ;;  %v739_v48 = vsel %vm703_vm14, %v3914_v2, 0.0  ;;  %vm872_vm0 = vcmp.eq.s32.totalorder %v3850_v15, %v3839_v42 }
  0xc9   : > { %3184 = vmatpush3.bf16.msra.mxu0 %v1248_v62  ;;  %v666_v56 = vadd.f32 %v634_v22, %v560_v63  ;;  %v740_v57 = vsel %vm704_vm15, %v3914_v2, 0.0  ;;  %vm873_vm1 = vcmp.eq.s32.totalorder %v3850_v15, %v3845_v49  ;;  %v908_v32 = vsel %vm872_vm0, %v3866_v29, 0.0 }
  0xca   : > { %v771_v24 = vadd.f32 %v739_v48, %v665_v55  ;;  %v909_v37 = vsel %vm873_vm1, %v3866_v29, 0.0  ;;  %vm949_vm2 = vcmp.eq.s32.totalorder %v3872_v31, %v3839_v42  ;;  %vm950_vm3 = vcmp.eq.s32.totalorder %v3872_v31, %v3845_v49 }
  0xcb   : > { %v772_v47 = vadd.f32 %v740_v57, %v666_v56  ;;  %v985_v38 = vsel %vm949_vm2, %v3853_v16, 0.0  ;;  %v986_v39 = vsel %vm950_vm3, %v3853_v16, 0.0  ;;  %vm1055_vm4 = vcmp.eq.s32.totalorder %v3856_v23, %v3839_v42 }
  0xcc   : > { %v1017_v44 = vadd.f32 %v985_v38, %v908_v32  ;;  %v1018_v45 = vadd.f32 %v986_v39, %v909_v37  ;;  %vm1056_vm5 = vcmp.eq.s32.totalorder %v3856_v23, %v3845_v49  ;;  %v1091_v50 = vsel %vm1055_vm4, %v3869_v30, 0.0 }
  0xcd   : > { %v807_v51 = vpack.c.bf16 %v772_v47, %v771_v24  ;;  %v1092_v52 = vsel %vm1056_vm5, %v3869_v30, 0.0  ;;  %vm1161_vm6 = vcmp.eq.s32.totalorder %v3879_v36, %v3839_v42  ;;  %vm1162_vm7 = vcmp.eq.s32.totalorder %v3879_v36, %v3845_v49 }
  0xce   : > { %v1123_v53 = vadd.f32 %v1091_v50, %v1017_v44  ;;  %v1124_v54 = vadd.f32 %v1092_v52, %v1018_v45  ;;  %v1197_v58 = vsel %vm1161_vm6, %v3859_v25, 0.0  ;;  %v1198_v59 = vsel %vm1162_vm7, %v3859_v25, 0.0 }
  0xcf   : > { %3224 = vmatpush3.bf16.msra.mxu1 %v807_v51  ;;  %vm432_vm8 = vcmp.eq.s32.totalorder %v3904_v10, %v3839_v42  ;;  %vm433_vm9 = vcmp.eq.s32.totalorder %v3904_v10, %v3845_v49  ;;  %vm509_vm10 = vcmp.eq.s32.totalorder %v3923_v40, %v3839_v42  ;;  %vm510_vm11 = vcmp.eq.s32.totalorder %v3923_v40, %v3845_v49 }
  0xd0   : > { %v1229_v60 = vadd.f32 %v1197_v58, %v1123_v53  ;;  %v1230_v61 = vadd.f32 %v1198_v59, %v1124_v54  ;;  %v468_v62 = vsel %vm432_vm8, %v3898_v0, 0.0  ;;  %v469_v63 = vsel %vm433_vm9, %v3898_v0, 0.0 }
  0xd1   : > { %v545_v22 = vsel %vm509_vm10, %v3901_v9, 0.0  ;;  %v546_v55 = vsel %vm510_vm11, %v3901_v9, 0.0  ;;  %vm615_vm12 = vcmp.eq.s32.totalorder %v3926_v41, %v3839_v42  ;;  %vm616_vm13 = vcmp.eq.s32.totalorder %v3926_v41, %v3845_v49 }
  0xd2   : > { %v1257_v48 = vpack.c.bf16 %v1230_v61, %v1229_v60  ;;  %v577_v56 = vadd.f32 %v545_v22, %v468_v62  ;;  %v578_v57 = vadd.f32 %v546_v55, %v469_v63  ;;  %v651_v32 = vsel %vm615_vm12, %v3910_v46, 0.0 }
  0xd3   : > { %v652_v24 = vsel %vm616_vm13, %v3910_v46, 0.0  ;;  %vm721_vm14 = vcmp.eq.s32.totalorder %v3933_v43, %v3839_v42  ;;  %vm722_vm15 = vcmp.eq.s32.totalorder %v3933_v43, %v3845_v49  ;;  %v4431_v37 = vadd.s32 80, %v3765_v1 }
  0xd4   : > { %3185 = vmatprep.subr.bf16.mxu0 %v1257_v48  ;;  %v683_v47 = vadd.f32 %v651_v32, %v577_v56  ;;  %v684_v38 = vadd.f32 %v652_v24, %v578_v57  ;;  %v757_v39 = vsel %vm721_vm14, %v3914_v2, 0.0  ;;  %v758_v44 = vsel %vm722_vm15, %v3914_v2, 0.0 }
  0xd5   : > { %v4436_v45 = vadd.s32 88, %v3765_v1  ;;  %vm856_vm0 = vcmp.eq.s32.totalorder %v3850_v15, %v4431_v37  ;;  %vm933_vm1 = vcmp.eq.s32.totalorder %v3872_v31, %v4431_v37  ;;  %vm1039_vm2 = vcmp.eq.s32.totalorder %v3856_v23, %v4431_v37 }
  0xd6   : > { %v789_v50 = vadd.f32 %v757_v39, %v683_v47  ;;  %v790_v51 = vadd.f32 %v758_v44, %v684_v38  ;;  %v892_v52 = vsel %vm856_vm0, %v3866_v29, 0.0  ;;  %v969_v53 = vsel %vm933_vm1, %v3853_v16, 0.0 }
  0xd7   : > { %vm857_vm3 = vcmp.eq.s32.totalorder %v3850_v15, %v4436_v45  ;;  %vm934_vm4 = vcmp.eq.s32.totalorder %v3872_v31, %v4436_v45  ;;  %v1001_v54 = vadd.f32 %v969_v53, %v892_v52  ;;  %vm1040_vm5 = vcmp.eq.s32.totalorder %v3856_v23, %v4436_v45 }
  0xd8   : > { %v816_v58 = vpack.c.bf16 %v790_v51, %v789_v50  ;;  %v893_v59 = vsel %vm857_vm3, %v3866_v29, 0.0  ;;  %v970_v60 = vsel %vm934_vm4, %v3853_v16, 0.0  ;;  %v1075_v61 = vsel %vm1039_vm2, %v3869_v30, 0.0 }
  0xd9   : > { %v1002_v62 = vadd.f32 %v970_v60, %v893_v59  ;;  %v1076_v63 = vsel %vm1040_vm5, %v3869_v30, 0.0  ;;  %v1107_v22 = vadd.f32 %v1075_v61, %v1001_v54  ;;  %vm1145_vm6 = vcmp.eq.s32.totalorder %v3879_v36, %v4431_v37 }
  0xda   : > { %3225 = vmatprep.subr.bf16.mxu1 %v816_v58  ;;  %vm1146_vm7 = vcmp.eq.s32.totalorder %v3879_v36, %v4436_v45  ;;  %v1181_v55 = vsel %vm1145_vm6, %v3859_v25, 0.0  ;;  %vm416_vm8 = vcmp.eq.s32.totalorder %v3904_v10, %v4431_v37  ;;  %vm417_vm9 = vcmp.eq.s32.totalorder %v3904_v10, %v4436_v45 }
  0xdb   : > { %v1108_v48 = vadd.f32 %v1076_v63, %v1002_v62  ;;  %v1182_v56 = vsel %vm1146_vm7, %v3859_v25, 0.0  ;;  %v1213_v57 = vadd.f32 %v1181_v55, %v1107_v22  ;;  %v452_v32 = vsel %vm416_vm8, %v3898_v0, 0.0 }
  0xdc   : > { %v453_v24 = vsel %vm417_vm9, %v3898_v0, 0.0  ;;  %vm493_vm10 = vcmp.eq.s32.totalorder %v3923_v40, %v4431_v37  ;;  %vm494_vm11 = vcmp.eq.s32.totalorder %v3923_v40, %v4436_v45  ;;  %vm599_vm12 = vcmp.eq.s32.totalorder %v3926_v41, %v4431_v37 }
  0xdd   : > { %v1214_v47 = vadd.f32 %v1182_v56, %v1108_v48  ;;  %v529_v38 = vsel %vm493_vm10, %v3901_v9, 0.0  ;;  %v530_v39 = vsel %vm494_vm11, %v3901_v9, 0.0  ;;  %vm600_vm13 = vcmp.eq.s32.totalorder %v3926_v41, %v4436_v45 }
  0xde   : > { %v561_v44 = vadd.f32 %v529_v38, %v452_v32  ;;  %v562_v50 = vadd.f32 %v530_v39, %v453_v24  ;;  %v635_v51 = vsel %vm599_vm12, %v3910_v46, 0.0  ;;  %v636_v52 = vsel %vm600_vm13, %v3910_v46, 0.0 }
  0xdf   : > { %v1249_v53 = vpack.c.bf16 %v1214_v47, %v1213_v57  ;;  %vm705_vm14 = vcmp.eq.s32.totalorder %v3933_v43, %v4431_v37  ;;  %vm706_vm15 = vcmp.eq.s32.totalorder %v3933_v43, %v4436_v45  ;;  %v4485_v54 = vadd.s32 224, %v3765_v1 }
  0xe0   : > { %v667_v58 = vadd.f32 %v635_v51, %v561_v44  ;;  %v668_v59 = vadd.f32 %v636_v52, %v562_v50  ;;  %v741_v60 = vsel %vm705_vm14, %v3914_v2, 0.0  ;;  %v742_v61 = vsel %vm706_vm15, %v3914_v2, 0.0 }
  0xe1   : > { %3186 = vmatpush3.bf16.msra.mxu0 %v1249_v53  ;;  %v4490_v62 = vadd.s32 232, %v3765_v1  ;;  %vm874_vm0 = vcmp.eq.s32.totalorder %v3850_v15, %v4485_v54  ;;  %vm951_vm1 = vcmp.eq.s32.totalorder %v3872_v31, %v4485_v54  ;;  %vm1057_vm2 = vcmp.eq.s32.totalorder %v3856_v23, %v4485_v54 }
  0xe2   : > { %v773_v63 = vadd.f32 %v741_v60, %v667_v58  ;;  %v774_v22 = vadd.f32 %v742_v61, %v668_v59  ;;  %v910_v55 = vsel %vm874_vm0, %v3866_v29, 0.0  ;;  %v987_v48 = vsel %vm951_vm1, %v3853_v16, 0.0 }
  0xe3   : > { %vm875_vm3 = vcmp.eq.s32.totalorder %v3850_v15, %v4490_v62  ;;  %vm952_vm4 = vcmp.eq.s32.totalorder %v3872_v31, %v4490_v62  ;;  %v1019_v56 = vadd.f32 %v987_v48, %v910_v55  ;;  %vm1058_vm5 = vcmp.eq.s32.totalorder %v3856_v23, %v4490_v62 }
  0xe4   : > { %v808_v57 = vpack.c.bf16 %v774_v22, %v773_v63  ;;  %v911_v32 = vsel %vm875_vm3, %v3866_v29, 0.0  ;;  %v988_v24 = vsel %vm952_vm4, %v3853_v16, 0.0  ;;  %v1093_v47 = vsel %vm1057_vm2, %v3869_v30, 0.0 }
  0xe5   : > { %v1020_v38 = vadd.f32 %v988_v24, %v911_v32  ;;  %v1094_v39 = vsel %vm1058_vm5, %v3869_v30, 0.0  ;;  %v1125_v44 = vadd.f32 %v1093_v47, %v1019_v56  ;;  %vm1163_vm6 = vcmp.eq.s32.totalorder %v3879_v36, %v4485_v54 }
  0xe6   : > { %3226 = vmatpush3.bf16.msra.mxu1 %v808_v57  ;;  %vm1164_vm7 = vcmp.eq.s32.totalorder %v3879_v36, %v4490_v62  ;;  %v1199_v50 = vsel %vm1163_vm6, %v3859_v25, 0.0  ;;  %vm434_vm8 = vcmp.eq.s32.totalorder %v3904_v10, %v4485_v54  ;;  %vm435_vm9 = vcmp.eq.s32.totalorder %v3904_v10, %v4490_v62 }
  0xe7   : > { %v1126_v51 = vadd.f32 %v1094_v39, %v1020_v38  ;;  %v1200_v52 = vsel %vm1164_vm7, %v3859_v25, 0.0  ;;  %v1231_v53 = vadd.f32 %v1199_v50, %v1125_v44  ;;  %v470_v58 = vsel %vm434_vm8, %v3898_v0, 0.0 }
  0xe8   : > { %v471_v59 = vsel %vm435_vm9, %v3898_v0, 0.0  ;;  %vm511_vm10 = vcmp.eq.s32.totalorder %v3923_v40, %v4485_v54  ;;  %vm512_vm11 = vcmp.eq.s32.totalorder %v3923_v40, %v4490_v62  ;;  %vm617_vm12 = vcmp.eq.s32.totalorder %v3926_v41, %v4485_v54 }
  0xe9   : > { %v1232_v60 = vadd.f32 %v1200_v52, %v1126_v51  ;;  %v547_v61 = vsel %vm511_vm10, %v3901_v9, 0.0  ;;  %v548_v63 = vsel %vm512_vm11, %v3901_v9, 0.0  ;;  %vm618_vm13 = vcmp.eq.s32.totalorder %v3926_v41, %v4490_v62 }
  0xea   : > { %v579_v22 = vadd.f32 %v547_v61, %v470_v58  ;;  %v580_v55 = vadd.f32 %v548_v63, %v471_v59  ;;  %v653_v48 = vsel %vm617_vm12, %v3910_v46, 0.0  ;;  %v654_v56 = vsel %vm618_vm13, %v3910_v46, 0.0 }
  0xeb   : > { %v1258_v57 = vpack.c.bf16 %v1232_v60, %v1231_v53  ;;  %vm723_vm14 = vcmp.eq.s32.totalorder %v3933_v43, %v4485_v54  ;;  %vm724_vm15 = vcmp.eq.s32.totalorder %v3933_v43, %v4490_v62  ;;  %v4539_v32 = vadd.s32 96, %v3765_v1 }
  0xec   : > { %v685_v24 = vadd.f32 %v653_v48, %v579_v22  ;;  %v686_v47 = vadd.f32 %v654_v56, %v580_v55  ;;  %v759_v38 = vsel %vm723_vm14, %v3914_v2, 0.0  ;;  %v760_v39 = vsel %vm724_vm15, %v3914_v2, 0.0 }
  0xed   : > { %5756 = vst [vmem:[#allocation8_spill] sm:$0xff] %v4539_v32  ;;  %3187 = vmatprep.subr.bf16.mxu0 %v1258_v57  ;;  %v4544_v44 = vadd.s32 104, %v3765_v1  ;;  %vm858_vm0 = vcmp.eq.s32.totalorder %v3850_v15, %v4539_v32  ;;  %vm935_vm1 = vcmp.eq.s32.totalorder %v3872_v31, %v4539_v32  ;;  %vm1041_vm2 = vcmp.eq.s32.totalorder %v3856_v23, %v4539_v32 }
  0xee   : > { %v791_v50 = vadd.f32 %v759_v38, %v685_v24  ;;  %v792_v51 = vadd.f32 %v760_v39, %v686_v47  ;;  %v894_v52 = vsel %vm858_vm0, %v3866_v29, 0.0  ;;  %v971_v53 = vsel %vm935_vm1, %v3853_v16, 0.0 }
  0xef   : > { %5757 = vst [vmem:[#allocation9_spill] sm:$0xff] %v4544_v44  ;;  %vm859_vm3 = vcmp.eq.s32.totalorder %v3850_v15, %v4544_v44  ;;  %vm936_vm4 = vcmp.eq.s32.totalorder %v3872_v31, %v4544_v44  ;;  %v1003_v58 = vadd.f32 %v971_v53, %v894_v52  ;;  %vm1042_vm5 = vcmp.eq.s32.totalorder %v3856_v23, %v4544_v44 }
  0xf0   : > { %v817_v59 = vpack.c.bf16 %v792_v51, %v791_v50  ;;  %v895_v60 = vsel %vm859_vm3, %v3866_v29, 0.0  ;;  %v972_v61 = vsel %vm936_vm4, %v3853_v16, 0.0  ;;  %v1077_v63 = vsel %vm1041_vm2, %v3869_v30, 0.0 }
  0xf1   : > { %v1004_v22 = vadd.f32 %v972_v61, %v895_v60  ;;  %v1078_v55 = vsel %vm1042_vm5, %v3869_v30, 0.0  ;;  %v1109_v48 = vadd.f32 %v1077_v63, %v1003_v58  ;;  %vm1147_vm6 = vcmp.eq.s32.totalorder %v3879_v36, %v4539_v32 }
  0xf2   : > { %3227 = vmatprep.subr.bf16.mxu1 %v817_v59  ;;  %vm1148_vm7 = vcmp.eq.s32.totalorder %v3879_v36, %v4544_v44  ;;  %v1183_v56 = vsel %vm1147_vm6, %v3859_v25, 0.0  ;;  %vm418_vm8 = vcmp.eq.s32.totalorder %v3904_v10, %v4539_v32  ;;  %vm419_vm9 = vcmp.eq.s32.totalorder %v3904_v10, %v4544_v44 }
  0xf3   : > { %v1110_v57 = vadd.f32 %v1078_v55, %v1004_v22  ;;  %v1184_v24 = vsel %vm1148_vm7, %v3859_v25, 0.0  ;;  %v1215_v47 = vadd.f32 %v1183_v56, %v1109_v48  ;;  %v454_v38 = vsel %vm418_vm8, %v3898_v0, 0.0 }
  0xf4   : > { %v455_v39 = vsel %vm419_vm9, %v3898_v0, 0.0  ;;  %vm495_vm10 = vcmp.eq.s32.totalorder %v3923_v40, %v4539_v32  ;;  %vm496_vm11 = vcmp.eq.s32.totalorder %v3923_v40, %v4544_v44  ;;  %vm601_vm12 = vcmp.eq.s32.totalorder %v3926_v41, %v4539_v32 }
  0xf5   : > { %v1216_v50 = vadd.f32 %v1184_v24, %v1110_v57  ;;  %v531_v51 = vsel %vm495_vm10, %v3901_v9, 0.0  ;;  %v532_v52 = vsel %vm496_vm11, %v3901_v9, 0.0  ;;  %vm602_vm13 = vcmp.eq.s32.totalorder %v3926_v41, %v4544_v44 }
  0xf6   : > { %v563_v53 = vadd.f32 %v531_v51, %v454_v38  ;;  %v564_v58 = vadd.f32 %v532_v52, %v455_v39  ;;  %v637_v59 = vsel %vm601_vm12, %v3910_v46, 0.0  ;;  %v638_v60 = vsel %vm602_vm13, %v3910_v46, 0.0 }
  0xf7   : > { %v1250_v61 = vpack.c.bf16 %v1216_v50, %v1215_v47  ;;  %vm707_vm14 = vcmp.eq.s32.totalorder %v3933_v43, %v4539_v32  ;;  %vm708_vm15 = vcmp.eq.s32.totalorder %v3933_v43, %v4544_v44  ;;  %v4593_v63 = vadd.s32 240, %v3765_v1 }
  0xf8   : > { %v669_v22 = vadd.f32 %v637_v59, %v563_v53  ;;  %v670_v55 = vadd.f32 %v638_v60, %v564_v58  ;;  %v743_v48 = vsel %vm707_vm14, %v3914_v2, 0.0  ;;  %v744_v56 = vsel %vm708_vm15, %v3914_v2, 0.0 }
  0xf9   : > { %5758 = vst [vmem:[#allocation10_spill] sm:$0xff] %v4593_v63  ;;  %3188 = vmatpush3.bf16.msra.mxu0 %v1250_v61  ;;  %v4598_v57 = vadd.s32 248, %v3765_v1  ;;  %vm876_vm0 = vcmp.eq.s32.totalorder %v3850_v15, %v4593_v63  ;;  %vm953_vm1 = vcmp.eq.s32.totalorder %v3872_v31, %v4593_v63  ;;  %vm1059_vm2 = vcmp.eq.s32.totalorder %v3856_v23, %v4593_v63 }
  0xfa   : > { %v775_v24 = vadd.f32 %v743_v48, %v669_v22  ;;  %v776_v47 = vadd.f32 %v744_v56, %v670_v55  ;;  %v912_v38 = vsel %vm876_vm0, %v3866_v29, 0.0  ;;  %v989_v39 = vsel %vm953_vm1, %v3853_v16, 0.0 }
  0xfb   : > { %5759 = vst [vmem:[#allocation11_spill] sm:$0xff] %v4598_v57  ;;  %vm877_vm3 = vcmp.eq.s32.totalorder %v3850_v15, %v4598_v57  ;;  %vm954_vm4 = vcmp.eq.s32.totalorder %v3872_v31, %v4598_v57  ;;  %v1021_v50 = vadd.f32 %v989_v39, %v912_v38  ;;  %vm1060_vm5 = vcmp.eq.s32.totalorder %v3856_v23, %v4598_v57 }
  0xfc   : > { %v809_v51 = vpack.c.bf16 %v776_v47, %v775_v24  ;;  %v913_v52 = vsel %vm877_vm3, %v3866_v29, 0.0  ;;  %v990_v53 = vsel %vm954_vm4, %v3853_v16, 0.0  ;;  %v1095_v58 = vsel %vm1059_vm2, %v3869_v30, 0.0 }
  0xfd   : > { %v1022_v59 = vadd.f32 %v990_v53, %v913_v52  ;;  %v1096_v60 = vsel %vm1060_vm5, %v3869_v30, 0.0  ;;  %v1127_v61 = vadd.f32 %v1095_v58, %v1021_v50  ;;  %vm1165_vm6 = vcmp.eq.s32.totalorder %v3879_v36, %v4593_v63 }
  0xfe   : > { %3228 = vmatpush3.bf16.msra.mxu1 %v809_v51  ;;  %vm1166_vm7 = vcmp.eq.s32.totalorder %v3879_v36, %v4598_v57  ;;  %v1201_v22 = vsel %vm1165_vm6, %v3859_v25, 0.0  ;;  %vm436_vm8 = vcmp.eq.s32.totalorder %v3904_v10, %v4593_v63  ;;  %vm437_vm9 = vcmp.eq.s32.totalorder %v3904_v10, %v4598_v57 }
  0xff   : > { %v1128_v55 = vadd.f32 %v1096_v60, %v1022_v59  ;;  %v1202_v48 = vsel %vm1166_vm7, %v3859_v25, 0.0  ;;  %v1233_v56 = vadd.f32 %v1201_v22, %v1127_v61  ;;  %v472_v24 = vsel %vm436_vm8, %v3898_v0, 0.0 }
 0x100   : > { %v473_v47 = vsel %vm437_vm9, %v3898_v0, 0.0  ;;  %vm513_vm10 = vcmp.eq.s32.totalorder %v3923_v40, %v4593_v63  ;;  %vm514_vm11 = vcmp.eq.s32.totalorder %v3923_v40, %v4598_v57  ;;  %vm619_vm12 = vcmp.eq.s32.totalorder %v3926_v41, %v4593_v63 }
 0x101   : > { %v1234_v38 = vadd.f32 %v1202_v48, %v1128_v55  ;;  %v549_v39 = vsel %vm513_vm10, %v3901_v9, 0.0  ;;  %v550_v50 = vsel %vm514_vm11, %v3901_v9, 0.0  ;;  %vm620_vm13 = vcmp.eq.s32.totalorder %v3926_v41, %v4598_v57 }
 0x102   : > { %v581_v51 = vadd.f32 %v549_v39, %v472_v24  ;;  %v582_v52 = vadd.f32 %v550_v50, %v473_v47  ;;  %v655_v53 = vsel %vm619_vm12, %v3910_v46, 0.0  ;;  %v656_v58 = vsel %vm620_vm13, %v3910_v46, 0.0 }
 0x103   : > { %v1259_v59 = vpack.c.bf16 %v1234_v38, %v1233_v56  ;;  %vm725_vm14 = vcmp.eq.s32.totalorder %v3933_v43, %v4593_v63  ;;  %vm726_vm15 = vcmp.eq.s32.totalorder %v3933_v43, %v4598_v57  ;;  %v4647_v60 = vadd.s32 112, %v3765_v1 }
 0x104   : > { %v687_v61 = vadd.f32 %v655_v53, %v581_v51  ;;  %v688_v22 = vadd.f32 %v656_v58, %v582_v52  ;;  %v761_v55 = vsel %vm725_vm14, %v3914_v2, 0.0  ;;  %v762_v48 = vsel %vm726_vm15, %v3914_v2, 0.0 }
 0x105   : > { %5760 = vst [vmem:[#allocation12_spill] sm:$0xff] %v4647_v60  ;;  %3189 = vmatprep.subr.bf16.mxu0 %v1259_v59  ;;  %v4652_v24 = vadd.s32 120, %v3765_v1  ;;  %vm860_vm0 = vcmp.eq.s32.totalorder %v3850_v15, %v4647_v60  ;;  %vm937_vm1 = vcmp.eq.s32.totalorder %v3872_v31, %v4647_v60  ;;  %vm1043_vm2 = vcmp.eq.s32.totalorder %v3856_v23, %v4647_v60 }
 0x106   : > { %v793_v56 = vadd.f32 %v761_v55, %v687_v61  ;;  %v794_v47 = vadd.f32 %v762_v48, %v688_v22  ;;  %v896_v38 = vsel %vm860_vm0, %v3866_v29, 0.0  ;;  %v973_v39 = vsel %vm937_vm1, %v3853_v16, 0.0 }
 0x107   : > { %5761 = vst [vmem:[#allocation13_spill] sm:$0xff] %v4652_v24  ;;  %vm861_vm3 = vcmp.eq.s32.totalorder %v3850_v15, %v4652_v24  ;;  %vm938_vm4 = vcmp.eq.s32.totalorder %v3872_v31, %v4652_v24  ;;  %v1005_v50 = vadd.f32 %v973_v39, %v896_v38  ;;  %vm1044_vm5 = vcmp.eq.s32.totalorder %v3856_v23, %v4652_v24 }
 0x108   : > { %v818_v51 = vpack.c.bf16 %v794_v47, %v793_v56  ;;  %v897_v52 = vsel %vm861_vm3, %v3866_v29, 0.0  ;;  %v974_v53 = vsel %vm938_vm4, %v3853_v16, 0.0  ;;  %v1079_v58 = vsel %vm1043_vm2, %v3869_v30, 0.0 }
 0x109   : > { %v1006_v59 = vadd.f32 %v974_v53, %v897_v52  ;;  %v1080_v61 = vsel %vm1044_vm5, %v3869_v30, 0.0  ;;  %v1111_v22 = vadd.f32 %v1079_v58, %v1005_v50  ;;  %vm1149_vm6 = vcmp.eq.s32.totalorder %v3879_v36, %v4647_v60  ;;  %v3465_v50 = vld [vmem:[#allocation2 + $0x40] ss:$8 sps:$4 sm:$0xff]   ;;  %v3471_v52 = vld [vmem:[#allocation2 + $0x54] ss:$8 sps:$4 sm:$0xff]  }
 0x10a   : > { %3229 = vmatprep.subr.bf16.mxu1 %v818_v51  ;;  %vm1150_vm7 = vcmp.eq.s32.totalorder %v3879_v36, %v4652_v24  ;;  %v1185_v15 = vsel %vm1149_vm6, %v3859_v25, 0.0  ;;  %vm420_vm8 = vcmp.eq.s32.totalorder %v3904_v10, %v4647_v60  ;;  %vm421_vm9 = vcmp.eq.s32.totalorder %v3904_v10, %v4652_v24 }
 0x10b   : > { %v1112_v16 = vadd.f32 %v1080_v61, %v1006_v59  ;;  %v1186_v23 = vsel %vm1150_vm7, %v3859_v25, 0.0  ;;  %v1217_v29 = vadd.f32 %v1185_v15, %v1111_v22  ;;  %v456_v30 = vsel %vm420_vm8, %v3898_v0, 0.0  ;;  %v3468_v15 = vld [vmem:[#allocation2] ss:$8 sps:$4 sm:$0xff]  }
 0x10c   : > { %v457_v31 = vsel %vm421_vm9, %v3898_v0, 0.0  ;;  %vm497_vm10 = vcmp.eq.s32.totalorder %v3923_v40, %v4647_v60  ;;  %vm498_vm11 = vcmp.eq.s32.totalorder %v3923_v40, %v4652_v24  ;;  %vm603_vm12 = vcmp.eq.s32.totalorder %v3926_v41, %v4647_v60 }
 0x10d   : > { %v1218_v36 = vadd.f32 %v1186_v23, %v1112_v16  ;;  %v533_v10 = vsel %vm497_vm10, %v3901_v9, 0.0  ;;  %v534_v55 = vsel %vm498_vm11, %v3901_v9, 0.0  ;;  %vm604_vm13 = vcmp.eq.s32.totalorder %v3926_v41, %v4652_v24 }
 0x10e   : > { %v565_v25 = vadd.f32 %v533_v10, %v456_v30  ;;  %v566_v48 = vadd.f32 %v534_v55, %v457_v31  ;;  %v639_v0 = vsel %vm603_vm12, %v3910_v46, 0.0  ;;  %v640_v56 = vsel %vm604_vm13, %v3910_v46, 0.0  ;;  %v3521_v31 = vld [vmem:[%s3763_s16] sm:$0x3]  ;;  %s338_s16 = scalar_lea.vmem [#allocation5], %s3119_s24 }
 0x10f   : > { %v1251_v47 = vpack.c.bf16 %v1218_v36, %v1217_v29  ;;  %vm709_vm14 = vcmp.eq.s32.totalorder %v3933_v43, %v4647_v60  ;;  %vm710_vm15 = vcmp.eq.s32.totalorder %v3933_v43, %v4652_v24  ;;  %v1471_v40 = vmul.f32 8.0, %v3774_v5  ;;  %s3042_s21 = sshll.u32 %s338_s16, 4  ;;  %s5684_s21 = int_to_ptr.vmem [resolvable:$true] %s3042_s21 }
 0x110   : > { %v671_v38 = vadd.f32 %v639_v0, %v565_v25  ;;  %v672_v9 = vadd.f32 %v640_v56, %v566_v48  ;;  %v745_v39 = vsel %vm709_vm14, %v3914_v2, 0.0  ;;  %v746_v41 = vsel %vm710_vm15, %v3914_v2, 0.0  ;;  %v3473_v2 = vld [vmem:[#allocation2 + $0x14] ss:$8 sps:$4 sm:$0xff]   ;;  %v3475_v48 = vld [vmem:[#allocation2 + $0x50] ss:$8 sps:$4 sm:$0xff]   ;;  %p3557_p2 = scmp.lt.s32.totalorder %s5684_s21, %s3555_s28 }
 0x111   : > { %3190 = vmatpush3.bf16.msra.mxu0 %v1251_v47  ;;  %v1472_v51 = vfloor.f32 %v1471_v40  ;;  %v2025_v46 = vmul.f32 16.0, %v3774_v5  ;;  %s3550_s25 = scalar_lea.vmem %s5684_s21, 128 }
 0x112   : > { %v777_v53 = vadd.f32 %v745_v39, %v671_v38  ;;  %v778_v58 = vadd.f32 %v746_v41, %v672_v9  ;;  %v3477_v38 = vld [vmem:[#allocation2 + $0x64] ss:$8 sps:$4 sm:$0xff]   ;;  %p3551_p6 = scmp.ne.s32.totalorder %s5684_s21, %s3550_s25  ;;  %p3558_p3 = scmp.lt.s32.totalorder %s3556_s27, %s3550_s25 }
 0x113   : > { %v1473_v59 = vmul.f32 0.125, %v1472_v51  ;;  %v3404_v61 = vtrunc.f32 %v1472_v51  ;;  %v2026_v43 = vfloor.f32 %v2025_v46 }
 0x114   : > { %v810_v22 = vpack.c.bf16 %v778_v58, %v777_v53  ;;  %1333 = vmatmul.mubr.bf16.vlgmr.msra.gmra.mrb[0].mxu0 %v3465_v50  ;;  %p3552_p10 = pnand %p3551_p6, %p5768_p9  ;;  %p3559_p4 = por %p3558_p3, %p3557_p2 }
 0x115   : > { %v1474_v16 = vadd.f32 -1.0, %v1473_v59  ;;  %v3405_v23 = vcvt.f32.s32 %v3404_v61  ;;  %v2027_v29 = vmul.f32 0.0625, %v2026_v43  ;;  %v3406_v30 = vtrunc.f32 %v2026_v43  ;;  %1340 = vmatprep.mubr.bf16.mxu0 %v3471_v52 }
 0x116   : > { %3230 = vmatpush3.bf16.msra.mxu1 %v810_v22  ;;  %p3553_p12 = pneg %p3552_p10 }
 0x117   : > { %v1475_v36 = vsub.f32 %v3521_v31, %v1474_v16  ;;  %v1489_v5 = vmul.u32 2654435761, %v3405_v23  ;;  %v1565_v10 = vadd.s32 1, %v3405_v23  ;;  %v2028_v55 = vadd.f32 -1.0, %v2027_v29  ;;  %v3476_v16 = vld [vmem:[#allocation2 + $0x10] ss:$8 sps:$4 sm:$0xff]  }
 0x118   : > { %v4705_v25 = vcvt.f32.s32 %v3406_v30  ;;  %p3560_p7 = pnand %p3559_p4, %p3553_p12 }
 0x119   : > { %1438 = vmatmul.mubr.bf16.vlgmr.msra.gmra.mrb[0].mxu1 %v3468_v15  ;;  %v1476_v0 = vmul.f32 8.0, %v1475_v36  ;;  %v1490_v56 = vrot.slane %v1489_v5, 1  ;;  %v1566_v47 = vmul.u32 2654435761, %v1565_v10  ;;  %v2029_v40 = vsub.f32 %v3521_v31, %v2028_v55  ;;  %v3479_v36 = vld [vmem:[#allocation2 + $0x24] ss:$8 sps:$4 sm:$0xff]  }
 0x11a   : > { %v2043_v9 = vmul.u32 2654435761, %v4705_v25  ;;  %v4709_v39 = vadd.s32 1, %v4705_v25  ;;  %1445 = vmatprep.mubr.bf16.mxu1 %v3473_v2 }
 0x11b   : > { %v1478_v41 = vsub.f32 1.0, %v1476_v0  ;;  %v1484_v50 = vrot.slane %v1476_v0, 1  ;;  %v1491_v51 = vxor.u32 %v3405_v23, %v1490_v56  ;;  %v1567_v46 = vrot.slane %v1566_v47, 1 }
 0x11c   : > { %v1674_v52 = vxor.u32 %v1565_v10, %v1490_v56  ;;  %v2030_v53 = vmul.f32 16.0, %v2029_v40  ;;  %v4711_v58 = vrot.slane %v2043_v9, 1  ;;  %v2120_v59 = vmul.u32 2654435761, %v4709_v39  ;;  %1341 = vmatmul.mubr.bf16.gmra.mrb[4].mxu0 %v3475_v48 }
 0x11d   : > { %v1480_v61 = vrot.slane %v1478_v41, 1  ;;  %v1486_v43 = vmul.f32 %v1484_v50, %v1478_v41  ;;  %v1488_v22 = vmul.f32 %v1484_v50, %v1476_v0  ;;  %v1492_v15 = vand.u32 255, %v1491_v51  ;;  %1348 = vmatprep.mubr.bf16.mxu0 %v3477_v38 }
 0x11e   : > { %v1568_v29 = vxor.u32 %v3405_v23, %v1567_v46  ;;  %v1675_v30 = vand.u32 255, %v1674_v52  ;;  %v1780_v2 = vxor.u32 %v1567_v46, %v1565_v10  ;;  %v2032_v31 = vsub.f32 1.0, %v2030_v53  ;;  %v3481_v23 = vld [vmem:[#allocation2 + $0x60] ss:$8 sps:$4 sm:$0xff]  }
 0x11f   : > { %v1482_v5 = vmul.f32 %v1480_v61, %v1478_v41  ;;  %v1487_v55 = vmul.f32 %v1480_v61, %v1476_v0  ;;  %v4715_v56 = vrot.slane %v1492_v15, %v3777_v6  ;;  %v4718_v47 = vrot.slane %v1486_v43, %v3777_v6 }
 0x120   : > { %v1569_v48 = vand.u32 255, %v1568_v29  ;;  %v4721_v40 = vrot.slane %v1675_v30, %v3777_v6  ;;  %v1781_v9 = vand.u32 255, %v1780_v2  ;;  %v4724_v38 = vrot.slane %v1488_v22, %v3777_v6  ;;  %v3482_v29 = vld [vmem:[#allocation2 + $0x20] ss:$8 sps:$4 sm:$0xff]  }
 0x121   : > { %vm1513_vm0 = vcmp.eq.s32.totalorder %v4715_v56, %v3769_v3  ;;  %vm1514_vm1 = vcmp.eq.s32.totalorder %v4715_v56, %v3772_v4  ;;  %v4731_v10 = vrot.slane %v1482_v5, %v3777_v6  ;;  %v4734_v0 = vrot.slane %v1487_v55, %v3777_v6  ;;  %1446 = vmatmul.mubr.bf16.gmra.mrb[4].mxu1 %v3476_v16 }
 0x122   : > { %v4737_v41 = vrot.slane %v1569_v48, %v3777_v6  ;;  %vm1696_vm2 = vcmp.eq.s32.totalorder %v4721_v40, %v3769_v3  ;;  %vm1697_vm3 = vcmp.eq.s32.totalorder %v4721_v40, %v3772_v4  ;;  %v4744_v50 = vrot.slane %v1781_v9, %v3777_v6  ;;  %1453 = vmatprep.mubr.bf16.mxu1 %v3479_v36 }
 0x123   : > { %v1549_v51 = vsel %vm1513_vm0, %v4731_v10, 0.0  ;;  %v1550_v46 = vsel %vm1514_vm1, %v4731_v10, 0.0  ;;  %v1732_v52 = vsel %vm1696_vm2, %v4734_v0, 0.0  ;;  %v1733_v61 = vsel %vm1697_vm3, %v4734_v0, 0.0 }
 0x124   : > { %vm1590_vm4 = vcmp.eq.s32.totalorder %v4737_v41, %v3769_v3  ;;  %vm1591_vm5 = vcmp.eq.s32.totalorder %v4737_v41, %v3772_v4  ;;  %vm1802_vm6 = vcmp.eq.s32.totalorder %v4744_v50, %v3769_v3  ;;  %vm1803_vm7 = vcmp.eq.s32.totalorder %v4744_v50, %v3772_v4  ;;  %1349 = vmatmul.mubr.bf16.gmra.mrb[8].mxu0 %v3481_v23 }
 0x125   : > { %v1626_v43 = vsel %vm1590_vm4, %v4718_v47, 0.0  ;;  %v1627_v22 = vsel %vm1591_vm5, %v4718_v47, 0.0  ;;  %v1838_v15 = vsel %vm1802_vm6, %v4724_v38, 0.0  ;;  %v1839_v16 = vsel %vm1803_vm7, %v4724_v38, 0.0 }
 0x126   : > { %v1658_v30 = vadd.f32 %v1626_v43, %v1549_v51  ;;  %v1659_v2 = vadd.f32 %v1627_v22, %v1550_v46  ;;  %v2034_v36 = vrot.slane %v2032_v31, 1  ;;  %v2038_v5 = vrot.slane %v2030_v53, 1 }
 0x127   : > { %v2045_v55 = vxor.u32 %v4705_v25, %v4711_v58  ;;  %v2121_v48 = vrot.slane %v2120_v59, 1  ;;  %v2228_v9 = vxor.u32 %v4709_v39, %v4711_v58  ;;  %vm1497_vm8 = vcmp.eq.s32.totalorder %v4715_v56, %v3765_v1 }
 0x128   : > { %v1764_v23 = vadd.f32 %v1732_v52, %v1658_v30  ;;  %v1765_v24 = vadd.f32 %v1733_v61, %v1659_v2  ;;  %v2036_v60 = vmul.f32 %v2034_v36, %v2032_v31  ;;  %v2040_v57 = vmul.f32 %v2038_v5, %v2032_v31 }
 0x129   : > { %v2041_v63 = vmul.f32 %v2034_v36, %v2030_v53  ;;  %v2042_v44 = vmul.f32 %v2038_v5, %v2030_v53  ;;  %v2046_v51 = vand.u32 255, %v2045_v55  ;;  %v2122_v46 = vxor.u32 %v4705_v25, %v2121_v48  ;;  %1454 = vmatmul.mubr.bf16.gmra.mrb[8].mxu1 %v3482_v29 }
 0x12a   : > { %v1870_v43 = vadd.f32 %v1838_v15, %v1764_v23  ;;  %v1871_v22 = vadd.f32 %v1839_v16, %v1765_v24  ;;  %v4770_v59 = vrot.slane %v2036_v60, %v3777_v6  ;;  %v4773_v58 = vrot.slane %v2040_v57, %v3777_v6 }
 0x12b   : > { %v4776_v32 = vrot.slane %v2046_v51, %v3777_v6  ;;  %v2123_v52 = vand.u32 255, %v2122_v46  ;;  %v2229_v61 = vand.u32 255, %v2228_v9  ;;  %v4779_v31 = vrot.slane %v2041_v63, %v3777_v6 }
 0x12c   : > { %v1903_v53 = vpack.c.bf16 %v1871_v22, %v1870_v43  ;;  %v2334_v25 = vxor.u32 %v2121_v48, %v4709_v39  ;;  %v4783_v15 = vrot.slane %v2042_v44, %v3777_v6  ;;  %vm1498_vm9 = vcmp.eq.s32.totalorder %v4715_v56, %v3780_v7 }
 0x12d   : > { %vm2067_vm10 = vcmp.eq.s32.totalorder %v4776_v32, %v3769_v3  ;;  %vm2068_vm11 = vcmp.eq.s32.totalorder %v4776_v32, %v3772_v4  ;;  %v4792_v57 = vrot.slane %v2123_v52, %v3777_v6  ;;  %v4795_v63 = vrot.slane %v2229_v61, %v3777_v6 }
 0x12e   : > { %3255 = vmatprep.subr.bf16.mxu0 %v1903_v53  ;;  %v2103_v60 = vsel %vm2067_vm10, %v4770_v59, 0.0  ;;  %v2104_v44 = vsel %vm2068_vm11, %v4770_v59, 0.0  ;;  %v2335_v24 = vand.u32 255, %v2334_v25  ;;  %v1533_v39 = vsel %vm1497_vm8, %v4731_v10, 0.0 }
 0x12f   : > { %vm2144_vm12 = vcmp.eq.s32.totalorder %v4792_v57, %v3769_v3  ;;  %vm2145_vm13 = vcmp.eq.s32.totalorder %v4792_v57, %v3772_v4  ;;  %vm2250_vm14 = vcmp.eq.s32.totalorder %v4795_v63, %v3769_v3  ;;  %vm2251_vm15 = vcmp.eq.s32.totalorder %v4795_v63, %v3772_v4 }
 0x130   : > { %v2180_v16 = vsel %vm2144_vm12, %v4773_v58, 0.0  ;;  %v2181_v29 = vsel %vm2145_vm13, %v4773_v58, 0.0  ;;  %v2286_v30 = vsel %vm2250_vm14, %v4779_v31, 0.0  ;;  %v2287_v2 = vsel %vm2251_vm15, %v4779_v31, 0.0 }
 0x131   : > { %v2212_v36 = vadd.f32 %v2180_v16, %v2103_v60  ;;  %v2213_v5 = vadd.f32 %v2181_v29, %v2104_v44  ;;  %v4816_v55 = vrot.slane %v2335_v24, %v3777_v6  ;;  %v1534_v48 = vsel %vm1498_vm9, %v4731_v10, 0.0 }
 0x132   : > { %vm1574_vm0 = vcmp.eq.s32.totalorder %v4737_v41, %v3765_v1  ;;  %vm1575_vm1 = vcmp.eq.s32.totalorder %v4737_v41, %v3780_v7  ;;  %vm1680_vm2 = vcmp.eq.s32.totalorder %v4721_v40, %v3765_v1  ;;  %vm1681_vm3 = vcmp.eq.s32.totalorder %v4721_v40, %v3780_v7 }
 0x133   : > { %v2318_v9 = vadd.f32 %v2286_v30, %v2212_v36  ;;  %v2319_v6 = vadd.f32 %v2287_v2, %v2213_v5  ;;  %vm2356_vm4 = vcmp.eq.s32.totalorder %v4816_v55, %v3769_v3  ;;  %vm2357_vm5 = vcmp.eq.s32.totalorder %v4816_v55, %v3772_v4  ;;  %v3483_v3 = vld [vmem:[#allocation2 + $0x74] ss:$8 sps:$4 sm:$0xff]   ;;  %v3487_v30 = vld [vmem:[#allocation2 + $0x70] ss:$8 sps:$4 sm:$0xff]  }
 0x134   : > { %v2392_v23 = vsel %vm2356_vm4, %v4783_v15, 0.0  ;;  %v2393_v51 = vsel %vm2357_vm5, %v4783_v15, 0.0  ;;  %v1610_v46 = vsel %vm1574_vm0, %v4718_v47, 0.0  ;;  %v1611_v43 = vsel %vm1575_vm1, %v4718_v47, 0.0  ;;  %v3485_v4 = vld [vmem:[#allocation2 + $0x34] ss:$8 sps:$4 sm:$0xff]   ;;  %1356 = vmatprep.mubr.bf16.mxu0 %v3483_v3 }
 0x135   : > { %v2424_v22 = vadd.f32 %v2392_v23, %v2318_v9  ;;  %v2425_v52 = vadd.f32 %v2393_v51, %v2319_v6  ;;  %v1642_v61 = vadd.f32 %v1610_v46, %v1533_v39  ;;  %v1643_v53 = vadd.f32 %v1611_v43, %v1534_v48  ;;  %v3488_v39 = vld [vmem:[#allocation2 + $0x30] ss:$8 sps:$4 sm:$0xff]   ;;  %1461 = vmatprep.mubr.bf16.mxu1 %v3485_v4 }
 0x136   : > { %v1716_v25 = vsel %vm1680_vm2, %v4734_v0, 0.0  ;;  %v1717_v60 = vsel %vm1681_vm3, %v4734_v0, 0.0  ;;  %vm1786_vm6 = vcmp.eq.s32.totalorder %v4744_v50, %v3765_v1  ;;  %vm1787_vm7 = vcmp.eq.s32.totalorder %v4744_v50, %v3780_v7  ;;  %1357 = vmatmul.mubr.bf16.gmra.mrb[12].mxu0 %v3487_v30  ;;  %1462 = vmatmul.mubr.bf16.gmra.mrb[12].mxu1 %v3488_v39 }
 0x137   : > { %v2457_v44 = vpack.c.bf16 %v2425_v52, %v2424_v22  ;;  %v1748_v24 = vadd.f32 %v1716_v25, %v1642_v61  ;;  %v1749_v16 = vadd.f32 %v1717_v60, %v1643_v53  ;;  %v1822_v29 = vsel %vm1786_vm6, %v4724_v38, 0.0 }
 0x138   : > { %v1823_v2 = vsel %vm1787_vm7, %v4724_v38, 0.0  ;;  %vm2051_vm8 = vcmp.eq.s32.totalorder %v4776_v32, %v3765_v1  ;;  %vm2052_vm9 = vcmp.eq.s32.totalorder %v4776_v32, %v3780_v7  ;;  %vm2128_vm10 = vcmp.eq.s32.totalorder %v4792_v57, %v3765_v1 }
 0x139   : > { %3295 = vmatprep.subr.bf16.mxu1 %v2457_v44  ;;  %v1854_v36 = vadd.f32 %v1822_v29, %v1748_v24  ;;  %v1855_v5 = vadd.f32 %v1823_v2, %v1749_v16  ;;  %v2087_v48 = vsel %vm2051_vm8, %v4770_v59, 0.0  ;;  %v2088_v9 = vsel %vm2052_vm9, %v4770_v59, 0.0 }
 0x13a   : > { %vm2129_vm11 = vcmp.eq.s32.totalorder %v4792_v57, %v3780_v7  ;;  %v2164_v6 = vsel %vm2128_vm10, %v4773_v58, 0.0  ;;  %vm2234_vm12 = vcmp.eq.s32.totalorder %v4795_v63, %v3765_v1  ;;  %vm2235_vm13 = vcmp.eq.s32.totalorder %v4795_v63, %v3780_v7 }
 0x13b   : > { %v1895_v23 = vpack.c.bf16 %v1855_v5, %v1854_v36  ;;  %v2165_v51 = vsel %vm2129_vm11, %v4773_v58, 0.0  ;;  %v2196_v46 = vadd.f32 %v2164_v6, %v2087_v48  ;;  %v2270_v43 = vsel %vm2234_vm12, %v4779_v31, 0.0 }
 0x13c   : > { %v2197_v22 = vadd.f32 %v2165_v51, %v2088_v9  ;;  %v2271_v52 = vsel %vm2235_vm13, %v4779_v31, 0.0  ;;  %vm2340_vm14 = vcmp.eq.s32.totalorder %v4816_v55, %v3765_v1  ;;  %vm2341_vm15 = vcmp.eq.s32.totalorder %v4816_v55, %v3780_v7 }
 0x13d   : > { %3256 = vmatpush3.bf16.msra.mxu0 %v1895_v23  ;;  %v2302_v61 = vadd.f32 %v2270_v43, %v2196_v46  ;;  %v2376_v53 = vsel %vm2340_vm14, %v4783_v15, 0.0  ;;  %v2377_v25 = vsel %vm2341_vm15, %v4783_v15, 0.0  ;;  %vm1515_vm0 = vcmp.eq.s32.totalorder %v4715_v56, %v3783_v8 }
 0x13e   : > { %v2303_v60 = vadd.f32 %v2271_v52, %v2197_v22  ;;  %vm1516_vm1 = vcmp.eq.s32.totalorder %v4715_v56, %v3788_v11  ;;  %v1551_v3 = vsel %vm1515_vm0, %v4731_v10, 0.0  ;;  %vm1592_vm2 = vcmp.eq.s32.totalorder %v4737_v41, %v3783_v8 }
 0x13f   : > { %v2408_v1 = vadd.f32 %v2376_v53, %v2302_v61  ;;  %v1552_v7 = vsel %vm1516_vm1, %v4731_v10, 0.0  ;;  %vm1593_vm3 = vcmp.eq.s32.totalorder %v4737_v41, %v3788_v11  ;;  %v1628_v4 = vsel %vm1592_vm2, %v4718_v47, 0.0 }
 0x140   : > { %v2409_v44 = vadd.f32 %v2377_v25, %v2303_v60  ;;  %v1629_v24 = vsel %vm1593_vm3, %v4718_v47, 0.0  ;;  %v1660_v16 = vadd.f32 %v1628_v4, %v1551_v3  ;;  %vm1698_vm4 = vcmp.eq.s32.totalorder %v4721_v40, %v3783_v8 }
 0x141   : > { %v1661_v29 = vadd.f32 %v1629_v24, %v1552_v7  ;;  %vm1699_vm5 = vcmp.eq.s32.totalorder %v4721_v40, %v3788_v11  ;;  %v1734_v30 = vsel %vm1698_vm4, %v4734_v0, 0.0  ;;  %vm1804_vm6 = vcmp.eq.s32.totalorder %v4744_v50, %v3783_v8 }
 0x142   : > { %v2449_v39 = vpack.c.bf16 %v2409_v44, %v2408_v1  ;;  %v1735_v2 = vsel %vm1699_vm5, %v4734_v0, 0.0  ;;  %v1766_v36 = vadd.f32 %v1734_v30, %v1660_v16  ;;  %vm1805_vm7 = vcmp.eq.s32.totalorder %v4744_v50, %v3788_v11 }
 0x143   : > { %v1767_v5 = vadd.f32 %v1735_v2, %v1661_v29  ;;  %v1840_v48 = vsel %vm1804_vm6, %v4724_v38, 0.0  ;;  %v1841_v9 = vsel %vm1805_vm7, %v4724_v38, 0.0  ;;  %vm2069_vm8 = vcmp.eq.s32.totalorder %v4776_v32, %v3783_v8 }
 0x144   : > { %3296 = vmatpush3.bf16.msra.mxu1 %v2449_v39  ;;  %v1872_v6 = vadd.f32 %v1840_v48, %v1766_v36  ;;  %vm2070_vm9 = vcmp.eq.s32.totalorder %v4776_v32, %v3788_v11  ;;  %v2105_v23 = vsel %vm2069_vm8, %v4770_v59, 0.0  ;;  %vm2146_vm10 = vcmp.eq.s32.totalorder %v4792_v57, %v3783_v8 }
 0x145   : > { %v1873_v51 = vadd.f32 %v1841_v9, %v1767_v5  ;;  %v2106_v46 = vsel %vm2070_vm9, %v4770_v59, 0.0  ;;  %vm2147_vm11 = vcmp.eq.s32.totalorder %v4792_v57, %v3788_v11  ;;  %v2182_v43 = vsel %vm2146_vm10, %v4773_v58, 0.0 }
 0x146   : > { %v2183_v22 = vsel %vm2147_vm11, %v4773_v58, 0.0  ;;  %v2214_v52 = vadd.f32 %v2182_v43, %v2105_v23  ;;  %vm2252_vm12 = vcmp.eq.s32.totalorder %v4795_v63, %v3783_v8  ;;  %vm2253_vm13 = vcmp.eq.s32.totalorder %v4795_v63, %v3788_v11 }
 0x147   : > { %v1904_v61 = vpack.c.bf16 %v1873_v51, %v1872_v6  ;;  %v2215_v53 = vadd.f32 %v2183_v22, %v2106_v46  ;;  %v2288_v25 = vsel %vm2252_vm12, %v4779_v31, 0.0  ;;  %v2289_v60 = vsel %vm2253_vm13, %v4779_v31, 0.0 }
 0x148   : > { %v2320_v3 = vadd.f32 %v2288_v25, %v2214_v52  ;;  %vm2358_vm14 = vcmp.eq.s32.totalorder %v4816_v55, %v3783_v8  ;;  %vm2359_vm15 = vcmp.eq.s32.totalorder %v4816_v55, %v3788_v11  ;;  %vm1499_vm0 = vcmp.eq.s32.totalorder %v4715_v56, %v3791_v12 }
 0x149   : > { %3257 = vmatprep.subr.bf16.mxu0 %v1904_v61  ;;  %v2321_v1 = vadd.f32 %v2289_v60, %v2215_v53  ;;  %v2394_v7 = vsel %vm2358_vm14, %v4783_v15, 0.0  ;;  %v2395_v4 = vsel %vm2359_vm15, %v4783_v15, 0.0  ;;  %vm1500_vm1 = vcmp.eq.s32.totalorder %v4715_v56, %v3794_v13 }
 0x14a   : > { %v2426_v44 = vadd.f32 %v2394_v7, %v2320_v3  ;;  %v1535_v24 = vsel %vm1499_vm0, %v4731_v10, 0.0  ;;  %v1536_v8 = vsel %vm1500_vm1, %v4731_v10, 0.0  ;;  %vm1576_vm2 = vcmp.eq.s32.totalorder %v4737_v41, %v3791_v12 }
 0x14b   : > { %v2427_v11 = vadd.f32 %v2395_v4, %v2321_v1  ;;  %vm1577_vm3 = vcmp.eq.s32.totalorder %v4737_v41, %v3794_v13  ;;  %v1612_v16 = vsel %vm1576_vm2, %v4718_v47, 0.0  ;;  %vm1682_vm4 = vcmp.eq.s32.totalorder %v4721_v40, %v3791_v12 }
 0x14c   : > { %v1613_v29 = vsel %vm1577_vm3, %v4718_v47, 0.0  ;;  %v1644_v30 = vadd.f32 %v1612_v16, %v1535_v24  ;;  %vm1683_vm5 = vcmp.eq.s32.totalorder %v4721_v40, %v3794_v13  ;;  %v1718_v39 = vsel %vm1682_vm4, %v4734_v0, 0.0 }
 0x14d   : > { %v2458_v2 = vpack.c.bf16 %v2427_v11, %v2426_v44  ;;  %v1645_v36 = vadd.f32 %v1613_v29, %v1536_v8  ;;  %v1719_v5 = vsel %vm1683_vm5, %v4734_v0, 0.0  ;;  %vm1788_vm6 = vcmp.eq.s32.totalorder %v4744_v50, %v3791_v12 }
 0x14e   : > { %v1750_v48 = vadd.f32 %v1718_v39, %v1644_v30  ;;  %vm1789_vm7 = vcmp.eq.s32.totalorder %v4744_v50, %v3794_v13  ;;  %v1824_v9 = vsel %vm1788_vm6, %v4724_v38, 0.0  ;;  %vm2053_vm8 = vcmp.eq.s32.totalorder %v4776_v32, %v3791_v12 }
 0x14f   : > { %3297 = vmatprep.subr.bf16.mxu1 %v2458_v2  ;;  %v1751_v6 = vadd.f32 %v1719_v5, %v1645_v36  ;;  %v1825_v23 = vsel %vm1789_vm7, %v4724_v38, 0.0  ;;  %vm2054_vm9 = vcmp.eq.s32.totalorder %v4776_v32, %v3794_v13  ;;  %v2089_v51 = vsel %vm2053_vm8, %v4770_v59, 0.0 }
 0x150   : > { %v1856_v46 = vadd.f32 %v1824_v9, %v1750_v48  ;;  %v2090_v43 = vsel %vm2054_vm9, %v4770_v59, 0.0  ;;  %vm2130_vm10 = vcmp.eq.s32.totalorder %v4792_v57, %v3791_v12  ;;  %vm2131_vm11 = vcmp.eq.s32.totalorder %v4792_v57, %v3794_v13 }
 0x151   : > { %v1857_v22 = vadd.f32 %v1825_v23, %v1751_v6  ;;  %v2166_v52 = vsel %vm2130_vm10, %v4773_v58, 0.0  ;;  %v2167_v61 = vsel %vm2131_vm11, %v4773_v58, 0.0  ;;  %vm2236_vm12 = vcmp.eq.s32.totalorder %v4795_v63, %v3791_v12 }
 0x152   : > { %v2198_v53 = vadd.f32 %v2166_v52, %v2089_v51  ;;  %v2199_v25 = vadd.f32 %v2167_v61, %v2090_v43  ;;  %vm2237_vm13 = vcmp.eq.s32.totalorder %v4795_v63, %v3794_v13  ;;  %v2272_v60 = vsel %vm2236_vm12, %v4779_v31, 0.0 }
 0x153   : > { %v1896_v3 = vpack.c.bf16 %v1857_v22, %v1856_v46  ;;  %v2273_v1 = vsel %vm2237_vm13, %v4779_v31, 0.0  ;;  %vm2342_vm14 = vcmp.eq.s32.totalorder %v4816_v55, %v3791_v12  ;;  %vm2343_vm15 = vcmp.eq.s32.totalorder %v4816_v55, %v3794_v13 }
 0x154   : > { %v2304_v7 = vadd.f32 %v2272_v60, %v2198_v53  ;;  %v2305_v4 = vadd.f32 %v2273_v1, %v2199_v25  ;;  %v2378_v44 = vsel %vm2342_vm14, %v4783_v15, 0.0  ;;  %v2379_v24 = vsel %vm2343_vm15, %v4783_v15, 0.0 }
 0x155   : > { %3258 = vmatpush3.bf16.msra.mxu0 %v1896_v3  ;;  %vm1517_vm0 = vcmp.eq.s32.totalorder %v4715_v56, %v3797_v14  ;;  %vm1518_vm1 = vcmp.eq.s32.totalorder %v4715_v56, %v3800_v17  ;;  %vm1594_vm2 = vcmp.eq.s32.totalorder %v4737_v41, %v3797_v14  ;;  %vm1595_vm3 = vcmp.eq.s32.totalorder %v4737_v41, %v3800_v17 }
 0x156   : > { %v2410_v12 = vadd.f32 %v2378_v44, %v2304_v7  ;;  %v2411_v13 = vadd.f32 %v2379_v24, %v2305_v4  ;;  %v1553_v8 = vsel %vm1517_vm0, %v4731_v10, 0.0  ;;  %v1554_v11 = vsel %vm1518_vm1, %v4731_v10, 0.0 }
 0x157   : > { %v1630_v16 = vsel %vm1594_vm2, %v4718_v47, 0.0  ;;  %v1631_v29 = vsel %vm1595_vm3, %v4718_v47, 0.0  ;;  %vm1700_vm4 = vcmp.eq.s32.totalorder %v4721_v40, %v3797_v14  ;;  %vm1701_vm5 = vcmp.eq.s32.totalorder %v4721_v40, %v3800_v17 }
 0x158   : > { %v2450_v30 = vpack.c.bf16 %v2411_v13, %v2410_v12  ;;  %v1662_v39 = vadd.f32 %v1630_v16, %v1553_v8  ;;  %v1663_v2 = vadd.f32 %v1631_v29, %v1554_v11  ;;  %v1736_v36 = vsel %vm1700_vm4, %v4734_v0, 0.0 }
 0x159   : > { %v1737_v5 = vsel %vm1701_vm5, %v4734_v0, 0.0  ;;  %vm1806_vm6 = vcmp.eq.s32.totalorder %v4744_v50, %v3797_v14  ;;  %vm1807_vm7 = vcmp.eq.s32.totalorder %v4744_v50, %v3800_v17  ;;  %vm2071_vm8 = vcmp.eq.s32.totalorder %v4776_v32, %v3797_v14 }
 0x15a   : > { %3298 = vmatpush3.bf16.msra.mxu1 %v2450_v30  ;;  %v1768_v48 = vadd.f32 %v1736_v36, %v1662_v39  ;;  %v1769_v9 = vadd.f32 %v1737_v5, %v1663_v2  ;;  %v1842_v6 = vsel %vm1806_vm6, %v4724_v38, 0.0  ;;  %v1843_v23 = vsel %vm1807_vm7, %v4724_v38, 0.0  ;;  %v3491_v36 = vld [vmem:[#allocation2 + $0x84] ss:$8 sps:$4 sm:$0xff]  }
 0x15b   : > { %vm2072_vm9 = vcmp.eq.s32.totalorder %v4776_v32, %v3800_v17  ;;  %v2107_v51 = vsel %vm2071_vm8, %v4770_v59, 0.0  ;;  %vm2148_vm10 = vcmp.eq.s32.totalorder %v4792_v57, %v3797_v14  ;;  %vm2149_vm11 = vcmp.eq.s32.totalorder %v4792_v57, %v3800_v17  ;;  %1983 = vmatprep.mubr.bf16.mxu0 %v3491_v36 }
 0x15c   : > { %v1874_v46 = vadd.f32 %v1842_v6, %v1768_v48  ;;  %v1875_v43 = vadd.f32 %v1843_v23, %v1769_v9  ;;  %v2108_v22 = vsel %vm2072_vm9, %v4770_v59, 0.0  ;;  %v2184_v52 = vsel %vm2148_vm10, %v4773_v58, 0.0  ;;  %v3494_v9 = vld [vmem:[#allocation2 + $0xc4] ss:$8 sps:$4 sm:$0xff]  }
 0x15d   : > { %v2185_v61 = vsel %vm2149_vm11, %v4773_v58, 0.0  ;;  %v2216_v53 = vadd.f32 %v2184_v52, %v2107_v51  ;;  %vm2254_vm12 = vcmp.eq.s32.totalorder %v4795_v63, %v3797_v14  ;;  %vm2255_vm13 = vcmp.eq.s32.totalorder %v4795_v63, %v3800_v17  ;;  %2537 = vmatprep.mubr.bf16.mxu1 %v3494_v9 }
 0x15e   : > { %v1905_v25 = vpack.c.bf16 %v1875_v43, %v1874_v46  ;;  %v2217_v60 = vadd.f32 %v2185_v61, %v2108_v22  ;;  %v2290_v3 = vsel %vm2254_vm12, %v4779_v31, 0.0  ;;  %v2291_v1 = vsel %vm2255_vm13, %v4779_v31, 0.0 }
 0x15f   : > { %v2322_v7 = vadd.f32 %v2290_v3, %v2216_v53  ;;  %vm2360_vm14 = vcmp.eq.s32.totalorder %v4816_v55, %v3797_v14  ;;  %vm2361_vm15 = vcmp.eq.s32.totalorder %v4816_v55, %v3800_v17  ;;  %vm1501_vm0 = vcmp.eq.s32.totalorder %v4715_v56, %v3803_v18 }
 0x160   : > { %3259 = vmatprep.subr.bf16.mxu0 %v1905_v25  ;;  %v2323_v4 = vadd.f32 %v2291_v1, %v2217_v60  ;;  %v2396_v44 = vsel %vm2360_vm14, %v4783_v15, 0.0  ;;  %v2397_v24 = vsel %vm2361_vm15, %v4783_v15, 0.0  ;;  %vm1502_vm1 = vcmp.eq.s32.totalorder %v4715_v56, %v3806_v19 }
 0x161   : > { %v2428_v12 = vadd.f32 %v2396_v44, %v2322_v7  ;;  %v1537_v13 = vsel %vm1501_vm0, %v4731_v10, 0.0  ;;  %v1538_v14 = vsel %vm1502_vm1, %v4731_v10, 0.0  ;;  %vm1578_vm2 = vcmp.eq.s32.totalorder %v4737_v41, %v3803_v18 }
 0x162   : > { %v2429_v17 = vadd.f32 %v2397_v24, %v2323_v4  ;;  %vm1579_vm3 = vcmp.eq.s32.totalorder %v4737_v41, %v3806_v19  ;;  %v1614_v8 = vsel %vm1578_vm2, %v4718_v47, 0.0  ;;  %vm1684_vm4 = vcmp.eq.s32.totalorder %v4721_v40, %v3803_v18 }
 0x163   : > { %v1615_v11 = vsel %vm1579_vm3, %v4718_v47, 0.0  ;;  %v1646_v16 = vadd.f32 %v1614_v8, %v1537_v13  ;;  %vm1685_vm5 = vcmp.eq.s32.totalorder %v4721_v40, %v3806_v19  ;;  %v1720_v29 = vsel %vm1684_vm4, %v4734_v0, 0.0 }
 0x164   : > { %v2459_v30 = vpack.c.bf16 %v2429_v17, %v2428_v12  ;;  %v1647_v39 = vadd.f32 %v1615_v11, %v1538_v14  ;;  %v1721_v2 = vsel %vm1685_vm5, %v4734_v0, 0.0  ;;  %vm1790_vm6 = vcmp.eq.s32.totalorder %v4744_v50, %v3803_v18 }
 0x165   : > { %v1752_v5 = vadd.f32 %v1720_v29, %v1646_v16  ;;  %vm1791_vm7 = vcmp.eq.s32.totalorder %v4744_v50, %v3806_v19  ;;  %v1826_v48 = vsel %vm1790_vm6, %v4724_v38, 0.0  ;;  %vm2055_vm8 = vcmp.eq.s32.totalorder %v4776_v32, %v3803_v18 }
 0x166   : > { %3299 = vmatprep.subr.bf16.mxu1 %v2459_v30  ;;  %v1753_v6 = vadd.f32 %v1721_v2, %v1647_v39  ;;  %v1827_v23 = vsel %vm1791_vm7, %v4724_v38, 0.0  ;;  %vm2056_vm9 = vcmp.eq.s32.totalorder %v4776_v32, %v3806_v19  ;;  %v2091_v51 = vsel %vm2055_vm8, %v4770_v59, 0.0 }
 0x167   : > { %v1858_v46 = vadd.f32 %v1826_v48, %v1752_v5  ;;  %v2092_v43 = vsel %vm2056_vm9, %v4770_v59, 0.0  ;;  %vm2132_vm10 = vcmp.eq.s32.totalorder %v4792_v57, %v3803_v18  ;;  %vm2133_vm11 = vcmp.eq.s32.totalorder %v4792_v57, %v3806_v19 }
 0x168   : > { %v1859_v22 = vadd.f32 %v1827_v23, %v1753_v6  ;;  %v2168_v52 = vsel %vm2132_vm10, %v4773_v58, 0.0  ;;  %v2169_v61 = vsel %vm2133_vm11, %v4773_v58, 0.0  ;;  %vm2238_vm12 = vcmp.eq.s32.totalorder %v4795_v63, %v3803_v18 }
 0x169   : > { %v2200_v53 = vadd.f32 %v2168_v52, %v2091_v51  ;;  %v2201_v25 = vadd.f32 %v2169_v61, %v2092_v43  ;;  %vm2239_vm13 = vcmp.eq.s32.totalorder %v4795_v63, %v3806_v19  ;;  %v2274_v60 = vsel %vm2238_vm12, %v4779_v31, 0.0 }
 0x16a   : > { %v1897_v3 = vpack.c.bf16 %v1859_v22, %v1858_v46  ;;  %v2275_v1 = vsel %vm2239_vm13, %v4779_v31, 0.0  ;;  %vm2344_vm14 = vcmp.eq.s32.totalorder %v4816_v55, %v3803_v18  ;;  %vm2345_vm15 = vcmp.eq.s32.totalorder %v4816_v55, %v3806_v19 }
 0x16b   : > { %v2306_v7 = vadd.f32 %v2274_v60, %v2200_v53  ;;  %v2307_v4 = vadd.f32 %v2275_v1, %v2201_v25  ;;  %v2380_v44 = vsel %vm2344_vm14, %v4783_v15, 0.0  ;;  %v2381_v24 = vsel %vm2345_vm15, %v4783_v15, 0.0 }
 0x16c   : > { %3260 = vmatpush3.bf16.msra.mxu0 %v1897_v3  ;;  %vm1519_vm0 = vcmp.eq.s32.totalorder %v4715_v56, %v3809_v20  ;;  %vm1520_vm1 = vcmp.eq.s32.totalorder %v4715_v56, %v3812_v21  ;;  %vm1596_vm2 = vcmp.eq.s32.totalorder %v4737_v41, %v3809_v20  ;;  %vm1597_vm3 = vcmp.eq.s32.totalorder %v4737_v41, %v3812_v21 }
 0x16d   : > { %v2412_v18 = vadd.f32 %v2380_v44, %v2306_v7  ;;  %v2413_v19 = vadd.f32 %v2381_v24, %v2307_v4  ;;  %v1555_v12 = vsel %vm1519_vm0, %v4731_v10, 0.0  ;;  %v1556_v13 = vsel %vm1520_vm1, %v4731_v10, 0.0 }
 0x16e   : > { %v1632_v14 = vsel %vm1596_vm2, %v4718_v47, 0.0  ;;  %v1633_v17 = vsel %vm1597_vm3, %v4718_v47, 0.0  ;;  %vm1702_vm4 = vcmp.eq.s32.totalorder %v4721_v40, %v3809_v20  ;;  %vm1703_vm5 = vcmp.eq.s32.totalorder %v4721_v40, %v3812_v21 }
 0x16f   : > { %v2451_v8 = vpack.c.bf16 %v2413_v19, %v2412_v18  ;;  %v1664_v11 = vadd.f32 %v1632_v14, %v1555_v12  ;;  %v1665_v16 = vadd.f32 %v1633_v17, %v1556_v13  ;;  %v1738_v29 = vsel %vm1702_vm4, %v4734_v0, 0.0 }
 0x170   : > { %v1739_v30 = vsel %vm1703_vm5, %v4734_v0, 0.0  ;;  %vm1808_vm6 = vcmp.eq.s32.totalorder %v4744_v50, %v3809_v20  ;;  %vm1809_vm7 = vcmp.eq.s32.totalorder %v4744_v50, %v3812_v21  ;;  %vm2073_vm8 = vcmp.eq.s32.totalorder %v4776_v32, %v3809_v20 }
 0x171   : > { %3300 = vmatpush3.bf16.msra.mxu1 %v2451_v8  ;;  %v1770_v39 = vadd.f32 %v1738_v29, %v1664_v11  ;;  %v1771_v2 = vadd.f32 %v1739_v30, %v1665_v16  ;;  %v1844_v36 = vsel %vm1808_vm6, %v4724_v38, 0.0  ;;  %v1845_v5 = vsel %vm1809_vm7, %v4724_v38, 0.0 }
 0x172   : > { %vm2074_vm9 = vcmp.eq.s32.totalorder %v4776_v32, %v3812_v21  ;;  %v2109_v48 = vsel %vm2073_vm8, %v4770_v59, 0.0  ;;  %vm2150_vm10 = vcmp.eq.s32.totalorder %v4792_v57, %v3809_v20  ;;  %vm2151_vm11 = vcmp.eq.s32.totalorder %v4792_v57, %v3812_v21 }
 0x173   : > { %v1876_v9 = vadd.f32 %v1844_v36, %v1770_v39  ;;  %v1877_v6 = vadd.f32 %v1845_v5, %v1771_v2  ;;  %v2110_v23 = vsel %vm2074_vm9, %v4770_v59, 0.0  ;;  %v2186_v51 = vsel %vm2150_vm10, %v4773_v58, 0.0 }
 0x174   : > { %v2187_v46 = vsel %vm2151_vm11, %v4773_v58, 0.0  ;;  %v2218_v43 = vadd.f32 %v2186_v51, %v2109_v48  ;;  %vm2256_vm12 = vcmp.eq.s32.totalorder %v4795_v63, %v3809_v20  ;;  %vm2257_vm13 = vcmp.eq.s32.totalorder %v4795_v63, %v3812_v21 }
 0x175   : > { %v1906_v22 = vpack.c.bf16 %v1877_v6, %v1876_v9  ;;  %v2219_v52 = vadd.f32 %v2187_v46, %v2110_v23  ;;  %v2292_v61 = vsel %vm2256_vm12, %v4779_v31, 0.0  ;;  %v2293_v53 = vsel %vm2257_vm13, %v4779_v31, 0.0 }
 0x176   : > { %v2324_v25 = vadd.f32 %v2292_v61, %v2218_v43  ;;  %vm2362_vm14 = vcmp.eq.s32.totalorder %v4816_v55, %v3809_v20  ;;  %vm2363_vm15 = vcmp.eq.s32.totalorder %v4816_v55, %v3812_v21  ;;  %vm1503_vm0 = vcmp.eq.s32.totalorder %v4715_v56, %v3815_v26 }
 0x177   : > { %3261 = vmatprep.subr.bf16.mxu0 %v1906_v22  ;;  %v2325_v60 = vadd.f32 %v2293_v53, %v2219_v52  ;;  %v2398_v3 = vsel %vm2362_vm14, %v4783_v15, 0.0  ;;  %v2399_v1 = vsel %vm2363_vm15, %v4783_v15, 0.0  ;;  %vm1504_vm1 = vcmp.eq.s32.totalorder %v4715_v56, %v3818_v27 }
 0x178   : > { %v2430_v7 = vadd.f32 %v2398_v3, %v2324_v25  ;;  %v1539_v4 = vsel %vm1503_vm0, %v4731_v10, 0.0  ;;  %v1540_v20 = vsel %vm1504_vm1, %v4731_v10, 0.0  ;;  %vm1580_vm2 = vcmp.eq.s32.totalorder %v4737_v41, %v3815_v26 }
 0x179   : > { %v2431_v21 = vadd.f32 %v2399_v1, %v2325_v60  ;;  %vm1581_vm3 = vcmp.eq.s32.totalorder %v4737_v41, %v3818_v27  ;;  %v1616_v44 = vsel %vm1580_vm2, %v4718_v47, 0.0  ;;  %vm1686_vm4 = vcmp.eq.s32.totalorder %v4721_v40, %v3815_v26 }
 0x17a   : > { %v1617_v24 = vsel %vm1581_vm3, %v4718_v47, 0.0  ;;  %v1648_v18 = vadd.f32 %v1616_v44, %v1539_v4  ;;  %vm1687_vm5 = vcmp.eq.s32.totalorder %v4721_v40, %v3818_v27  ;;  %v1722_v19 = vsel %vm1686_vm4, %v4734_v0, 0.0 }
 0x17b   : > { %v2460_v12 = vpack.c.bf16 %v2431_v21, %v2430_v7  ;;  %v1649_v13 = vadd.f32 %v1617_v24, %v1540_v20  ;;  %v1723_v14 = vsel %vm1687_vm5, %v4734_v0, 0.0  ;;  %vm1792_vm6 = vcmp.eq.s32.totalorder %v4744_v50, %v3815_v26 }
 0x17c   : > { %v1754_v17 = vadd.f32 %v1722_v19, %v1648_v18  ;;  %vm1793_vm7 = vcmp.eq.s32.totalorder %v4744_v50, %v3818_v27  ;;  %v1828_v8 = vsel %vm1792_vm6, %v4724_v38, 0.0  ;;  %vm2057_vm8 = vcmp.eq.s32.totalorder %v4776_v32, %v3815_v26 }
 0x17d   : > { %3301 = vmatprep.subr.bf16.mxu1 %v2460_v12  ;;  %v1755_v11 = vadd.f32 %v1723_v14, %v1649_v13  ;;  %v1829_v16 = vsel %vm1793_vm7, %v4724_v38, 0.0  ;;  %vm2058_vm9 = vcmp.eq.s32.totalorder %v4776_v32, %v3818_v27  ;;  %v2093_v29 = vsel %vm2057_vm8, %v4770_v59, 0.0 }
 0x17e   : > { %v1860_v30 = vadd.f32 %v1828_v8, %v1754_v17  ;;  %v2094_v39 = vsel %vm2058_vm9, %v4770_v59, 0.0  ;;  %vm2134_vm10 = vcmp.eq.s32.totalorder %v4792_v57, %v3815_v26  ;;  %vm2135_vm11 = vcmp.eq.s32.totalorder %v4792_v57, %v3818_v27 }
 0x17f   : > { %v1861_v2 = vadd.f32 %v1829_v16, %v1755_v11  ;;  %v2170_v36 = vsel %vm2134_vm10, %v4773_v58, 0.0  ;;  %v2171_v5 = vsel %vm2135_vm11, %v4773_v58, 0.0  ;;  %vm2240_vm12 = vcmp.eq.s32.totalorder %v4795_v63, %v3815_v26 }
 0x180   : > { %v2202_v48 = vadd.f32 %v2170_v36, %v2093_v29  ;;  %v2203_v9 = vadd.f32 %v2171_v5, %v2094_v39  ;;  %vm2241_vm13 = vcmp.eq.s32.totalorder %v4795_v63, %v3818_v27  ;;  %v2276_v6 = vsel %vm2240_vm12, %v4779_v31, 0.0 }
 0x181   : > { %v1898_v23 = vpack.c.bf16 %v1861_v2, %v1860_v30  ;;  %v2277_v51 = vsel %vm2241_vm13, %v4779_v31, 0.0  ;;  %vm2346_vm14 = vcmp.eq.s32.totalorder %v4816_v55, %v3815_v26  ;;  %vm2347_vm15 = vcmp.eq.s32.totalorder %v4816_v55, %v3818_v27 }
 0x182   : > { %v2308_v46 = vadd.f32 %v2276_v6, %v2202_v48  ;;  %v2309_v43 = vadd.f32 %v2277_v51, %v2203_v9  ;;  %v2382_v22 = vsel %vm2346_vm14, %v4783_v15, 0.0  ;;  %v2383_v52 = vsel %vm2347_vm15, %v4783_v15, 0.0 }
 0x183   : > { %3262 = vmatpush3.bf16.msra.mxu0 %v1898_v23  ;;  %vm1521_vm0 = vcmp.eq.s32.totalorder %v4715_v56, %v3821_v28  ;;  %vm1522_vm1 = vcmp.eq.s32.totalorder %v4715_v56, %v3826_v33  ;;  %vm1598_vm2 = vcmp.eq.s32.totalorder %v4737_v41, %v3821_v28  ;;  %vm1599_vm3 = vcmp.eq.s32.totalorder %v4737_v41, %v3826_v33 }
 0x184   : > { %v2414_v26 = vadd.f32 %v2382_v22, %v2308_v46  ;;  %v2415_v27 = vadd.f32 %v2383_v52, %v2309_v43  ;;  %v1557_v61 = vsel %vm1521_vm0, %v4731_v10, 0.0  ;;  %v1558_v53 = vsel %vm1522_vm1, %v4731_v10, 0.0 }
 0x185   : > { %v1634_v25 = vsel %vm1598_vm2, %v4718_v47, 0.0  ;;  %v1635_v60 = vsel %vm1599_vm3, %v4718_v47, 0.0  ;;  %vm1704_vm4 = vcmp.eq.s32.totalorder %v4721_v40, %v3821_v28  ;;  %vm1705_vm5 = vcmp.eq.s32.totalorder %v4721_v40, %v3826_v33 }
 0x186   : > { %v2452_v3 = vpack.c.bf16 %v2415_v27, %v2414_v26  ;;  %v1666_v1 = vadd.f32 %v1634_v25, %v1557_v61  ;;  %v1667_v7 = vadd.f32 %v1635_v60, %v1558_v53  ;;  %v1740_v4 = vsel %vm1704_vm4, %v4734_v0, 0.0 }
 0x187   : > { %v1741_v20 = vsel %vm1705_vm5, %v4734_v0, 0.0  ;;  %vm1810_vm6 = vcmp.eq.s32.totalorder %v4744_v50, %v3821_v28  ;;  %vm1811_vm7 = vcmp.eq.s32.totalorder %v4744_v50, %v3826_v33  ;;  %vm2075_vm8 = vcmp.eq.s32.totalorder %v4776_v32, %v3821_v28 }
 0x188   : > { %3302 = vmatpush3.bf16.msra.mxu1 %v2452_v3  ;;  %v1772_v21 = vadd.f32 %v1740_v4, %v1666_v1  ;;  %v1773_v44 = vadd.f32 %v1741_v20, %v1667_v7  ;;  %v1846_v24 = vsel %vm1810_vm6, %v4724_v38, 0.0  ;;  %v1847_v18 = vsel %vm1811_vm7, %v4724_v38, 0.0 }
 0x189   : > { %vm2076_vm9 = vcmp.eq.s32.totalorder %v4776_v32, %v3826_v33  ;;  %v2111_v19 = vsel %vm2075_vm8, %v4770_v59, 0.0  ;;  %vm2152_vm10 = vcmp.eq.s32.totalorder %v4792_v57, %v3821_v28  ;;  %vm2153_vm11 = vcmp.eq.s32.totalorder %v4792_v57, %v3826_v33 }
 0x18a   : > { %v1878_v12 = vadd.f32 %v1846_v24, %v1772_v21  ;;  %v1879_v13 = vadd.f32 %v1847_v18, %v1773_v44  ;;  %v2112_v14 = vsel %vm2076_vm9, %v4770_v59, 0.0  ;;  %v2188_v17 = vsel %vm2152_vm10, %v4773_v58, 0.0 }
 0x18b   : > { %v2189_v8 = vsel %vm2153_vm11, %v4773_v58, 0.0  ;;  %v2220_v11 = vadd.f32 %v2188_v17, %v2111_v19  ;;  %vm2258_vm12 = vcmp.eq.s32.totalorder %v4795_v63, %v3821_v28  ;;  %vm2259_vm13 = vcmp.eq.s32.totalorder %v4795_v63, %v3826_v33 }
 0x18c   : > { %v1907_v16 = vpack.c.bf16 %v1879_v13, %v1878_v12  ;;  %v2221_v29 = vadd.f32 %v2189_v8, %v2112_v14  ;;  %v2294_v30 = vsel %vm2258_vm12, %v4779_v31, 0.0  ;;  %v2295_v39 = vsel %vm2259_vm13, %v4779_v31, 0.0 }
 0x18d   : > { %v2326_v2 = vadd.f32 %v2294_v30, %v2220_v11  ;;  %vm2364_vm14 = vcmp.eq.s32.totalorder %v4816_v55, %v3821_v28  ;;  %vm2365_vm15 = vcmp.eq.s32.totalorder %v4816_v55, %v3826_v33  ;;  %vm1505_vm0 = vcmp.eq.s32.totalorder %v4715_v56, %v3829_v34 }
 0x18e   : > { %3263 = vmatprep.subr.bf16.mxu0 %v1907_v16  ;;  %v2327_v36 = vadd.f32 %v2295_v39, %v2221_v29  ;;  %v2400_v5 = vsel %vm2364_vm14, %v4783_v15, 0.0  ;;  %v2401_v48 = vsel %vm2365_vm15, %v4783_v15, 0.0  ;;  %vm1506_vm1 = vcmp.eq.s32.totalorder %v4715_v56, %v3832_v35 }
 0x18f   : > { %v2432_v9 = vadd.f32 %v2400_v5, %v2326_v2  ;;  %v1541_v6 = vsel %vm1505_vm0, %v4731_v10, 0.0  ;;  %v1542_v28 = vsel %vm1506_vm1, %v4731_v10, 0.0  ;;  %vm1582_vm2 = vcmp.eq.s32.totalorder %v4737_v41, %v3829_v34 }
 0x190   : > { %v2433_v33 = vadd.f32 %v2401_v48, %v2327_v36  ;;  %vm1583_vm3 = vcmp.eq.s32.totalorder %v4737_v41, %v3832_v35  ;;  %v1618_v23 = vsel %vm1582_vm2, %v4718_v47, 0.0  ;;  %vm1688_vm4 = vcmp.eq.s32.totalorder %v4721_v40, %v3829_v34 }
 0x191   : > { %v1619_v51 = vsel %vm1583_vm3, %v4718_v47, 0.0  ;;  %v1650_v46 = vadd.f32 %v1618_v23, %v1541_v6  ;;  %vm1689_vm5 = vcmp.eq.s32.totalorder %v4721_v40, %v3832_v35  ;;  %v1724_v43 = vsel %vm1688_vm4, %v4734_v0, 0.0 }
 0x192   : > { %v2461_v22 = vpack.c.bf16 %v2433_v33, %v2432_v9  ;;  %v1651_v52 = vadd.f32 %v1619_v51, %v1542_v28  ;;  %v1725_v26 = vsel %vm1689_vm5, %v4734_v0, 0.0  ;;  %vm1794_vm6 = vcmp.eq.s32.totalorder %v4744_v50, %v3829_v34 }
 0x193   : > { %v1756_v27 = vadd.f32 %v1724_v43, %v1650_v46  ;;  %vm1795_vm7 = vcmp.eq.s32.totalorder %v4744_v50, %v3832_v35  ;;  %v1830_v61 = vsel %vm1794_vm6, %v4724_v38, 0.0  ;;  %vm2059_vm8 = vcmp.eq.s32.totalorder %v4776_v32, %v3829_v34 }
 0x194   : > { %3303 = vmatprep.subr.bf16.mxu1 %v2461_v22  ;;  %v1757_v53 = vadd.f32 %v1725_v26, %v1651_v52  ;;  %v1831_v25 = vsel %vm1795_vm7, %v4724_v38, 0.0  ;;  %vm2060_vm9 = vcmp.eq.s32.totalorder %v4776_v32, %v3832_v35  ;;  %v2095_v60 = vsel %vm2059_vm8, %v4770_v59, 0.0 }
 0x195   : > { %v1862_v3 = vadd.f32 %v1830_v61, %v1756_v27  ;;  %v2096_v1 = vsel %vm2060_vm9, %v4770_v59, 0.0  ;;  %vm2136_vm10 = vcmp.eq.s32.totalorder %v4792_v57, %v3829_v34  ;;  %vm2137_vm11 = vcmp.eq.s32.totalorder %v4792_v57, %v3832_v35 }
 0x196   : > { %v1863_v7 = vadd.f32 %v1831_v25, %v1757_v53  ;;  %v2172_v4 = vsel %vm2136_vm10, %v4773_v58, 0.0  ;;  %v2173_v20 = vsel %vm2137_vm11, %v4773_v58, 0.0  ;;  %vm2242_vm12 = vcmp.eq.s32.totalorder %v4795_v63, %v3829_v34 }
 0x197   : > { %v2204_v21 = vadd.f32 %v2172_v4, %v2095_v60  ;;  %v2205_v44 = vadd.f32 %v2173_v20, %v2096_v1  ;;  %vm2243_vm13 = vcmp.eq.s32.totalorder %v4795_v63, %v3832_v35  ;;  %v2278_v24 = vsel %vm2242_vm12, %v4779_v31, 0.0 }
 0x198   : > { %v1899_v18 = vpack.c.bf16 %v1863_v7, %v1862_v3  ;;  %v2279_v19 = vsel %vm2243_vm13, %v4779_v31, 0.0  ;;  %vm2348_vm14 = vcmp.eq.s32.totalorder %v4816_v55, %v3829_v34  ;;  %vm2349_vm15 = vcmp.eq.s32.totalorder %v4816_v55, %v3832_v35 }
 0x199   : > { %v2310_v12 = vadd.f32 %v2278_v24, %v2204_v21  ;;  %v2311_v13 = vadd.f32 %v2279_v19, %v2205_v44  ;;  %v2384_v14 = vsel %vm2348_vm14, %v4783_v15, 0.0  ;;  %v2385_v17 = vsel %vm2349_vm15, %v4783_v15, 0.0 }
 0x19a   : > { %3264 = vmatpush3.bf16.msra.mxu0 %v1899_v18  ;;  %vm1523_vm0 = vcmp.eq.s32.totalorder %v4715_v56, %v3839_v42  ;;  %vm1524_vm1 = vcmp.eq.s32.totalorder %v4715_v56, %v3845_v49  ;;  %vm1600_vm2 = vcmp.eq.s32.totalorder %v4737_v41, %v3839_v42  ;;  %vm1601_vm3 = vcmp.eq.s32.totalorder %v4737_v41, %v3845_v49 }
 0x19b   : > { %v2416_v34 = vadd.f32 %v2384_v14, %v2310_v12  ;;  %v2417_v35 = vadd.f32 %v2385_v17, %v2311_v13  ;;  %v1559_v8 = vsel %vm1523_vm0, %v4731_v10, 0.0  ;;  %v1560_v11 = vsel %vm1524_vm1, %v4731_v10, 0.0 }
 0x19c   : > { %v1636_v16 = vsel %vm1600_vm2, %v4718_v47, 0.0  ;;  %v1637_v29 = vsel %vm1601_vm3, %v4718_v47, 0.0  ;;  %vm1706_vm4 = vcmp.eq.s32.totalorder %v4721_v40, %v3839_v42  ;;  %vm1707_vm5 = vcmp.eq.s32.totalorder %v4721_v40, %v3845_v49 }
 0x19d   : > { %v2453_v30 = vpack.c.bf16 %v2417_v35, %v2416_v34  ;;  %v1668_v39 = vadd.f32 %v1636_v16, %v1559_v8  ;;  %v1669_v2 = vadd.f32 %v1637_v29, %v1560_v11  ;;  %v1742_v36 = vsel %vm1706_vm4, %v4734_v0, 0.0 }
 0x19e   : > { %v1743_v5 = vsel %vm1707_vm5, %v4734_v0, 0.0  ;;  %vm1812_vm6 = vcmp.eq.s32.totalorder %v4744_v50, %v3839_v42  ;;  %vm1813_vm7 = vcmp.eq.s32.totalorder %v4744_v50, %v3845_v49  ;;  %vm2077_vm8 = vcmp.eq.s32.totalorder %v4776_v32, %v3839_v42 }
 0x19f   : > { %3304 = vmatpush3.bf16.msra.mxu1 %v2453_v30  ;;  %v1774_v48 = vadd.f32 %v1742_v36, %v1668_v39  ;;  %v1775_v9 = vadd.f32 %v1743_v5, %v1669_v2  ;;  %v1848_v6 = vsel %vm1812_vm6, %v4724_v38, 0.0  ;;  %v1849_v28 = vsel %vm1813_vm7, %v4724_v38, 0.0 }
 0x1a0   : > { %vm2078_vm9 = vcmp.eq.s32.totalorder %v4776_v32, %v3845_v49  ;;  %v2113_v33 = vsel %vm2077_vm8, %v4770_v59, 0.0  ;;  %vm2154_vm10 = vcmp.eq.s32.totalorder %v4792_v57, %v3839_v42  ;;  %vm2155_vm11 = vcmp.eq.s32.totalorder %v4792_v57, %v3845_v49 }
 0x1a1   : > { %v1880_v23 = vadd.f32 %v1848_v6, %v1774_v48  ;;  %v1881_v51 = vadd.f32 %v1849_v28, %v1775_v9  ;;  %v2114_v46 = vsel %vm2078_vm9, %v4770_v59, 0.0  ;;  %v2190_v43 = vsel %vm2154_vm10, %v4773_v58, 0.0 }
 0x1a2   : > { %v2191_v22 = vsel %vm2155_vm11, %v4773_v58, 0.0  ;;  %v2222_v52 = vadd.f32 %v2190_v43, %v2113_v33  ;;  %vm2260_vm12 = vcmp.eq.s32.totalorder %v4795_v63, %v3839_v42  ;;  %vm2261_vm13 = vcmp.eq.s32.totalorder %v4795_v63, %v3845_v49 }
 0x1a3   : > { %v1908_v26 = vpack.c.bf16 %v1881_v51, %v1880_v23  ;;  %v2223_v27 = vadd.f32 %v2191_v22, %v2114_v46  ;;  %v2296_v61 = vsel %vm2260_vm12, %v4779_v31, 0.0  ;;  %v2297_v53 = vsel %vm2261_vm13, %v4779_v31, 0.0 }
 0x1a4   : > { %v2328_v25 = vadd.f32 %v2296_v61, %v2222_v52  ;;  %vm2366_vm14 = vcmp.eq.s32.totalorder %v4816_v55, %v3839_v42  ;;  %vm2367_vm15 = vcmp.eq.s32.totalorder %v4816_v55, %v3845_v49  ;;  %vm1507_vm0 = vcmp.eq.s32.totalorder %v4715_v56, %v4431_v37 }
 0x1a5   : > { %3265 = vmatprep.subr.bf16.mxu0 %v1908_v26  ;;  %v2329_v60 = vadd.f32 %v2297_v53, %v2223_v27  ;;  %v2402_v3 = vsel %vm2366_vm14, %v4783_v15, 0.0  ;;  %v2403_v1 = vsel %vm2367_vm15, %v4783_v15, 0.0  ;;  %vm1508_vm1 = vcmp.eq.s32.totalorder %v4715_v56, %v4436_v45 }
 0x1a6   : > { %v2434_v7 = vadd.f32 %v2402_v3, %v2328_v25  ;;  %v1543_v4 = vsel %vm1507_vm0, %v4731_v10, 0.0  ;;  %v1544_v42 = vsel %vm1508_vm1, %v4731_v10, 0.0  ;;  %vm1584_vm2 = vcmp.eq.s32.totalorder %v4737_v41, %v4431_v37 }
 0x1a7   : > { %v2435_v49 = vadd.f32 %v2403_v1, %v2329_v60  ;;  %vm1585_vm3 = vcmp.eq.s32.totalorder %v4737_v41, %v4436_v45  ;;  %v1620_v20 = vsel %vm1584_vm2, %v4718_v47, 0.0  ;;  %vm1690_vm4 = vcmp.eq.s32.totalorder %v4721_v40, %v4431_v37 }
 0x1a8   : > { %v1621_v21 = vsel %vm1585_vm3, %v4718_v47, 0.0  ;;  %v1652_v44 = vadd.f32 %v1620_v20, %v1543_v4  ;;  %vm1691_vm5 = vcmp.eq.s32.totalorder %v4721_v40, %v4436_v45  ;;  %v1726_v24 = vsel %vm1690_vm4, %v4734_v0, 0.0 }
 0x1a9   : > { %v2462_v18 = vpack.c.bf16 %v2435_v49, %v2434_v7  ;;  %v1653_v19 = vadd.f32 %v1621_v21, %v1544_v42  ;;  %v1727_v12 = vsel %vm1691_vm5, %v4734_v0, 0.0  ;;  %vm1796_vm6 = vcmp.eq.s32.totalorder %v4744_v50, %v4431_v37 }
 0x1aa   : > { %v1758_v13 = vadd.f32 %v1726_v24, %v1652_v44  ;;  %vm1797_vm7 = vcmp.eq.s32.totalorder %v4744_v50, %v4436_v45  ;;  %v1832_v14 = vsel %vm1796_vm6, %v4724_v38, 0.0  ;;  %vm2061_vm8 = vcmp.eq.s32.totalorder %v4776_v32, %v4431_v37 }
 0x1ab   : > { %3305 = vmatprep.subr.bf16.mxu1 %v2462_v18  ;;  %v1759_v17 = vadd.f32 %v1727_v12, %v1653_v19  ;;  %v1833_v34 = vsel %vm1797_vm7, %v4724_v38, 0.0  ;;  %vm2062_vm9 = vcmp.eq.s32.totalorder %v4776_v32, %v4436_v45  ;;  %v2097_v35 = vsel %vm2061_vm8, %v4770_v59, 0.0 }
 0x1ac   : > { %v1864_v8 = vadd.f32 %v1832_v14, %v1758_v13  ;;  %v2098_v11 = vsel %vm2062_vm9, %v4770_v59, 0.0  ;;  %vm2138_vm10 = vcmp.eq.s32.totalorder %v4792_v57, %v4431_v37  ;;  %vm2139_vm11 = vcmp.eq.s32.totalorder %v4792_v57, %v4436_v45  ;;  %v5762_v13 = vld [vmem:[#allocation8_spill] sm:$0xff] }
 0x1ad   : > { %v1865_v16 = vadd.f32 %v1833_v34, %v1759_v17  ;;  %v2174_v29 = vsel %vm2138_vm10, %v4773_v58, 0.0  ;;  %v2175_v30 = vsel %vm2139_vm11, %v4773_v58, 0.0  ;;  %vm2244_vm12 = vcmp.eq.s32.totalorder %v4795_v63, %v4431_v37 }
 0x1ae   : > { %v2206_v39 = vadd.f32 %v2174_v29, %v2097_v35  ;;  %v2207_v2 = vadd.f32 %v2175_v30, %v2098_v11  ;;  %vm2245_vm13 = vcmp.eq.s32.totalorder %v4795_v63, %v4436_v45  ;;  %v2280_v36 = vsel %vm2244_vm12, %v4779_v31, 0.0  ;;  %v5763_v35 = vld [vmem:[#allocation9_spill] sm:$0xff] }
 0x1af   : > { %v1900_v5 = vpack.c.bf16 %v1865_v16, %v1864_v8  ;;  %v2281_v48 = vsel %vm2245_vm13, %v4779_v31, 0.0  ;;  %vm2350_vm14 = vcmp.eq.s32.totalorder %v4816_v55, %v4431_v37  ;;  %vm2351_vm15 = vcmp.eq.s32.totalorder %v4816_v55, %v4436_v45 }
 0x1b0   : > { %v2312_v9 = vadd.f32 %v2280_v36, %v2206_v39  ;;  %v2313_v6 = vadd.f32 %v2281_v48, %v2207_v2  ;;  %v2386_v28 = vsel %vm2350_vm14, %v4783_v15, 0.0  ;;  %v2387_v33 = vsel %vm2351_vm15, %v4783_v15, 0.0 }
 0x1b1   : > { %3266 = vmatpush3.bf16.msra.mxu0 %v1900_v5  ;;  %vm1525_vm0 = vcmp.eq.s32.totalorder %v4715_v56, %v4485_v54  ;;  %vm1526_vm1 = vcmp.eq.s32.totalorder %v4715_v56, %v4490_v62  ;;  %vm1602_vm2 = vcmp.eq.s32.totalorder %v4737_v41, %v4485_v54  ;;  %vm1603_vm3 = vcmp.eq.s32.totalorder %v4737_v41, %v4490_v62 }
 0x1b2   : > { %v2418_v37 = vadd.f32 %v2386_v28, %v2312_v9  ;;  %v2419_v45 = vadd.f32 %v2387_v33, %v2313_v6  ;;  %v1561_v23 = vsel %vm1525_vm0, %v4731_v10, 0.0  ;;  %v1562_v51 = vsel %vm1526_vm1, %v4731_v10, 0.0 }
 0x1b3   : > { %v1638_v46 = vsel %vm1602_vm2, %v4718_v47, 0.0  ;;  %v1639_v43 = vsel %vm1603_vm3, %v4718_v47, 0.0  ;;  %vm1708_vm4 = vcmp.eq.s32.totalorder %v4721_v40, %v4485_v54  ;;  %vm1709_vm5 = vcmp.eq.s32.totalorder %v4721_v40, %v4490_v62 }
 0x1b4   : > { %v2454_v22 = vpack.c.bf16 %v2419_v45, %v2418_v37  ;;  %v1670_v52 = vadd.f32 %v1638_v46, %v1561_v23  ;;  %v1671_v26 = vadd.f32 %v1639_v43, %v1562_v51  ;;  %v1744_v27 = vsel %vm1708_vm4, %v4734_v0, 0.0 }
 0x1b5   : > { %v1745_v61 = vsel %vm1709_vm5, %v4734_v0, 0.0  ;;  %vm1814_vm6 = vcmp.eq.s32.totalorder %v4744_v50, %v4485_v54  ;;  %vm1815_vm7 = vcmp.eq.s32.totalorder %v4744_v50, %v4490_v62  ;;  %vm2079_vm8 = vcmp.eq.s32.totalorder %v4776_v32, %v4485_v54 }
 0x1b6   : > { %3306 = vmatpush3.bf16.msra.mxu1 %v2454_v22  ;;  %v1776_v53 = vadd.f32 %v1744_v27, %v1670_v52  ;;  %v1777_v25 = vadd.f32 %v1745_v61, %v1671_v26  ;;  %v1850_v60 = vsel %vm1814_vm6, %v4724_v38, 0.0  ;;  %v1851_v3 = vsel %vm1815_vm7, %v4724_v38, 0.0 }
 0x1b7   : > { %vm2080_vm9 = vcmp.eq.s32.totalorder %v4776_v32, %v4490_v62  ;;  %v2115_v1 = vsel %vm2079_vm8, %v4770_v59, 0.0  ;;  %vm2156_vm10 = vcmp.eq.s32.totalorder %v4792_v57, %v4485_v54  ;;  %vm2157_vm11 = vcmp.eq.s32.totalorder %v4792_v57, %v4490_v62 }
 0x1b8   : > { %v1882_v7 = vadd.f32 %v1850_v60, %v1776_v53  ;;  %v1883_v4 = vadd.f32 %v1851_v3, %v1777_v25  ;;  %v2116_v42 = vsel %vm2080_vm9, %v4770_v59, 0.0  ;;  %v2192_v49 = vsel %vm2156_vm10, %v4773_v58, 0.0  ;;  %v5764_v3 = vld [vmem:[#allocation10_spill] sm:$0xff] }
 0x1b9   : > { %v2193_v20 = vsel %vm2157_vm11, %v4773_v58, 0.0  ;;  %v2224_v21 = vadd.f32 %v2192_v49, %v2115_v1  ;;  %vm2262_vm12 = vcmp.eq.s32.totalorder %v4795_v63, %v4485_v54  ;;  %vm2263_vm13 = vcmp.eq.s32.totalorder %v4795_v63, %v4490_v62  ;;  %v5765_v1 = vld [vmem:[#allocation11_spill] sm:$0xff] }
 0x1ba   : > { %v1909_v44 = vpack.c.bf16 %v1883_v4, %v1882_v7  ;;  %v2225_v24 = vadd.f32 %v2193_v20, %v2116_v42  ;;  %v2298_v18 = vsel %vm2262_vm12, %v4779_v31, 0.0  ;;  %v2299_v19 = vsel %vm2263_vm13, %v4779_v31, 0.0 }
 0x1bb   : > { %v2330_v12 = vadd.f32 %v2298_v18, %v2224_v21  ;;  %vm2368_vm14 = vcmp.eq.s32.totalorder %v4816_v55, %v4485_v54  ;;  %vm2369_vm15 = vcmp.eq.s32.totalorder %v4816_v55, %v4490_v62  ;;  %vm1509_vm0 = vcmp.eq.s32.totalorder %v4715_v56, %v5762_v13 }
 0x1bc   : > { %3267 = vmatprep.subr.bf16.mxu0 %v1909_v44  ;;  %v2331_v14 = vadd.f32 %v2299_v19, %v2225_v24  ;;  %v2404_v17 = vsel %vm2368_vm14, %v4783_v15, 0.0  ;;  %v2405_v34 = vsel %vm2369_vm15, %v4783_v15, 0.0  ;;  %vm1510_vm1 = vcmp.eq.s32.totalorder %v4715_v56, %v5763_v35 }
 0x1bd   : > { %v2436_v8 = vadd.f32 %v2404_v17, %v2330_v12  ;;  %v1545_v11 = vsel %vm1509_vm0, %v4731_v10, 0.0  ;;  %v1546_v54 = vsel %vm1510_vm1, %v4731_v10, 0.0  ;;  %vm1586_vm2 = vcmp.eq.s32.totalorder %v4737_v41, %v5762_v13 }
 0x1be   : > { %v2437_v62 = vadd.f32 %v2405_v34, %v2331_v14  ;;  %vm1587_vm3 = vcmp.eq.s32.totalorder %v4737_v41, %v5763_v35  ;;  %v1622_v16 = vsel %vm1586_vm2, %v4718_v47, 0.0  ;;  %vm1692_vm4 = vcmp.eq.s32.totalorder %v4721_v40, %v5762_v13 }
 0x1bf   : > { %v1623_v29 = vsel %vm1587_vm3, %v4718_v47, 0.0  ;;  %v1654_v30 = vadd.f32 %v1622_v16, %v1545_v11  ;;  %vm1693_vm5 = vcmp.eq.s32.totalorder %v4721_v40, %v5763_v35  ;;  %v1728_v39 = vsel %vm1692_vm4, %v4734_v0, 0.0 }
 0x1c0   : > { %v2463_v2 = vpack.c.bf16 %v2437_v62, %v2436_v8  ;;  %v1655_v36 = vadd.f32 %v1623_v29, %v1546_v54  ;;  %v1729_v5 = vsel %vm1693_vm5, %v4734_v0, 0.0  ;;  %vm1798_vm6 = vcmp.eq.s32.totalorder %v4744_v50, %v5762_v13 }
 0x1c1   : > { %v1760_v48 = vadd.f32 %v1728_v39, %v1654_v30  ;;  %vm1799_vm7 = vcmp.eq.s32.totalorder %v4744_v50, %v5763_v35  ;;  %v1834_v9 = vsel %vm1798_vm6, %v4724_v38, 0.0  ;;  %vm2063_vm8 = vcmp.eq.s32.totalorder %v4776_v32, %v5762_v13 }
 0x1c2   : > { %3307 = vmatprep.subr.bf16.mxu1 %v2463_v2  ;;  %v1761_v6 = vadd.f32 %v1729_v5, %v1655_v36  ;;  %v1835_v28 = vsel %vm1799_vm7, %v4724_v38, 0.0  ;;  %vm2064_vm9 = vcmp.eq.s32.totalorder %v4776_v32, %v5763_v35  ;;  %v2099_v33 = vsel %vm2063_vm8, %v4770_v59, 0.0 }
 0x1c3   : > { %v1866_v37 = vadd.f32 %v1834_v9, %v1760_v48  ;;  %v2100_v45 = vsel %vm2064_vm9, %v4770_v59, 0.0  ;;  %vm2140_vm10 = vcmp.eq.s32.totalorder %v4792_v57, %v5762_v13  ;;  %vm2141_vm11 = vcmp.eq.s32.totalorder %v4792_v57, %v5763_v35  ;;  %v5766_v48 = vld [vmem:[#allocation12_spill] sm:$0xff] }
 0x1c4   : > { %v1867_v23 = vadd.f32 %v1835_v28, %v1761_v6  ;;  %v2176_v51 = vsel %vm2140_vm10, %v4773_v58, 0.0  ;;  %v2177_v46 = vsel %vm2141_vm11, %v4773_v58, 0.0  ;;  %vm2246_vm12 = vcmp.eq.s32.totalorder %v4795_v63, %v5762_v13 }
 0x1c5   : > { %v2208_v43 = vadd.f32 %v2176_v51, %v2099_v33  ;;  %v2209_v22 = vadd.f32 %v2177_v46, %v2100_v45  ;;  %vm2247_vm13 = vcmp.eq.s32.totalorder %v4795_v63, %v5763_v35  ;;  %v2282_v52 = vsel %vm2246_vm12, %v4779_v31, 0.0  ;;  %v5767_v33 = vld [vmem:[#allocation13_spill] sm:$0xff] }
 0x1c6   : > { %v1901_v26 = vpack.c.bf16 %v1867_v23, %v1866_v37  ;;  %v2283_v27 = vsel %vm2247_vm13, %v4779_v31, 0.0  ;;  %vm2352_vm14 = vcmp.eq.s32.totalorder %v4816_v55, %v5762_v13  ;;  %vm2353_vm15 = vcmp.eq.s32.totalorder %v4816_v55, %v5763_v35 }
 0x1c7   : > { %v2314_v61 = vadd.f32 %v2282_v52, %v2208_v43  ;;  %v2315_v53 = vadd.f32 %v2283_v27, %v2209_v22  ;;  %v2388_v25 = vsel %vm2352_vm14, %v4783_v15, 0.0  ;;  %v2389_v60 = vsel %vm2353_vm15, %v4783_v15, 0.0 }
 0x1c8   : > { %3268 = vmatpush3.bf16.msra.mxu0 %v1901_v26  ;;  %vm1527_vm0 = vcmp.eq.s32.totalorder %v4715_v56, %v5764_v3  ;;  %vm1528_vm1 = vcmp.eq.s32.totalorder %v4715_v56, %v5765_v1  ;;  %vm1604_vm2 = vcmp.eq.s32.totalorder %v4737_v41, %v5764_v3  ;;  %vm1605_vm3 = vcmp.eq.s32.totalorder %v4737_v41, %v5765_v1 }
 0x1c9   : > { %v2420_v7 = vadd.f32 %v2388_v25, %v2314_v61  ;;  %v2421_v4 = vadd.f32 %v2389_v60, %v2315_v53  ;;  %v1563_v42 = vsel %vm1527_vm0, %v4731_v10, 0.0  ;;  %v1564_v49 = vsel %vm1528_vm1, %v4731_v10, 0.0 }
 0x1ca   : > { %v1640_v20 = vsel %vm1604_vm2, %v4718_v47, 0.0  ;;  %v1641_v21 = vsel %vm1605_vm3, %v4718_v47, 0.0  ;;  %vm1710_vm4 = vcmp.eq.s32.totalorder %v4721_v40, %v5764_v3  ;;  %vm1711_vm5 = vcmp.eq.s32.totalorder %v4721_v40, %v5765_v1 }
 0x1cb   : > { %v2455_v44 = vpack.c.bf16 %v2421_v4, %v2420_v7  ;;  %v1672_v24 = vadd.f32 %v1640_v20, %v1563_v42  ;;  %v1673_v18 = vadd.f32 %v1641_v21, %v1564_v49  ;;  %v1746_v19 = vsel %vm1710_vm4, %v4734_v0, 0.0  ;;  %v3489_v42 = vld [vmem:[#allocation2 + $0x80] ss:$8 sps:$4 sm:$0xff]   ;;  %v3495_v49 = vld [vmem:[#allocation2 + $0x94] ss:$8 sps:$4 sm:$0xff]  }
 0x1cc   : > { %v1747_v12 = vsel %vm1711_vm5, %v4734_v0, 0.0  ;;  %vm1816_vm6 = vcmp.eq.s32.totalorder %v4744_v50, %v5764_v3  ;;  %vm1817_vm7 = vcmp.eq.s32.totalorder %v4744_v50, %v5765_v1  ;;  %vm2081_vm8 = vcmp.eq.s32.totalorder %v4776_v32, %v5764_v3 }
 0x1cd   : > { %3308 = vmatpush3.bf16.msra.mxu1 %v2455_v44  ;;  %v1778_v13 = vadd.f32 %v1746_v19, %v1672_v24  ;;  %v1779_v14 = vadd.f32 %v1747_v12, %v1673_v18  ;;  %v1852_v17 = vsel %vm1816_vm6, %v4724_v38, 0.0  ;;  %v1853_v34 = vsel %vm1817_vm7, %v4724_v38, 0.0  ;;  %v2581_v24 = vld [vmem:[%s5726_s2 + $0x18] sm:$0xff]  ;;  %v3492_v18 = vld [vmem:[#allocation2 + $0xc0] ss:$8 sps:$4 sm:$0xff]  }
 0x1ce   : > { %vm2082_vm9 = vcmp.eq.s32.totalorder %v4776_v32, %v5765_v1  ;;  %v2117_v35 = vsel %vm2081_vm8, %v4770_v59, 0.0  ;;  %vm2158_vm10 = vcmp.eq.s32.totalorder %v4792_v57, %v5764_v3  ;;  %vm2159_vm11 = vcmp.eq.s32.totalorder %v4792_v57, %v5765_v1  ;;  %v3497_v19 = vld [vmem:[#allocation2 + $0xd4] ss:$8 sps:$4 sm:$0xff]   ;;  %v3499_v12 = vld [vmem:[#allocation2 + $0x90] ss:$8 sps:$4 sm:$0xff]  }
 0x1cf   : > { %v1884_v8 = vadd.f32 %v1852_v17, %v1778_v13  ;;  %v1885_v11 = vadd.f32 %v1853_v34, %v1779_v14  ;;  %v2118_v54 = vsel %vm2082_vm9, %v4770_v59, 0.0  ;;  %v2194_v62 = vsel %vm2158_vm10, %v4773_v58, 0.0  ;;  %v2582_v13 = vld [vmem:[%s5726_s2 + $0x20] sm:$0xff]  ;;  %v2583_v14 = vld [vmem:[%s5726_s2 + $0x28] sm:$0xff] }
 0x1d0   : > { %v2195_v16 = vsel %vm2159_vm11, %v4773_v58, 0.0  ;;  %v2226_v29 = vadd.f32 %v2194_v62, %v2117_v35  ;;  %vm2264_vm12 = vcmp.eq.s32.totalorder %v4795_v63, %v5764_v3  ;;  %vm2265_vm13 = vcmp.eq.s32.totalorder %v4795_v63, %v5765_v1  ;;  %v3501_v17 = vld [vmem:[#allocation2 + $0xa4] ss:$8 sps:$4 sm:$0xff]   ;;  %v2585_v62 = vld [vmem:[%s5726_s2 + $0x38] sm:$0xff] }
 0x1d1   : > { %v1910_v30 = vpack.c.bf16 %v1885_v11, %v1884_v8  ;;  %v2227_v39 = vadd.f32 %v2195_v16, %v2118_v54  ;;  %v2300_v2 = vsel %vm2264_vm12, %v4779_v31, 0.0  ;;  %v2301_v36 = vsel %vm2265_vm13, %v4779_v31, 0.0  ;;  %v2584_v54 = vld [vmem:[%s5726_s2 + $0x30] sm:$0xff] }
 0x1d2   : > { %v2332_v5 = vadd.f32 %v2300_v2, %v2226_v29  ;;  %vm2370_vm14 = vcmp.eq.s32.totalorder %v4816_v55, %v5764_v3  ;;  %vm2371_vm15 = vcmp.eq.s32.totalorder %v4816_v55, %v5765_v1  ;;  %vm1511_vm0 = vcmp.eq.s32.totalorder %v4715_v56, %v5766_v48  ;;  %v3500_v29 = vld [vmem:[#allocation2 + $0xd0] ss:$8 sps:$4 sm:$0xff]  }
 0x1d3   : > { %3269 = vmatprep.subr.bf16.mxu0 %v1910_v30  ;;  %v2333_v9 = vadd.f32 %v2301_v36, %v2227_v39  ;;  %v2406_v6 = vsel %vm2370_vm14, %v4783_v15, 0.0  ;;  %v2407_v28 = vsel %vm2371_vm15, %v4783_v15, 0.0  ;;  %vm1512_vm1 = vcmp.eq.s32.totalorder %v4715_v56, %v5767_v33  ;;  %v3503_v39 = vld [vmem:[#allocation2 + $0xe4] ss:$8 sps:$4 sm:$0xff]  }
 0x1d4   : > { %v2438_v37 = vadd.f32 %v2406_v6, %v2332_v5  ;;  %v1547_v45 = vsel %vm1511_vm0, %v4731_v10, 0.0  ;;  %v1548_v23 = vsel %vm1512_vm1, %v4731_v10, 0.0  ;;  %vm1588_vm2 = vcmp.eq.s32.totalorder %v4737_v41, %v5766_v48  ;;  %v3505_v5 = vld [vmem:[#allocation2 + $0xa0] ss:$8 sps:$4 sm:$0xff]  }
 0x1d5   : > { %v2439_v51 = vadd.f32 %v2407_v28, %v2333_v9  ;;  %vm1589_vm3 = vcmp.eq.s32.totalorder %v4737_v41, %v5767_v33  ;;  %v1624_v46 = vsel %vm1588_vm2, %v4718_v47, 0.0  ;;  %vm1694_vm4 = vcmp.eq.s32.totalorder %v4721_v40, %v5766_v48  ;;  %v2655_v9 = vld [vmem:[%s5728_s4 + $0x8] sm:$0xff] }
 0x1d6   : > { %v1625_v43 = vsel %vm1589_vm3, %v4718_v47, 0.0  ;;  %v1656_v56 = vadd.f32 %v1624_v46, %v1547_v45  ;;  %vm1695_vm5 = vcmp.eq.s32.totalorder %v4721_v40, %v5767_v33  ;;  %v1730_v10 = vsel %vm1694_vm4, %v4734_v0, 0.0 }
 0x1d7   : > { %v2464_v22 = vpack.c.bf16 %v2439_v51, %v2438_v37  ;;  %v1657_v52 = vadd.f32 %v1625_v43, %v1548_v23  ;;  %v1731_v26 = vsel %vm1695_vm5, %v4734_v0, 0.0  ;;  %vm1800_vm6 = vcmp.eq.s32.totalorder %v4744_v50, %v5766_v48 }
 0x1d8   : > { %v1762_v41 = vadd.f32 %v1730_v10, %v1656_v56  ;;  %vm1801_vm7 = vcmp.eq.s32.totalorder %v4744_v50, %v5767_v33  ;;  %v1836_v27 = vsel %vm1800_vm6, %v4724_v38, 0.0  ;;  %vm2065_vm8 = vcmp.eq.s32.totalorder %v4776_v32, %v5766_v48  ;;  %v2656_v10 = vld [vmem:[%s5728_s4 + $0x10] sm:$0xff] }
 0x1d9   : > { %3309 = vmatprep.subr.bf16.mxu1 %v2464_v22  ;;  %v1763_v47 = vadd.f32 %v1731_v26, %v1657_v52  ;;  %v1837_v40 = vsel %vm1801_vm7, %v4724_v38, 0.0  ;;  %vm2066_vm9 = vcmp.eq.s32.totalorder %v4776_v32, %v5767_v33  ;;  %v2101_v0 = vsel %vm2065_vm8, %v4770_v59, 0.0  ;;  %v2657_v22 = vld [vmem:[%s5728_s4 + $0x18] sm:$0xff] }
 0x1da   : > { %v1868_v61 = vadd.f32 %v1836_v27, %v1762_v41  ;;  %v2102_v53 = vsel %vm2066_vm9, %v4770_v59, 0.0  ;;  %vm2142_vm10 = vcmp.eq.s32.totalorder %v4792_v57, %v5766_v48  ;;  %vm2143_vm11 = vcmp.eq.s32.totalorder %v4792_v57, %v5767_v33  ;;  %v3506_v41 = vld [vmem:[#allocation2 + $0xe0] ss:$8 sps:$4 sm:$0xff]  }
 0x1db   : > { %v1869_v50 = vadd.f32 %v1837_v40, %v1763_v47  ;;  %v2178_v25 = vsel %vm2142_vm10, %v4773_v58, 0.0  ;;  %v2179_v60 = vsel %vm2143_vm11, %v4773_v58, 0.0  ;;  %vm2248_vm12 = vcmp.eq.s32.totalorder %v4795_v63, %v5766_v48  ;;  %v3509_v47 = vld [vmem:[#allocation2 + $0xf4] ss:$8 sps:$4 sm:$0xff]  }
 0x1dc   : > { %v2210_v32 = vadd.f32 %v2178_v25, %v2101_v0  ;;  %v2211_v38 = vadd.f32 %v2179_v60, %v2102_v53  ;;  %vm2249_vm13 = vcmp.eq.s32.totalorder %v4795_v63, %v5767_v33  ;;  %v2284_v59 = vsel %vm2248_vm12, %v4779_v31, 0.0  ;;  %v2578_v63 = vld [vmem:[%s5726_s2] sm:$0xff] }
 0x1dd   : > { %v1902_v3 = vpack.c.bf16 %v1869_v50, %v1868_v61  ;;  %v2285_v1 = vsel %vm2249_vm13, %v4779_v31, 0.0  ;;  %vm2354_vm14 = vcmp.eq.s32.totalorder %v4816_v55, %v5766_v48  ;;  %vm2355_vm15 = vcmp.eq.s32.totalorder %v4816_v55, %v5767_v33  ;;  %v2580_v31 = vld [vmem:[%s5726_s2 + $0x10] sm:$0xff]  ;;  %v2654_v48 = vld [vmem:[%s5728_s4] sm:$0xff]  ;;  %v2659_v50 = vld [vmem:[%s5728_s4 + $0x28] sm:$0xff] }
 0x1de   : > { %v2316_v58 = vadd.f32 %v2284_v59, %v2210_v32  ;;  %v2317_v57 = vadd.f32 %v2285_v1, %v2211_v38  ;;  %v2390_v7 = vsel %vm2354_vm14, %v4783_v15, 0.0  ;;  %v2391_v4 = vsel %vm2355_vm15, %v4783_v15, 0.0  ;;  %v2579_v15 = vld [vmem:[%s5726_s2 + $0x8] sm:$0xff]  ;;  %v3507_v33 = vld [vmem:[#allocation2 + $0xb4] ss:$8 sps:$4 sm:$0xff]   ;;  %v2658_v53 = vld [vmem:[%s5728_s4 + $0x20] sm:$0xff] }
 0x1df   : > { %3270 = vmatpush3.bf16.msra.mxu0 %v1902_v3  ;;  %v3621_v55 = vmov 0   ;;  %v3511_v61 = vld [vmem:[#allocation2 + $0xb0] ss:$8 sps:$4 sm:$0xff]   ;;  %vm2722_vm0 = vcmask 523264   ;;  %vm3623_vm1 = vmmov 0  }
 0x1e0   : > { %v2422_v20 = vadd.f32 %v2390_v7, %v2316_v58  ;;  %v2423_v21 = vadd.f32 %v2391_v4, %v2317_v57  ;;  %3463 = vset.pattern.permute.xlu0 %v3621_v55  ;;  %3464 = vset.pattern.permute.xlu1 %v3621_v55  ;;  %v2660_v7 = vld [vmem:[%s5728_s4 + $0x30] sm:$0xff]  ;;  %v2661_v4 = vld [vmem:[%s5728_s4 + $0x38] sm:$0xff]  ;;  %v2820_v55 = vld [vmem:[%s5730_s6] sm:$0xff] }
 0x1e1   : > { %2588 = vperm.xlu0 %3463, %v2578_v63   ;;  %2598 = vperm.xlu1 %3464, %v2580_v31   ;;  %v3512_v31 = vld [vmem:[#allocation2 + $0xf0] ss:$8 sps:$4 sm:$0xff]  }
 0x1e2   : > { %v2456_v44 = vpack.c.bf16 %v2423_v21, %v2422_v20  ;;  %1984 = vmatmul.mubr.bf16.vlgmr.msra.gmra.mrb[16].mxu0 %v3489_v42 }
 0x1e3   : > { %1991 = vmatprep.mubr.bf16.mxu0 %v3495_v49 }
 0x1e4   : > { %3310 = vmatpush3.bf16.msra.mxu1 %v2456_v44  ;;  %v2821_v44 = vld [vmem:[%s5730_s6 + $0x8] sm:$0xff] }
 0x1e5   : > { %2593 = vperm.xlu0 %3463, %v2579_v15   ;;  %2603 = vperm.xlu1 %3464, %v2581_v24  }
 0x1e7   : > { %2538 = vmatmul.mubr.bf16.vlgmr.msra.gmra.mrb[16].mxu1 %v3492_v18  ;;  %v3191_v34 = vpop.f32.mrb[0].mxu0 }
 0x1e8   : > { %2545 = vmatprep.mubr.bf16.mxu1 %v3497_v19  ;;  %v3192_v35 = vpop.f32.mrb[1].mxu0 }
 0x1e9   : > { %2608 = vperm.xlu0 %3463, %v2582_v13   ;;  %2613 = vperm.xlu1 %3464, %v2583_v14   ;;  %v3193_v8 = vadd.f32 %v3192_v35, %v3191_v34  ;;  %v3194_v11 = vpop.f32.mrb[2].mxu0  ;;  %v2822_v13 = vld [vmem:[%s5730_s6 + $0x10] sm:$0xff]  ;;  %v2823_v14 = vld [vmem:[%s5730_s6 + $0x18] sm:$0xff]  ;;  %v2824_v34 = vld [vmem:[%s5730_s6 + $0x20] sm:$0xff] }
 0x1ea   : > { %1992 = vmatmul.mubr.bf16.gmra.mrb[20].mxu0 %v3499_v12  ;;  %v3195_v16 = vpop.f32.mrb[3].mxu0  ;;  %v2825_v35 = vld [vmem:[%s5730_s6 + $0x28] sm:$0xff] }
 0x1eb   : > { %1999 = vmatprep.mubr.bf16.mxu0 %v3501_v17  ;;  %v3196_v30 = vadd.f32 %v3195_v16, %v3194_v11  ;;  %v2827_v11 = vld [vmem:[%s5730_s6 + $0x38] sm:$0xff] }
 0x1ec   : > { %v3231_v2 = vpop.f32.mrb[0].mxu1 }
 0x1ed   : > { %2618 = vperm.xlu0 %3463, %v2584_v54   ;;  %2623 = vperm.xlu1 %3464, %v2585_v62   ;;  %v3232_v36 = vpop.f32.mrb[1].mxu1 }
 0x1ee   : > { %v3233_v6 = vadd.f32 %v3232_v36, %v3231_v2  ;;  %v3234_v28 = vpop.f32.mrb[2].mxu1 }
 0x1ef   : > { %2546 = vmatmul.mubr.bf16.gmra.mrb[20].mxu1 %v3500_v29  ;;  %v3235_v37 = vpop.f32.mrb[3].mxu1  ;;  %v3197_v45 = vpop.f32.mrb[4].mxu0  ;;  %v2978_v29 = vld [vmem:[%s5732_s8] sm:$0xff] }
 0x1f0   : > { %2553 = vmatprep.mubr.bf16.mxu1 %v3503_v39  ;;  %v5572_v23 = vadd.f32 %v3233_v6, %v3193_v8  ;;  %v3236_v51 = vadd.f32 %v3235_v37, %v3234_v28  ;;  %v3198_v46 = vpop.f32.mrb[5].mxu0  ;;  %v2826_v8 = vld [vmem:[%s5730_s6 + $0x30] sm:$0xff] }
 0x1f1   : > { %2664 = vperm.xlu0 %3463, %v2654_v48   ;;  %2669 = vperm.xlu1 %3464, %v2655_v9   ;;  %v3199_v43 = vadd.f32 %v3198_v46, %v3197_v45  ;;  %v3200_v56 = vpop.f32.mrb[6].mxu0  ;;  %v3513_v45 = vld [vmem:[%s5727_s3] sm:$0xff]  }
 0x1f2   : > { %2000 = vmatmul.mubr.bf16.gmra.mrb[24].mxu0 %v3505_v5  ;;  %v5580_v52 = vadd.f32 %v3236_v51, %v3196_v30  ;;  %v3201_v26 = vpop.f32.mrb[7].mxu0 }
 0x1f3   : > { %2007 = vmatprep.mubr.bf16.mxu0 %v3507_v33  ;;  %v3202_v27 = vadd.f32 %v3201_v26, %v3200_v56 }
 0x1f4   : > { %v3237_v40 = vpop.f32.mrb[4].mxu1 }
 0x1f5   : > { %2674 = vperm.xlu0 %3463, %v2656_v10   ;;  %2679 = vperm.xlu1 %3464, %v2657_v22   ;;  %v3238_v0 = vpop.f32.mrb[5].mxu1 }
 0x1f6   : > { %v3239_v25 = vadd.f32 %v3238_v0, %v3237_v40  ;;  %v3240_v60 = vpop.f32.mrb[6].mxu1 }
 0x1f7   : > { %2554 = vmatmul.mubr.bf16.gmra.mrb[24].mxu1 %v3506_v41  ;;  %v3241_v32 = vpop.f32.mrb[7].mxu1  ;;  %v3203_v38 = vpop.f32.mrb[8].mxu0 }
 0x1f8   : > { %2561 = vmatprep.mubr.bf16.mxu1 %v3509_v47  ;;  %v5588_v59 = vadd.f32 %v3239_v25, %v3199_v43  ;;  %v3242_v3 = vadd.f32 %v3241_v32, %v3240_v60  ;;  %v3204_v1 = vpop.f32.mrb[9].mxu0 }
 0x1f9   : > { %2684 = vperm.xlu0 %3463, %v2658_v53   ;;  %2689 = vperm.xlu1 %3464, %v2659_v50   ;;  %v3205_v58 = vadd.f32 %v3204_v1, %v3203_v38  ;;  %v3206_v57 = vpop.f32.mrb[10].mxu0 }
 0x1fa   : > { %2008 = vmatmul.mubr.bf16.gmra.mrb[28].mxu0 %v3511_v61  ;;  %v5596_v42 = vadd.f32 %v3242_v3, %v3202_v27  ;;  %v3207_v63 = vpop.f32.mrb[11].mxu0 }
 0x1fb   : > { %v3208_v49 = vadd.f32 %v3207_v63, %v3206_v57  ;;  %3364 = vmatprep.mubr.msk.bf16.mxu0 %vm2722_vm0, %v3513_v45 }
 0x1fc   : > { %v3243_v20 = vpop.f32.mrb[8].mxu1 }
 0x1fd   : > { %2694 = vperm.xlu0 %3463, %v2660_v7   ;;  %2699 = vperm.xlu1 %3464, %v2661_v4   ;;  %v3244_v21 = vpop.f32.mrb[9].mxu1 }
 0x1fe   : > { %v3245_v15 = vadd.f32 %v3244_v21, %v3243_v20  ;;  %v3246_v24 = vpop.f32.mrb[10].mxu1 }
 0x1ff   : > { %2562 = vmatmul.mubr.bf16.gmra.mrb[28].mxu1 %v3512_v31  ;;  %v3247_v18 = vpop.f32.mrb[11].mxu1 }
 0x200   : > { %v5604_v19 = vadd.f32 %v3245_v15, %v3205_v58  ;;  %v3248_v12 = vadd.f32 %v3247_v18, %v3246_v24 }
 0x201   : > { %2830 = vperm.xlu0 %3463, %v2820_v55   ;;  %2835 = vperm.xlu1 %3464, %v2821_v44  }
 0x202   : > { %v5612_v17 = vadd.f32 %v3248_v12, %v3208_v49 }
 0x205   : > { %2840 = vperm.xlu0 %3463, %v2822_v13   ;;  %2845 = vperm.xlu1 %3464, %v2823_v14  }
 0x209   : > { %2850 = vperm.xlu0 %3463, %v2824_v34   ;;  %2855 = vperm.xlu1 %3464, %v2825_v35   ;;  %v3209_v54 = vpop.f32.mrb[12].mxu0  ;;  %v3249_v62 = vpop.f32.mrb[12].mxu1 }
 0x20a   : > { %v3210_v16 = vpop.f32.mrb[13].mxu0  ;;  %v3250_v39 = vpop.f32.mrb[13].mxu1 }
 0x20b   : > { %v3211_v30 = vadd.f32 %v3210_v16, %v3209_v54  ;;  %v3212_v2 = vpop.f32.mrb[14].mxu0  ;;  %v3251_v36 = vadd.f32 %v3250_v39, %v3249_v62  ;;  %v3252_v5 = vpop.f32.mrb[14].mxu1 }
 0x20c   : > { %v3213_v48 = vpop.f32.mrb[15].mxu0  ;;  %v3253_v6 = vpop.f32.mrb[15].mxu1 }
 0x20d   : > { %2860 = vperm.xlu0 %3463, %v2826_v8   ;;  %2865 = vperm.xlu1 %3464, %v2827_v11   ;;  %v3214_v9 = vadd.f32 %v3213_v48, %v3212_v2  ;;  %v5629_v28 = vadd.f32 %v3251_v36, %v3211_v30  ;;  %v3254_v33 = vadd.f32 %v3253_v6, %v3252_v5 }
 0x20f   : > { %v5631_v37 = vadd.f32 %v3254_v33, %v3214_v9 }
 0x211   : > { %2981 = vperm.xlu0 %3463, %v2978_v29  }
 0x260   : > { %v2589_v27 = vpop.permute.xlu0 %2588  ;;  %v2599_v49 = vpop.permute.xlu1 %2598 }
 0x264   : > { %v2594_v7 = vpop.permute.xlu0 %2593  ;;  %v2604_v62 = vpop.permute.xlu1 %2603 }
 0x2b5   : > { %v3271_v51 = vpop.f32.mrb[16].mxu0 }
 0x2b6   : > { %v3272_v46 = vpop.f32.mrb[17].mxu0 }
 0x2b7   : > { %v3273_v43 = vadd.f32 %v3272_v46, %v3271_v51  ;;  %v3274_v56 = vpop.f32.mrb[18].mxu0 }
 0x2b8   : > { %v3275_v10 = vpop.f32.mrb[19].mxu0 }
 0x2b9   : > { %v2016_v22 = vadd.f32 %v3273_v43, %v5572_v23  ;;  %v3276_v26 = vadd.f32 %v3275_v10, %v3274_v56  ;;  %v2609_v56 = vpop.permute.xlu0 %2608 }
 0x2ba   : > { %v3311_v41 = vpop.f32.mrb[16].mxu1 }
 0x2bb   : > { %v3312_v47 = vpop.f32.mrb[17].mxu1  ;;  %v2017_v40 = vadd.f32 %v3276_v26, %v5580_v52 }
 0x2bc   : > { %v3313_v0 = vadd.f32 %v3312_v47, %v3311_v41  ;;  %v3314_v61 = vpop.f32.mrb[18].mxu1 }
 0x2bd   : > { %v3315_v53 = vpop.f32.mrb[19].mxu1  ;;  %v3277_v50 = vpop.f32.mrb[20].mxu0 }
 0x2be   : > { %v2570_v25 = vadd.f32 %v3313_v0, %v2016_v22  ;;  %v3316_v60 = vadd.f32 %v3315_v53, %v3314_v61  ;;  %v3278_v32 = vpop.f32.mrb[21].mxu0 }
 0x2bf   : > { %v3279_v38 = vadd.f32 %v3278_v32, %v3277_v50  ;;  %v3280_v3 = vpop.f32.mrb[22].mxu0 }
 0x2c0   : > { %v2626_v1 = vadd.f32 %v2589_v27, %v2570_v25  ;;  %v2571_v58 = vadd.f32 %v3316_v60, %v2017_v40  ;;  %v3281_v57 = vpop.f32.mrb[23].mxu0  ;;  %v2614_v27 = vpop.permute.xlu1 %2613 }
 0x2c1   : > { %v2018_v23 = vadd.f32 %v3279_v38, %v5588_v59  ;;  %v3282_v4 = vadd.f32 %v3281_v57, %v3280_v3  ;;  %v2619_v57 = vpop.permute.xlu0 %2618 }
 0x2c2   : > { %v2627_v63 = vadd.f32 %v2594_v7, %v2571_v58  ;;  %v3317_v31 = vpop.f32.mrb[20].mxu1  ;;  %v2634_v21 = vmax.f32 %v2626_v1, 0.0 }
 0x2c3   : > { %v3318_v52 = vpop.f32.mrb[21].mxu1  ;;  %v2019_v20 = vadd.f32 %v3282_v4, %v5596_v42 }
 0x2c4   : > { %v2635_v55 = vmax.f32 %v2627_v63, 0.0  ;;  %v3319_v44 = vadd.f32 %v3318_v52, %v3317_v31  ;;  %v3320_v15 = vpop.f32.mrb[22].mxu1  ;;  %v3515_v52 = vld [vmem:[%s5727_s3 + $0x10] sm:$0xff]  }
 0x2c5   : > { %v3321_v24 = vpop.f32.mrb[23].mxu1  ;;  %v3283_v18 = vpop.f32.mrb[24].mxu0 }
 0x2c6   : > { %v2572_v12 = vadd.f32 %v3319_v44, %v2018_v23  ;;  %v3322_v13 = vadd.f32 %v3321_v24, %v3320_v15  ;;  %v2650_v14 = vpack.c.bf16 %v2635_v55, %v2634_v21  ;;  %v3284_v34 = vpop.f32.mrb[25].mxu0  ;;  %v3517_v21 = vld [vmem:[%s5729_s5] sm:$0xff]   ;;  %v2665_v55 = vpop.permute.xlu0 %2664 }
 0x2c7   : > { %v3285_v35 = vadd.f32 %v3284_v34, %v3283_v18  ;;  %v3286_v8 = vpop.f32.mrb[26].mxu0  ;;  %3380 = vmatprep.mubr.msk.bf16.mxu1 %vm2722_vm0, %v3517_v21 }
 0x2c8   : > { %v2628_v59 = vadd.f32 %v2599_v49, %v2572_v12  ;;  %v2573_v11 = vadd.f32 %v3322_v13, %v2019_v20  ;;  %3356 = vmatprep.subr.bf16.mxu0 %v2650_v14  ;;  %v3287_v54 = vpop.f32.mrb[27].mxu0  ;;  %v3516_v20 = vld [vmem:[%s5727_s3 + $0x18] sm:$0xff]  }
 0x2c9   : > { %v2020_v16 = vadd.f32 %v3285_v35, %v5604_v19  ;;  %3357 = vmatpush3.bf16.msra.mxu0 %v2650_v14  ;;  %v3288_v42 = vadd.f32 %v3287_v54, %v3286_v8 }
 0x2ca   : > { %v2629_v29 = vadd.f32 %v2604_v62, %v2573_v11  ;;  %v3323_v30 = vpop.f32.mrb[24].mxu1  ;;  %v2636_v36 = vmax.f32 %v2628_v59, 0.0  ;;  %v2675_v15 = vpop.permute.xlu0 %2674 }
 0x2cb   : > { %v3324_v39 = vpop.f32.mrb[25].mxu1  ;;  %v2021_v2 = vadd.f32 %v3288_v42, %v5612_v17 }
 0x2cc   : > { %v2637_v5 = vmax.f32 %v2629_v29, 0.0  ;;  %v3325_v48 = vadd.f32 %v3324_v39, %v3323_v30  ;;  %v3326_v9 = vpop.f32.mrb[26].mxu1 }
 0x2cd   : > { %v3327_v6 = vpop.f32.mrb[27].mxu1  ;;  %v3289_v33 = vpop.f32.mrb[28].mxu0 }
 0x2ce   : > { %v2574_v45 = vadd.f32 %v3325_v48, %v2020_v16  ;;  %v3328_v51 = vadd.f32 %v3327_v6, %v3326_v9  ;;  %v2651_v46 = vpack.c.bf16 %v2637_v5, %v2636_v36  ;;  %v3290_v43 = vpop.f32.mrb[29].mxu0  ;;  %v2685_v14 = vpop.permute.xlu0 %2684 }
 0x2cf   : > { %v3291_v10 = vadd.f32 %v3290_v43, %v3289_v33  ;;  %v3292_v19 = vpop.f32.mrb[30].mxu0 }
 0x2d0   : > { %v2630_v22 = vadd.f32 %v2609_v56, %v2574_v45  ;;  %v2575_v26 = vadd.f32 %v3328_v51, %v2021_v2  ;;  %3358 = vmatprep.subr.bf16.mxu0 %v2651_v46  ;;  %v3293_v41 = vpop.f32.mrb[31].mxu0 }
 0x2d1   : > { %v2022_v17 = vadd.f32 %v3291_v10, %v5629_v28  ;;  %3359 = vmatpush3.bf16.msra.mxu0 %v2651_v46  ;;  %v3294_v47 = vadd.f32 %v3293_v41, %v3292_v19  ;;  %v2624_v28 = vpop.permute.xlu1 %2623  ;;  %v3518_v41 = vld [vmem:[%s5729_s5 + $0x8] sm:$0xff]  }
 0x2d2   : > { %v2631_v40 = vadd.f32 %v2614_v27, %v2575_v26  ;;  %v3329_v0 = vpop.f32.mrb[28].mxu1  ;;  %v2638_v50 = vmax.f32 %v2630_v22, 0.0  ;;  %v2695_v39 = vpop.permute.xlu0 %2694  ;;  %v3519_v27 = vld [vmem:[%s5729_s5 + $0x10] sm:$0xff]  }
 0x2d3   : > { %v3330_v61 = vpop.f32.mrb[29].mxu1  ;;  %v2023_v53 = vadd.f32 %v3294_v47, %v5631_v37  ;;  %v3514_v37 = vld [vmem:[%s5727_s3 + $0x8] sm:$0xff]   ;;  %v3622_v47 = vmov 0.0  }
 0x2d4   : > { %v2639_v25 = vmax.f32 %v2631_v40, 0.0  ;;  %v3331_v60 = vadd.f32 %v3330_v61, %v3329_v0  ;;  %v3332_v32 = vpop.f32.mrb[30].mxu1 }
 0x2d5   : > { %v3333_v38 = vpop.f32.mrb[31].mxu1  ;;  %v2670_v44 = vpop.permute.xlu1 %2669 }
 0x2d6   : > { %v2576_v3 = vadd.f32 %v3331_v60, %v2022_v17  ;;  %v3334_v1 = vadd.f32 %v3333_v38, %v3332_v32  ;;  %v2652_v58 = vpack.c.bf16 %v2639_v25, %v2638_v50  ;;  %v3520_v17 = vld [vmem:[%s5729_s5 + $0x18] sm:$0xff]   ;;  %v2831_v40 = vpop.permute.xlu0 %2830 }
 0x2d8   : > { %v2632_v7 = vadd.f32 %v2619_v57, %v2576_v3  ;;  %v2577_v23 = vadd.f32 %v3334_v1, %v2023_v53  ;;  %3360 = vmatprep.subr.bf16.mxu0 %v2652_v58 }
 0x2d9   : > { %3361 = vmatpush3.bf16.msra.mxu0 %v2652_v58  ;;  %v2680_v24 = vpop.permute.xlu1 %2679 }
 0x2da   : > { %v2633_v4 = vadd.f32 %v2624_v28, %v2577_v23  ;;  %v2640_v63 = vmax.f32 %v2632_v7, 0.0  ;;  %v2841_v61 = vpop.permute.xlu0 %2840 }
 0x2dc   : > { %v2641_v31 = vmax.f32 %v2633_v4, 0.0 }
 0x2dd   : > { %v2690_v11 = vpop.permute.xlu1 %2689 }
 0x2de   : > { %v2653_v49 = vpack.c.bf16 %v2641_v31, %v2640_v63  ;;  %v2851_v32 = vpop.permute.xlu0 %2850 }
 0x2e0   : > { %3362 = vmatprep.subr.bf16.mxu0 %v2653_v49 }
 0x2e1   : > { %3363 = vmatpush3.bf16.msra.mxu0 %v2653_v49  ;;  %v2700_v9 = vpop.permute.xlu1 %2699 }
 0x2e2   : > { %3388 = vmatprep.subr.bf16.mxu0 %v3622_v47  ;;  %v2861_v49 = vpop.permute.xlu0 %2860 }
 0x2e4   : > { %3365 = vmatmul.mubr.msk.bf16.vlgmr.msra.gmra.mrb[32].mxu0 %vm2722_vm0, %v3514_v37 }
 0x2e5   : > { %3368 = vmatprep.mubr.msk.bf16.mxu0 %vm2722_vm0, %v3515_v52  ;;  %v2836_v0 = vpop.permute.xlu1 %2835 }
 0x2e9   : > { %v2846_v53 = vpop.permute.xlu1 %2845 }
 0x2ec   : > { %3369 = vmatmul.mubr.msk.bf16.gmra.mrb[36].mxu0 %vm2722_vm0, %v3516_v20 }
 0x2ed   : > { %3396 = vmatprep.mubr.msk.bf16.mxu0 %vm3623_vm1, %v3622_v47  ;;  %v2856_v57 = vpop.permute.xlu1 %2855 }
 0x3b7   : > { %v3366_v18 = vpop.f32.mrb[32].mxu0 }
 0x3b8   : > { %v2778_v12 = vadd.f32 %v3366_v18, %v2675_v15  ;;  %v2769_v13 = vpop.f32.mrb[33].mxu0 }
 0x3b9   : > { %v2770_v34 = vadd.f32 %v2769_v13, %v2665_v55  ;;  %v3367_v35 = vpop.f32.mrb[34].mxu0  ;;  %v2866_v55 = vpop.permute.xlu1 %2865 }
 0x3ba   : > { %v2781_v8 = vadd.f32 %v3367_v35, %v2680_v24  ;;  %v2772_v59 = vpop.f32.mrb[35].mxu0  ;;  %v2802_v62 = vmax.f32 %v2778_v12, 0.0 }
 0x3bb   : > { %v2773_v54 = vadd.f32 %v2772_v59, %v2670_v44  ;;  %v2800_v42 = vmax.f32 %v2770_v34, 0.0 }
 0x3bc   : > { %v2803_v16 = vmax.f32 %v2781_v8, 0.0 }
 0x3bd   : > { %v2801_v29 = vmax.f32 %v2773_v54, 0.0  ;;  %v2982_v54 = vpop.permute.xlu0 %2981 }
 0x3be   : > { %v2817_v30 = vpack.c.bf16 %v2803_v16, %v2802_v62 }
 0x3bf   : > { %v2816_v2 = vpack.c.bf16 %v2801_v29, %v2800_v42  ;;  %v3370_v36 = vpop.f32.mrb[36].mxu0 }
 0x3c0   : > { %v2794_v5 = vadd.f32 %v3370_v36, %v2695_v39  ;;  %v2785_v48 = vpop.f32.mrb[37].mxu0 }
 0x3c1   : > { %v2786_v6 = vadd.f32 %v2785_v48, %v2685_v14  ;;  %v3371_v33 = vpop.f32.mrb[38].mxu0  ;;  %3372 = vmatprep.subr.bf16.mxu1 %v2816_v2 }
 0x3c2   : > { %v2797_v45 = vadd.f32 %v3371_v33, %v2700_v9  ;;  %v2788_v51 = vpop.f32.mrb[39].mxu0  ;;  %3373 = vmatpush3.bf16.msra.mxu1 %v2816_v2  ;;  %v2806_v43 = vmax.f32 %v2794_v5, 0.0 }
 0x3c3   : > { %v2789_v46 = vadd.f32 %v2788_v51, %v2690_v11  ;;  %3374 = vmatprep.subr.bf16.mxu1 %v2817_v30  ;;  %v2804_v10 = vmax.f32 %v2786_v6, 0.0  ;;  %v2973_v11 = vld [vmem:[%s5731_s7] sm:$0xf] }
 0x3c4   : > { %v2807_v56 = vmax.f32 %v2797_v45, 0.0 }
 0x3c5   : > { %v2805_v19 = vmax.f32 %v2789_v46, 0.0 }
 0x3c6   : > { %v2819_v22 = vpack.c.bf16 %v2807_v56, %v2806_v43  ;;  %3375 = vmatpush3.bf16.msra.mxu1 %v2817_v30 }
 0x3c7   : > { %v2818_v26 = vpack.c.bf16 %v2805_v19, %v2804_v10 }
 0x3c9   : > { %3376 = vmatprep.subr.bf16.mxu1 %v2818_v26 }
 0x3ca   : > { %3377 = vmatpush3.bf16.msra.mxu1 %v2818_v26 }
 0x3cb   : > { %3378 = vmatprep.subr.bf16.mxu1 %v2819_v22 }
 0x3ce   : > { %3379 = vmatpush3.bf16.msra.mxu1 %v2819_v22 }
 0x3d1   : > { %3381 = vmatmul.mubr.msk.bf16.vlgmr.msra.gmra.mrb[32].mxu1 %vm2722_vm0, %v3518_v41 }
 0x3d2   : > { %3384 = vmatprep.mubr.msk.bf16.mxu1 %vm2722_vm0, %v3519_v27 }
 0x3d9   : > { %3385 = vmatmul.mubr.msk.bf16.gmra.mrb[36].mxu1 %vm2722_vm0, %v3520_v17 }
 0x4a4   : > { %v3382_v50 = vpop.f32.mrb[32].mxu1 }
 0x4a5   : > { %v2943_v25 = vadd.f32 %v3382_v50, %v2841_v61  ;;  %v2934_v60 = vpop.f32.mrb[33].mxu1 }
 0x4a6   : > { %v2935_v38 = vadd.f32 %v2934_v60, %v2831_v40  ;;  %v3383_v3 = vpop.f32.mrb[34].mxu1 }
 0x4a7   : > { %v2946_v1 = vadd.f32 %v3383_v3, %v2846_v53  ;;  %v2937_v58 = vpop.f32.mrb[35].mxu1  ;;  %v2967_v23 = vmax.f32 %v2943_v25, 0.0 }
 0x4a8   : > { %v2938_v7 = vadd.f32 %v2937_v58, %v2836_v0  ;;  %v2965_v4 = vmax.f32 %v2935_v38, 0.0 }
 0x4a9   : > { %v2968_v28 = vmax.f32 %v2946_v1, 0.0 }
 0x4aa   : > { %v2966_v63 = vmax.f32 %v2938_v7, 0.0 }
 0x4ab   : > { %v2975_v31 = vpack.c.bf16 %v2968_v28, %v2967_v23 }
 0x4ac   : > { %v2974_v37 = vpack.c.bf16 %v2966_v63, %v2965_v4  ;;  %v3386_v52 = vpop.f32.mrb[36].mxu1 }
 0x4ad   : > { %v2959_v20 = vadd.f32 %v3386_v52, %v2861_v49  ;;  %v2950_v21 = vpop.f32.mrb[37].mxu1 }
 0x4ae   : > { %v2951_v44 = vadd.f32 %v2950_v21, %v2851_v32  ;;  %v3387_v15 = vpop.f32.mrb[38].mxu1  ;;  %3389 = vmatpush3.bf16.msra.mxu0 %v2974_v37 }
 0x4af   : > { %v2962_v24 = vadd.f32 %v3387_v15, %v2866_v55  ;;  %v2953_v18 = vpop.f32.mrb[39].mxu1  ;;  %3390 = vmatprep.subr.bf16.mxu0 %v3622_v47  ;;  %v2971_v13 = vmax.f32 %v2959_v20, 0.0 }
 0x4b0   : > { %v2954_v12 = vadd.f32 %v2953_v18, %v2856_v57  ;;  %v2969_v34 = vmax.f32 %v2951_v44, 0.0 }
 0x4b1   : > { %v2972_v14 = vmax.f32 %v2962_v24, 0.0 }
 0x4b2   : > { %v2970_v35 = vmax.f32 %v2954_v12, 0.0  ;;  %3391 = vmatpush3.bf16.msra.mxu0 %v2975_v31 }
 0x4b3   : > { %v2977_v8 = vpack.c.bf16 %v2972_v14, %v2971_v13  ;;  %3392 = vmatprep.subr.bf16.mxu0 %v3622_v47 }
 0x4b4   : > { %v2976_v59 = vpack.c.bf16 %v2970_v35, %v2969_v34 }
 0x4b6   : > { %3393 = vmatpush3.bf16.msra.mxu0 %v2976_v59 }
 0x4b7   : > { %3394 = vmatprep.subr.bf16.mxu0 %v3622_v47 }
 0x4ba   : > { %3395 = vmatpush3.bf16.msra.mxu0 %v2977_v8 }
 0x4bd   : > { %3397 = vmatmul.mubr.msk.bf16.vlgmr.msra.gmra.mrb[40].mxu0 %vm2722_vm0, %v2973_v11 }
 0x590   : > { %v3021_v62 = vpop.f32.mrb[40].mxu0 }
 0x591   : > { %v3022_v16 = vadd.f32 %v3021_v62, %v2982_v54  ;;  %v3398_v42 = vpop.f32.mrb[41].mxu0 }
 0x592   : > { %v3024_v29 = vpop.f32.mrb[42].mxu0 }
 0x593   : > { %3027 = vst [vmem:[%s338_s16] sm:$0xff] %v3022_v16  ;;  %v3399_v30 = vpop.f32.mrb[43].mxu0 }
 0x594   : > { %3563 = shalt.err (!%p3560_p7)
}
 0x595   : > { %s3564_s29 = scalar_lea.hbm %s5682_s22, 128  ;;  %s3568_s16 = scalar_lea.hbm %s5733_s9, 512 }
 0x596   : > { %p3565_p8 = scmp.ne.s32.totalorder %s5682_s22, %s3564_s29  ;;  %p3569_p1 = scmp.lt.u32.totalorder %s5682_s22, %s5733_s9 }
 0x597   : > { %p3570_p0 = scmp.lt.u32.totalorder %s3568_s16, %s3564_s29  ;;  %p3572_p6 = scmp.lt.u32.totalorder %s3564_s29, %s5682_s22 }
 0x598   : > { %p3566_p11 = pnand %p3565_p8, %p5768_p9 }
 0x599   : > { %p3571_p5 = por %p3570_p0, %p3569_p1 }
 0x59a   : > { %p3567_p13 = pneg %p3566_p11 }
 0x59b   : > { %p3573_p10 = por %p3572_p6, %p3571_p5 }
 0x59d   : > { %p3574_p12 = pnand %p3573_p10, %p3567_p13 }
 0x59f   : > { %3577 = shalt.err (!%p3574_p12)
}
 0x5a0   : > { %3412 = dma.vmem_to_hbm [thread:$0]  (%p5768_p9), %s5684_s21, 128, %s5682_s22, %s3029_s13  }
 0x5a1 PF: > { %p3424_p2 = scmp.ge.s32.totalorder %s3616_s12, 2  ;;  %s3054_s25 = sand.u32 1, %s3604_s30  }
 0x5a2   : > { %p5769_p3 = scmp.ne.s32.totalorder %s5750_s20, 0  ;;  %s3055_s26 = scalar_lea.sflag [#allocation4], %s3054_s25 }
 0x5a4   : > { %p3419_p4 = pnand %p3424_p2, %p5769_p3 }
 0x5a6   : > { %3599 = dma.done.wait (!%p3419_p4), %s3055_s26, 128  }
 0x5a7   : > { %3601 = vsyncadd (!%p3419_p4), %s3055_s26, 4294967168  ;;  %p20_p7 = scmp.ge.s32.totalorder %s3700_s15, 6   ;;  %s5770_s30 = smov %s3608_s10 }
 0x5a8   : > { %s5771_s10 = smov %s3612_s11  ;;  %s5772_s11 = smov %s3711_s18 }
 0x5a9   : > { %s5773_s12 = smov %s3700_s15  ;;  %22 = sbr.rel (!%p20_p7) target bundleno = 4 (0x4), region = 99 }
 0x5b0   :  { %3060 = vsyncpa [#allocation3], 1 }
 0x5b1   :  { %3062 = vsyncpa [#allocation3 + $0x1], 1 }
 0x5b2   :  { %3063 = vsyncpa [#allocation4], 1 }
 0x5b3   :  { %3065 = vsyncpa [#allocation4 + $0x1], 1 }

</bundles_post_ra>
